<compile_context>
chip_gen: v6e
topology: v6e:2x2x1
jax: 0.10.0
libtpu: 0.0.40
codegen_flags: <defaults>
</compile_context>

<pallas_src>
import jax
import jax.numpy as jnp
from jax.experimental import pallas as pl
from jax.experimental.pallas import tpu as pltpu


# ----------------------------------------------------------------------------
# Hardware-dependent tiling / VMEM configuration
# ----------------------------------------------------------------------------
def _hw_config():
    vmem_bytes = 64 << 20  # conservative default (v7x-class)
    try:
        info = pltpu.get_tpu_info()
        vmem_bytes = int(getattr(info, "vmem_capacity_bytes", vmem_bytes))
    except Exception:
        pass
    if vmem_bytes >= (128 << 20):
        # v5e / v6e: 128 MiB VMEM -> bigger tiles, raise the scoped-VMEM cap.
        return {"tm": 512, "ts": 4096, "vmem_limit": 96 << 20}
    # v7x: 64 MiB physical VMEM -> keep tiles <= 512 x 2048 and 40 MiB cap.
    return {"tm": 512, "ts": 2048, "vmem_limit": 40 << 20}


def _round_up(v, m):
    return ((v + m - 1) // m) * m


def _row_tile(dim, tmax):
    # Tile for a sublane (row) dimension: full dim if small, else tmax (mult of 8).
    return dim if dim <= tmax else tmax


def _split_rows_for_parallel(dim, tile, n_blocks_other):
    # Guarantee >= 2 total grid blocks so both TensorCores (v7x) get work.
    if n_blocks_other * pl.cdiv(dim, tile) >= 2:
        return tile
    if dim >= 16:
        return _round_up(pl.cdiv(dim, 2), 8)
    return tile


# ----------------------------------------------------------------------------
# Kernel 1: global average pool over spatial.  x2d (M, S) -> y (M, 1)
#   Per-step: VPU adds into a (tm, 128) scratch accumulator.
#   Finalize: one lane reduce + 1/S multiply.
# ----------------------------------------------------------------------------
def _make_pool_kernel(S, tm, ts):
    need_mask = (S % ts) != 0
    lane_accum = (ts % 128 == 0)
    inv_s = 1.0 / float(S)

    if lane_accum:
        def kernel(x_ref, o_ref, acc_ref):
            s = pl.program_id(1)
            last = pl.num_programs(1) - 1

            @pl.when(s == 0)
            def _():
                acc_ref[...] = jnp.zeros_like(acc_ref)

            def accumulate(xb):
                acc_ref[...] += jnp.sum(xb.reshape(tm, ts // 128, 128), axis=1)

            if need_mask:
                # Mask only on the ragged last step.
                @pl.when(s != last)
                def _():
                    accumulate(x_ref[...].astype(jnp.float32))

                @pl.when(s == last)
                def _():
                    xb = x_ref[...].astype(jnp.float32)
                    col = jax.lax.broadcasted_iota(jnp.int32, xb.shape, 1) + s * ts
                    accumulate(jnp.where(col < S, xb, 0.0))
            else:
                accumulate(x_ref[...].astype(jnp.float32))

            @pl.when(s == last)
            def _():
                o_ref[...] = jnp.sum(acc_ref[...], axis=1, keepdims=True) * inv_s

        scratch = [pltpu.VMEM((tm, 128), jnp.float32)]
    else:
        # S (full-dim block) not a multiple of 128: tiny case, plain lane reduce.
        def kernel(x_ref, o_ref):
            s = pl.program_id(1)
            last = pl.num_programs(1) - 1

            @pl.when(s == 0)
            def _():
                o_ref[...] = jnp.zeros_like(o_ref)

            xb = x_ref[...].astype(jnp.float32)
            if need_mask:
                col = jax.lax.broadcasted_iota(jnp.int32, xb.shape, 1) + s * ts
                xb = jnp.where(col < S, xb, 0.0)
            o_ref[...] += jnp.sum(xb, axis=1, keepdims=True)

            @pl.when(s == last)
            def _():
                o_ref[...] = o_ref[...] * inv_s

        scratch = []
    return kernel, scratch


# ----------------------------------------------------------------------------
# Kernel 2: per-batch attention weights, Nb batch elements per grid step.
#   Output per row:  w = gamma * sa + mlp + 1   (the residual +1 is folded in
#   so kernel 3 is a pure multiply).  All dominant operands keep C on lanes.
# ----------------------------------------------------------------------------
def _make_attn_weight_kernel(Nb, C, Ch):
    TK = C if C <= 128 else 128  # key-tile (sublane) width for the softmax

    def kernel(y_row_ref, y_col_ref, w1r_ref, w2tr_ref,
               wk1t_ref, wk2_ref, wv1t_ref, wv2_ref,
               gamma_ref, out_ref):
        y_rows = y_row_ref[...]          # (Nb, C)       lane-dense
        y_cols = y_col_ref[...]          # (Nb*C, 1)
        w1r = w1r_ref[...]               # (2*Ch, C)  = [Wa1; Wq1]
        w2tr = w2tr_ref[...]             # (2*Ch, C)  = [Wa2^T; Wq2^T]
        wk1t = wk1t_ref[...]             # (C, Ch)    = Wk1^T
        wk2 = wk2_ref[...]               # (C, Ch)    = Wk2
        wv1t = wv1t_ref[...]             # (C, Ch)    = Wv1^T
        wv2 = wv2_ref[...]               # (C, Ch)    = Wv2
        gamma = gamma_ref[0, 0]          # SMEM scalar

        rows = []
        for i in range(Nb):
            yr = y_rows[i:i + 1, :]                  # (1, C)
            yc = y_cols[i * C:(i + 1) * C, :]        # (C, 1)

            # --- attention + query MLPs (stacked, fully lane-dense) --------
            h_r = jnp.maximum(
                jnp.sum(w1r * yr, axis=1, keepdims=True), 0.0)       # (2Ch, 1)
            prod_r = w2tr * h_r                                      # (2Ch, C)
            mlp_row = jnp.sum(prod_r[:Ch, :], axis=0, keepdims=True)  # (1, C)
            q_row = jnp.sum(prod_r[Ch:, :], axis=0, keepdims=True)    # (1, C)

            # --- key / value MLPs (column-oriented -> (C,1) outputs) -------
            h_k = jnp.maximum(
                jnp.sum(wk1t * yc, axis=0, keepdims=True), 0.0)      # (1, Ch)
            k_col = jnp.sum(wk2 * h_k, axis=1, keepdims=True)        # (C, 1)
            h_v = jnp.maximum(
                jnp.sum(wv1t * yc, axis=0, keepdims=True), 0.0)      # (1, Ch)
            v_col = jnp.sum(wv2 * h_v, axis=1, keepdims=True)        # (C, 1)

            # --- softmax over keys j of q_i * k_j, weighted by v_j ---------
            # Algebraic row max (true max): m_i = max(q_i*k_max, q_i*k_min).
            k_max = jnp.max(k_col, axis=0, keepdims=True)            # (1, 1)
            k_min = jnp.min(k_col, axis=0, keepdims=True)            # (1, 1)
            m_row = jnp.maximum(q_row * k_max, q_row * k_min)        # (1, C)

            denom = jnp.zeros((1, C), jnp.float32)
            num = jnp.zeros((1, C), jnp.float32)
            for t0 in range(0, C, TK):
                tl = min(TK, C - t0)
                kt = k_col[t0:t0 + tl, :]                            # (tl, 1)
                vt = v_col[t0:t0 + tl, :]                            # (tl, 1)
                p = jnp.exp(kt * q_row - m_row)                      # (tl, C)
                denom = denom + jnp.sum(p, axis=0, keepdims=True)
                num = num + jnp.sum(p * vt, axis=0, keepdims=True)
            sa_row = num / denom                                     # (1, C)

            rows.append(gamma * sa_row + mlp_row + 1.0)

        out = rows[0] if Nb == 1 else jnp.concatenate(rows, axis=0)
        out_ref[...] = out.astype(out_ref.dtype)

    return kernel


# ----------------------------------------------------------------------------
# Kernel 3: pure per-(batch, channel) broadcast multiply:  out = x * w
#   (w already contains gamma*sa + mlp + 1).
# ----------------------------------------------------------------------------
def _scale_kernel(x_ref, w_ref, o_ref):
    o_ref[...] = (x_ref[...] * w_ref[...]).astype(o_ref.dtype)


def bottleneck_forward(x, params):
    """Forward pass of the channel-attention Bottleneck.

    x      : (N, C, H, W) float32
    params : dict with
       "attention"/"query"/"key"/"value": (W1 (Ch, C), W2 (C, Ch)) torch Linear layout
       "gamma": (1,)
    """
    cfg = _hw_config()
    wa1, wa2 = params["attention"]
    wq1, wq2 = params["query"]
    wk1, wk2 = params["key"]
    wv1, wv2 = params["value"]
    gamma = jnp.asarray(params["gamma"], jnp.float32).reshape(1, 1)

    N, C, H, W = x.shape
    Ch = wa1.shape[0]
    M = N * C
    S = H * W

    x2d = x.reshape(M, S)  # rows = (n, c), lanes = spatial (pure reshape of NCHW)

    # --- 1) global average pool over spatial ---------------------------------
    tm1 = _row_tile(M, cfg["tm"])
    ts1 = S if S <= cfg["ts"] else cfg["ts"]
    tm1 = _split_rows_for_parallel(M, tm1, 1)   # S axis is the reduction
    grid1 = (pl.cdiv(M, tm1), pl.cdiv(S, ts1))
    pool_kernel, pool_scratch = _make_pool_kernel(S, tm1, ts1)

    y_col_flat = pl.pallas_call(
        pool_kernel,
        out_shape=jax.ShapeDtypeStruct((M, 1), jnp.float32),
        grid_spec=pltpu.PrefetchScalarGridSpec(
            num_scalar_prefetch=0,
            grid=grid1,
            in_specs=[pl.BlockSpec((tm1, ts1), lambda i, s: (i, s))],
            out_specs=pl.BlockSpec((tm1, 1), lambda i, s: (i, 0)),
            scratch_shapes=pool_scratch,
        ),
        compiler_params=pltpu.CompilerParams(
            dimension_semantics=("parallel", "arbitrary"),
            vmem_limit_bytes=cfg["vmem_limit"],
        ),
        cost_estimate=pl.CostEstimate(
            flops=M * S, transcendentals=0, bytes_accessed=4 * (M * S + M)),
    )(x2d)

    # --- 2) per-batch attention weights (tiny; Nb batch elements per step) ----
    y2 = y_col_flat.reshape(N, C)           # same memory order (channel-fastest)
    if N <= 8:
        Nb = N
    elif N % 8 == 0:
        Nb = 8
    else:
        Nb = N
    grid2 = (N // Nb,)

    w1_rowstack = jnp.concatenate([wa1, wq1], axis=0)        # (2Ch, C)
    w2t_rowstack = jnp.concatenate([wa2.T, wq2.T], axis=0)   # (2Ch, C)

    attn_w = pl.pallas_call(
        _make_attn_weight_kernel(Nb, C, Ch),
        out_shape=jax.ShapeDtypeStruct((N, C), jnp.float32),
        grid_spec=pltpu.PrefetchScalarGridSpec(
            num_scalar_prefetch=0,
            grid=grid2,
            in_specs=[
                pl.BlockSpec((Nb, C), lambda b: (b, 0)),        # y rows (lane-dense)
                pl.BlockSpec((Nb * C, 1), lambda b: (b, 0)),    # y columns
                pl.BlockSpec((2 * Ch, C), lambda b: (0, 0)),    # [Wa1; Wq1]
                pl.BlockSpec((2 * Ch, C), lambda b: (0, 0)),    # [Wa2^T; Wq2^T]
                pl.BlockSpec((C, Ch), lambda b: (0, 0)),        # Wk1^T
                pl.BlockSpec((C, Ch), lambda b: (0, 0)),        # Wk2
                pl.BlockSpec((C, Ch), lambda b: (0, 0)),        # Wv1^T
                pl.BlockSpec((C, Ch), lambda b: (0, 0)),        # Wv2
                pl.BlockSpec(memory_space=pltpu.MemorySpace.SMEM),  # gamma scalar
            ],
            out_specs=pl.BlockSpec((Nb, C), lambda b: (b, 0)),  # lane-dense output
        ),
        compiler_params=pltpu.CompilerParams(
            dimension_semantics=("parallel",)),
        cost_estimate=pl.CostEstimate(
            flops=N * (8 * C * Ch + 6 * C * C),
            transcendentals=N * C * C,
            bytes_accessed=4 * (2 * M + 8 * C * Ch + N * C)),
    )(y2, y_col_flat, w1_rowstack, w2t_rowstack,
      wk1.T, wk2, wv1.T, wv2, gamma)

    attn_w_col = attn_w.reshape(M, 1)       # per-(n, c) scale, already +1 folded

    # --- 3) pure broadcast multiply:  out = x * w ------------------------------
    tm3 = _row_tile(M, cfg["tm"])
    ts3 = S if S <= cfg["ts"] else cfg["ts"]
    n_s3 = pl.cdiv(S, ts3)
    tm3 = _split_rows_for_parallel(M, tm3, n_s3)
    grid3 = (pl.cdiv(M, tm3), n_s3)

    out2d = pl.pallas_call(
        _scale_kernel,
        out_shape=jax.ShapeDtypeStruct((M, S), x.dtype),
        grid_spec=pltpu.PrefetchScalarGridSpec(
            num_scalar_prefetch=0,
            grid=grid3,
            in_specs=[
                pl.BlockSpec((tm3, ts3), lambda i, j: (i, j)),
                pl.BlockSpec((tm3, 1), lambda i, j: (i, 0)),
            ],
            out_specs=pl.BlockSpec((tm3, ts3), lambda i, j: (i, j)),
        ),
        compiler_params=pltpu.CompilerParams(
            dimension_semantics=("parallel", "parallel"),
            vmem_limit_bytes=cfg["vmem_limit"],
        ),
        cost_estimate=pl.CostEstimate(
            flops=M * S, transcendentals=0,
            bytes_accessed=4 * (2 * M * S + M)),
    )(x2d, attn_w_col)

    return out2d.reshape(N, C, H, W)


def bottleneck_reference(x, params):
    """Plain-JAX reference mirroring the PyTorch forward."""
    hp = jax.lax.Precision.HIGHEST
    wa1, wa2 = params["attention"]
    wq1, wq2 = params["query"]
    wk1, wk2 = params["key"]
    wv1, wv2 = params["value"]
    gamma = jnp.asarray(params["gamma"], jnp.float32).reshape(())

    y = jnp.mean(x, axis=(2, 3))                              # (N, C)

    def mlp(w1, w2):
        h = jnp.maximum(jnp.matmul(y, w1.T, precision=hp), 0.0)
        return jnp.matmul(h, w2.T, precision=hp)

    mlp_att = mlp(wa1, wa2)
    q = mlp(wq1, wq2)
    k = mlp(wk1, wk2)
    v = mlp(wv1, wv2)

    energy = q[:, :, None] * k[:, None, :]                    # (N, C, C)
    attn = jax.nn.softmax(energy, axis=-1)
    sa = jnp.einsum("bij,bj->bi", attn, v, precision=hp)      # (N, C)
    w = gamma * sa + mlp_att                                  # (N, C)
    return x * w[:, :, None, None] + x


if __name__ == "__main__":
    key = jax.random.PRNGKey(0)
    keys = jax.random.split(key, 9)

    N, C, H, W = 2, 128, 16, 16
    reduction = 16
    Ch = C // reduction

    x = jax.random.normal(keys[0], (N, C, H, W), dtype=jnp.float32)

    b1 = 1.0 / (C ** 0.5)   # first Linear fan_in = C
    b2 = 1.0 / (Ch ** 0.5)  # second Linear fan_in = Ch

    def lin(k, shape, bound):
        return jax.random.uniform(k, shape, dtype=jnp.float32,
                                  minval=-bound, maxval=bound)

    params = {
        "attention": (lin(keys[1], (Ch, C), b1), lin(keys[2], (C, Ch), b2)),
        "query":     (lin(keys[3], (Ch, C), b1), lin(keys[4], (C, Ch), b2)),
        "key":       (lin(keys[5], (Ch, C), b1), lin(keys[6], (C, Ch), b2)),
        "value":     (lin(keys[7], (Ch, C), b1), lin(keys[8], (C, Ch), b2)),
        # torch initializes gamma to zero; use a nonzero value so the
        # self-attention branch is actually exercised by the check.
        "gamma": jnp.array([0.75], dtype=jnp.float32),
    }

    forward = jax.jit(bottleneck_forward)
    out = forward(x, params)
    out = jax.block_until_ready(out)

    ref = bottleneck_reference(x, params)
    assert out.shape == (N, C, H, W)
    assert jnp.allclose(out, ref, atol=1e-4, rtol=1e-4), \
        float(jnp.max(jnp.abs(out - ref)))

    print("KERNEL_OK")
</pallas_src>

<mosaic_0001>
module attributes {stable_mosaic.version = 11 : i64} {
  func.func @kernel(%arg0: i32, %arg1: i32, %arg2: memref<128x256xf32, #tpu.memory_space<vmem>>, %arg3: memref<128x1xf32, #tpu.memory_space<vmem>>, %arg4: memref<128x128xf32, #tpu.memory_space<vmem>>) attributes {dimension_semantics = [#tpu.dimension_semantics<parallel>, #tpu.dimension_semantics<arbitrary>], iteration_bounds = array<i64: 2, 1>, scalar_prefetch = 0 : i64, scratch_operands = 1 : i64, tpu.core_type = #tpu.core_type<tc>, window_params = [{transform_indices = @transform_0, window_bounds = array<i64: 128, 256>}, {transform_indices = @transform_1, window_bounds = array<i64: 128, 1>}]} {
    %c0_i32 = arith.constant 0 : i32
    %0 = arith.cmpi eq, %arg1, %c0_i32 : i32
    %1 = arith.extui %0 : i1 to i32
    %c0_i32_0 = arith.constant 0 : i32
    %2 = arith.cmpi ne, %1, %c0_i32_0 : i32
    scf.if %2 {
      %cst_8 = arith.constant 0.000000e+00 : f32
      %12 = vector.broadcast %cst_8 : f32 to vector<128x128xf32>
      %c0_9 = arith.constant 0 : index
      %c0_10 = arith.constant 0 : index
      %13 = vector.load %arg4[%c0_9, %c0_10] : memref<128x128xf32, #tpu.memory_space<vmem>>, vector<128x128xf32>
      tpu.vector_store %arg4[%c0_9, %c0_10], %12 {strides = array<i32>} : memref<128x128xf32, #tpu.memory_space<vmem>>, vector<128x128xf32>,
    } else {
    }
    %c0 = arith.constant 0 : index
    %c0_1 = arith.constant 0 : index
    %3 = vector.load %arg2[%c0, %c0_1] : memref<128x256xf32, #tpu.memory_space<vmem>>, vector<128x256xf32>
    %c0_2 = arith.constant 0 : index
    %c0_3 = arith.constant 0 : index
    %4 = vector.load %arg4[%c0_2, %c0_3] : memref<128x128xf32, #tpu.memory_space<vmem>>, vector<128x128xf32>
    %5 = vector.shape_cast %3 : vector<128x256xf32> to vector<128x2x128xf32>
    %cst = arith.constant dense<0.000000e+00> : vector<128x128xf32>
    %6 = vector.multi_reduction <add>, %5, %cst [1] : vector<128x2x128xf32> to vector<128x128xf32>
    %7 = arith.addf %4, %6 : vector<128x128xf32>
    %c0_4 = arith.constant 0 : index
    %c0_5 = arith.constant 0 : index
    %8 = vector.load %arg4[%c0_4, %c0_5] : memref<128x128xf32, #tpu.memory_space<vmem>>, vector<128x128xf32>
    tpu.vector_store %arg4[%c0_4, %c0_5], %7 {strides = array<i32>} : memref<128x128xf32, #tpu.memory_space<vmem>>, vector<128x128xf32>,
    %c0_i32_6 = arith.constant 0 : i32
    %9 = arith.cmpi eq, %arg1, %c0_i32_6 : i32
    %10 = arith.extui %9 : i1 to i32
    %c0_i32_7 = arith.constant 0 : i32
    %11 = arith.cmpi ne, %10, %c0_i32_7 : i32
    scf.if %11 {
      %c0_8 = arith.constant 0 : index
      %c0_9 = arith.constant 0 : index
      %12 = vector.load %arg4[%c0_8, %c0_9] : memref<128x128xf32, #tpu.memory_space<vmem>>, vector<128x128xf32>
      %cst_10 = arith.constant dense<0.000000e+00> : vector<128xf32>
      %13 = vector.multi_reduction <add>, %12, %cst_10 [1] : vector<128x128xf32> to vector<128xf32>
      %14 = vector.shape_cast %13 : vector<128xf32> to vector<128x1xf32>
      %cst_11 = arith.constant 3.906250e-03 : f32
      %15 = vector.broadcast %cst_11 : f32 to vector<128x1xf32>
      %16 = arith.mulf %14, %15 : vector<128x1xf32>
      %c0_12 = arith.constant 0 : index
      %c0_13 = arith.constant 0 : index
      %17 = vector.load %arg3[%c0_12, %c0_13] : memref<128x1xf32, #tpu.memory_space<vmem>>, vector<128x1xf32>
      tpu.vector_store %arg3[%c0_12, %c0_13], %16 {strides = array<i32>} : memref<128x1xf32, #tpu.memory_space<vmem>>, vector<128x1xf32>,
    } else {
    }
    return
  }
  func.func @transform_0(%arg0: i32, %arg1: i32) -> (i32, i32) {
    %c0_i32 = arith.constant 0 : i32
    return %arg0, %arg1 : i32, i32
  }
  func.func @transform_1(%arg0: i32, %arg1: i32) -> (i32, i32) {
    %c0_i32 = arith.constant 0 : i32
    %c0_i32_0 = arith.constant 0 : i32
    return %arg0, %c0_i32 : i32, i32
  }
}

module attributes {stable_mosaic.version = 11 : i64} {
  func.func @kernel(%arg0: i32, %arg1: memref<2x128xf32, #tpu.memory_space<vmem>>, %arg2: memref<256x1xf32, #tpu.memory_space<vmem>>, %arg3: memref<16x128xf32, #tpu.memory_space<vmem>>, %arg4: memref<16x128xf32, #tpu.memory_space<vmem>>, %arg5: memref<128x8xf32, #tpu.memory_space<vmem>>, %arg6: memref<128x8xf32, #tpu.memory_space<vmem>>, %arg7: memref<128x8xf32, #tpu.memory_space<vmem>>, %arg8: memref<128x8xf32, #tpu.memory_space<vmem>>, %arg9: memref<1x1xf32, #tpu.memory_space<smem>>, %arg10: memref<2x128xf32, #tpu.memory_space<vmem>>) attributes {dimension_semantics = [#tpu.dimension_semantics<parallel>], iteration_bounds = array<i64: 1>, scalar_prefetch = 0 : i64, scratch_operands = 0 : i64, tpu.core_type = #tpu.core_type<tc>, window_params = [{transform_indices = @transform_0, window_bounds = array<i64: 2, 128>}, {transform_indices = @transform_1, window_bounds = array<i64: 256, 1>}, {pipeline_mode = #tpu.pipeline_mode<synchronous>, transform_indices = @transform_2, window_bounds = array<i64: 16, 128>}, {pipeline_mode = #tpu.pipeline_mode<synchronous>, transform_indices = @transform_3, window_bounds = array<i64: 16, 128>}, {pipeline_mode = #tpu.pipeline_mode<synchronous>, transform_indices = @transform_4, window_bounds = array<i64: 128, 8>}, {pipeline_mode = #tpu.pipeline_mode<synchronous>, transform_indices = @transform_5, window_bounds = array<i64: 128, 8>}, {pipeline_mode = #tpu.pipeline_mode<synchronous>, transform_indices = @transform_6, window_bounds = array<i64: 128, 8>}, {pipeline_mode = #tpu.pipeline_mode<synchronous>, transform_indices = @transform_7, window_bounds = array<i64: 128, 8>}, {transform_indices = @transform_8, window_bounds = array<i64: 1, 1>}, {transform_indices = @transform_9, window_bounds = array<i64: 2, 128>}]} {
    %c0 = arith.constant 0 : index
    %c0_0 = arith.constant 0 : index
    %0 = vector.load %arg1[%c0, %c0_0] : memref<2x128xf32, #tpu.memory_space<vmem>>, vector<2x128xf32>
    %c0_1 = arith.constant 0 : index
    %c0_2 = arith.constant 0 : index
    %1 = vector.load %arg2[%c0_1, %c0_2] : memref<256x1xf32, #tpu.memory_space<vmem>>, vector<256x1xf32>
    %c0_3 = arith.constant 0 : index
    %c0_4 = arith.constant 0 : index
    %2 = vector.load %arg3[%c0_3, %c0_4] : memref<16x128xf32, #tpu.memory_space<vmem>>, vector<16x128xf32>
    %c0_5 = arith.constant 0 : index
    %c0_6 = arith.constant 0 : index
    %3 = vector.load %arg4[%c0_5, %c0_6] : memref<16x128xf32, #tpu.memory_space<vmem>>, vector<16x128xf32>
    %c0_7 = arith.constant 0 : index
    %c0_8 = arith.constant 0 : index
    %4 = vector.load %arg5[%c0_7, %c0_8] : memref<128x8xf32, #tpu.memory_space<vmem>>, vector<128x8xf32>
    %c0_9 = arith.constant 0 : index
    %c0_10 = arith.constant 0 : index
    %5 = vector.load %arg6[%c0_9, %c0_10] : memref<128x8xf32, #tpu.memory_space<vmem>>, vector<128x8xf32>
    %c0_11 = arith.constant 0 : index
    %c0_12 = arith.constant 0 : index
    %6 = vector.load %arg7[%c0_11, %c0_12] : memref<128x8xf32, #tpu.memory_space<vmem>>, vector<128x8xf32>
    %c0_13 = arith.constant 0 : index
    %c0_14 = arith.constant 0 : index
    %7 = vector.load %arg8[%c0_13, %c0_14] : memref<128x8xf32, #tpu.memory_space<vmem>>, vector<128x8xf32>
    %c0_15 = arith.constant 0 : index
    %c0_16 = arith.constant 0 : index
    %8 = memref.load %arg9[%c0_15, %c0_16] : memref<1x1xf32, #tpu.memory_space<smem>>
    %9 = vector.extract_strided_slice %0 {offsets = [0, 0], sizes = [1, 128], strides = [1, 1]} : vector<2x128xf32> to vector<1x128xf32>
    %10 = vector.extract_strided_slice %1 {offsets = [0, 0], sizes = [128, 1], strides = [1, 1]} : vector<256x1xf32> to vector<128x1xf32>
    %11 = vector.broadcast %9 : vector<1x128xf32> to vector<16x128xf32>
    %12 = arith.mulf %2, %11 : vector<16x128xf32>
    %cst = arith.constant dense<0.000000e+00> : vector<16xf32>
    %13 = vector.multi_reduction <add>, %12, %cst [1] : vector<16x128xf32> to vector<16xf32>
    %14 = vector.shape_cast %13 : vector<16xf32> to vector<16x1xf32>
    %cst_17 = arith.constant 0.000000e+00 : f32
    %15 = vector.broadcast %cst_17 : f32 to vector<16x1xf32>
    %16 = arith.maximumf %14, %15 : vector<16x1xf32>
    %17 = vector.broadcast %16 : vector<16x1xf32> to vector<16x128xf32>
    %18 = arith.mulf %3, %17 : vector<16x128xf32>
    %19 = vector.extract_strided_slice %18 {offsets = [0, 0], sizes = [8, 128], strides = [1, 1]} : vector<16x128xf32> to vector<8x128xf32>
    %cst_18 = arith.constant dense<0.000000e+00> : vector<128xf32>
    %20 = vector.multi_reduction <add>, %19, %cst_18 [0] : vector<8x128xf32> to vector<128xf32>
    %21 = vector.shape_cast %20 : vector<128xf32> to vector<1x128xf32>
    %22 = vector.extract_strided_slice %18 {offsets = [8, 0], sizes = [8, 128], strides = [1, 1]} : vector<16x128xf32> to vector<8x128xf32>
    %cst_19 = arith.constant dense<0.000000e+00> : vector<128xf32>
    %23 = vector.multi_reduction <add>, %22, %cst_19 [0] : vector<8x128xf32> to vector<128xf32>
    %24 = vector.shape_cast %23 : vector<128xf32> to vector<1x128xf32>
    %25 = vector.broadcast %10 : vector<128x1xf32> to vector<128x8xf32>
    %26 = arith.mulf %4, %25 : vector<128x8xf32>
    %cst_20 = arith.constant dense<0.000000e+00> : vector<8xf32>
    %27 = vector.multi_reduction <add>, %26, %cst_20 [0] : vector<128x8xf32> to vector<8xf32>
    %28 = vector.shape_cast %27 : vector<8xf32> to vector<1x8xf32>
    %cst_21 = arith.constant 0.000000e+00 : f32
    %29 = vector.broadcast %cst_21 : f32 to vector<1x8xf32>
    %30 = arith.maximumf %28, %29 : vector<1x8xf32>
    %31 = vector.broadcast %30 : vector<1x8xf32> to vector<128x8xf32>
    %32 = arith.mulf %5, %31 : vector<128x8xf32>
    %cst_22 = arith.constant dense<0.000000e+00> : vector<128xf32>
    %33 = vector.multi_reduction <add>, %32, %cst_22 [1] : vector<128x8xf32> to vector<128xf32>
    %34 = vector.shape_cast %33 : vector<128xf32> to vector<128x1xf32>
    %35 = vector.broadcast %10 : vector<128x1xf32> to vector<128x8xf32>
    %36 = arith.mulf %6, %35 : vector<128x8xf32>
    %cst_23 = arith.constant dense<0.000000e+00> : vector<8xf32>
    %37 = vector.multi_reduction <add>, %36, %cst_23 [0] : vector<128x8xf32> to vector<8xf32>
    %38 = vector.shape_cast %37 : vector<8xf32> to vector<1x8xf32>
    %cst_24 = arith.constant 0.000000e+00 : f32
    %39 = vector.broadcast %cst_24 : f32 to vector<1x8xf32>
    %40 = arith.maximumf %38, %39 : vector<1x8xf32>
    %41 = vector.broadcast %40 : vector<1x8xf32> to vector<128x8xf32>
    %42 = arith.mulf %7, %41 : vector<128x8xf32>
    %cst_25 = arith.constant dense<0.000000e+00> : vector<128xf32>
    %43 = vector.multi_reduction <add>, %42, %cst_25 [1] : vector<128x8xf32> to vector<128xf32>
    %44 = vector.shape_cast %43 : vector<128xf32> to vector<128x1xf32>
    %cst_26 = arith.constant dense<0xFF800000> : vector<1xf32>
    %45 = vector.multi_reduction <maximumf>, %34, %cst_26 [0] : vector<128x1xf32> to vector<1xf32>
    %46 = vector.shape_cast %45 : vector<1xf32> to vector<1x1xf32>
    %cst_27 = arith.constant dense<0x7F800000> : vector<1xf32>
    %47 = vector.multi_reduction <minimumf>, %34, %cst_27 [0] : vector<128x1xf32> to vector<1xf32>
    %48 = vector.shape_cast %47 : vector<1xf32> to vector<1x1xf32>
    %49 = vector.broadcast %46 : vector<1x1xf32> to vector<1x128xf32>
    %50 = arith.mulf %24, %49 : vector<1x128xf32>
    %51 = vector.broadcast %48 : vector<1x1xf32> to vector<1x128xf32>
    %52 = arith.mulf %24, %51 : vector<1x128xf32>
    %53 = arith.maximumf %50, %52 : vector<1x128xf32>
    %cst_28 = arith.constant 0.000000e+00 : f32
    %54 = vector.broadcast %cst_28 : f32 to vector<1x128xf32>
    %cst_29 = arith.constant 0.000000e+00 : f32
    %55 = vector.broadcast %cst_29 : f32 to vector<1x128xf32>
    %56 = vector.broadcast %34 : vector<128x1xf32> to vector<128x128xf32>
    %57 = vector.broadcast %24 : vector<1x128xf32> to vector<128x128xf32>
    %58 = arith.mulf %56, %57 : vector<128x128xf32>
    %59 = vector.broadcast %53 : vector<1x128xf32> to vector<128x128xf32>
    %60 = arith.subf %58, %59 : vector<128x128xf32>
    %61 = math.exp %60 : vector<128x128xf32>
    %cst_30 = arith.constant dense<0.000000e+00> : vector<128xf32>
    %62 = vector.multi_reduction <add>, %61, %cst_30 [0] : vector<128x128xf32> to vector<128xf32>
    %63 = vector.shape_cast %62 : vector<128xf32> to vector<1x128xf32>
    %64 = arith.addf %54, %63 : vector<1x128xf32>
    %65 = vector.broadcast %44 : vector<128x1xf32> to vector<128x128xf32>
    %66 = arith.mulf %61, %65 : vector<128x128xf32>
    %cst_31 = arith.constant dense<0.000000e+00> : vector<128xf32>
    %67 = vector.multi_reduction <add>, %66, %cst_31 [0] : vector<128x128xf32> to vector<128xf32>
    %68 = vector.shape_cast %67 : vector<128xf32> to vector<1x128xf32>
    %69 = arith.addf %55, %68 : vector<1x128xf32>
    %70 = arith.divf %69, %64 : vector<1x128xf32>
    %71 = vector.broadcast %8 : f32 to vector<1x128xf32>
    %72 = arith.mulf %71, %70 : vector<1x128xf32>
    %73 = arith.addf %72, %21 : vector<1x128xf32>
    %cst_32 = arith.constant 1.000000e+00 : f32
    %74 = vector.broadcast %cst_32 : f32 to vector<1x128xf32>
    %75 = arith.addf %73, %74 : vector<1x128xf32>
    %76 = vector.extract_strided_slice %0 {offsets = [1, 0], sizes = [1, 128], strides = [1, 1]} : vector<2x128xf32> to vector<1x128xf32>
    %77 = vector.extract_strided_slice %1 {offsets = [128, 0], sizes = [128, 1], strides = [1, 1]} : vector<256x1xf32> to vector<128x1xf32>
    %78 = vector.broadcast %76 : vector<1x128xf32> to vector<16x128xf32>
    %79 = arith.mulf %2, %78 : vector<16x128xf32>
    %cst_33 = arith.constant dense<0.000000e+00> : vector<16xf32>
    %80 = vector.multi_reduction <add>, %79, %cst_33 [1] : vector<16x128xf32> to vector<16xf32>
    %81 = vector.shape_cast %80 : vector<16xf32> to vector<16x1xf32>
    %cst_34 = arith.constant 0.000000e+00 : f32
    %82 = vector.broadcast %cst_34 : f32 to vector<16x1xf32>
    %83 = arith.maximumf %81, %82 : vector<16x1xf32>
    %84 = vector.broadcast %83 : vector<16x1xf32> to vector<16x128xf32>
    %85 = arith.mulf %3, %84 : vector<16x128xf32>
    %86 = vector.extract_strided_slice %85 {offsets = [0, 0], sizes = [8, 128], strides = [1, 1]} : vector<16x128xf32> to vector<8x128xf32>
    %cst_35 = arith.constant dense<0.000000e+00> : vector<128xf32>
    %87 = vector.multi_reduction <add>, %86, %cst_35 [0] : vector<8x128xf32> to vector<128xf32>
    %88 = vector.shape_cast %87 : vector<128xf32> to vector<1x128xf32>
    %89 = vector.extract_strided_slice %85 {offsets = [8, 0], sizes = [8, 128], strides = [1, 1]} : vector<16x128xf32> to vector<8x128xf32>
    %cst_36 = arith.constant dense<0.000000e+00> : vector<128xf32>
    %90 = vector.multi_reduction <add>, %89, %cst_36 [0] : vector<8x128xf32> to vector<128xf32>
    %91 = vector.shape_cast %90 : vector<128xf32> to vector<1x128xf32>
    %92 = vector.broadcast %77 : vector<128x1xf32> to vector<128x8xf32>
    %93 = arith.mulf %4, %92 : vector<128x8xf32>
    %cst_37 = arith.constant dense<0.000000e+00> : vector<8xf32>
    %94 = vector.multi_reduction <add>, %93, %cst_37 [0] : vector<128x8xf32> to vector<8xf32>
    %95 = vector.shape_cast %94 : vector<8xf32> to vector<1x8xf32>
    %cst_38 = arith.constant 0.000000e+00 : f32
    %96 = vector.broadcast %cst_38 : f32 to vector<1x8xf32>
    %97 = arith.maximumf %95, %96 : vector<1x8xf32>
    %98 = vector.broadcast %97 : vector<1x8xf32> to vector<128x8xf32>
    %99 = arith.mulf %5, %98 : vector<128x8xf32>
    %cst_39 = arith.constant dense<0.000000e+00> : vector<128xf32>
    %100 = vector.multi_reduction <add>, %99, %cst_39 [1] : vector<128x8xf32> to vector<128xf32>
    %101 = vector.shape_cast %100 : vector<128xf32> to vector<128x1xf32>
    %102 = vector.broadcast %77 : vector<128x1xf32> to vector<128x8xf32>
    %103 = arith.mulf %6, %102 : vector<128x8xf32>
    %cst_40 = arith.constant dense<0.000000e+00> : vector<8xf32>
    %104 = vector.multi_reduction <add>, %103, %cst_40 [0] : vector<128x8xf32> to vector<8xf32>
    %105 = vector.shape_cast %104 : vector<8xf32> to vector<1x8xf32>
    %cst_41 = arith.constant 0.000000e+00 : f32
    %106 = vector.broadcast %cst_41 : f32 to vector<1x8xf32>
    %107 = arith.maximumf %105, %106 : vector<1x8xf32>
    %108 = vector.broadcast %107 : vector<1x8xf32> to vector<128x8xf32>
    %109 = arith.mulf %7, %108 : vector<128x8xf32>
    %cst_42 = arith.constant dense<0.000000e+00> : vector<128xf32>
    %110 = vector.multi_reduction <add>, %109, %cst_42 [1] : vector<128x8xf32> to vector<128xf32>
    %111 = vector.shape_cast %110 : vector<128xf32> to vector<128x1xf32>
    %cst_43 = arith.constant dense<0xFF800000> : vector<1xf32>
    %112 = vector.multi_reduction <maximumf>, %101, %cst_43 [0] : vector<128x1xf32> to vector<1xf32>
    %113 = vector.shape_cast %112 : vector<1xf32> to vector<1x1xf32>
    %cst_44 = arith.constant dense<0x7F800000> : vector<1xf32>
    %114 = vector.multi_reduction <minimumf>, %101, %cst_44 [0] : vector<128x1xf32> to vector<1xf32>
    %115 = vector.shape_cast %114 : vector<1xf32> to vector<1x1xf32>
    %116 = vector.broadcast %113 : vector<1x1xf32> to vector<1x128xf32>
    %117 = arith.mulf %91, %116 : vector<1x128xf32>
    %118 = vector.broadcast %115 : vector<1x1xf32> to vector<1x128xf32>
    %119 = arith.mulf %91, %118 : vector<1x128xf32>
    %120 = arith.maximumf %117, %119 : vector<1x128xf32>
    %cst_45 = arith.constant 0.000000e+00 : f32
    %121 = vector.broadcast %cst_45 : f32 to vector<1x128xf32>
    %cst_46 = arith.constant 0.000000e+00 : f32
    %122 = vector.broadcast %cst_46 : f32 to vector<1x128xf32>
    %123 = vector.broadcast %101 : vector<128x1xf32> to vector<128x128xf32>
    %124 = vector.broadcast %91 : vector<1x128xf32> to vector<128x128xf32>
    %125 = arith.mulf %123, %124 : vector<128x128xf32>
    %126 = vector.broadcast %120 : vector<1x128xf32> to vector<128x128xf32>
    %127 = arith.subf %125, %126 : vector<128x128xf32>
    %128 = math.exp %127 : vector<128x128xf32>
    %cst_47 = arith.constant dense<0.000000e+00> : vector<128xf32>
    %129 = vector.multi_reduction <add>, %128, %cst_47 [0] : vector<128x128xf32> to vector<128xf32>
    %130 = vector.shape_cast %129 : vector<128xf32> to vector<1x128xf32>
    %131 = arith.addf %121, %130 : vector<1x128xf32>
    %132 = vector.broadcast %111 : vector<128x1xf32> to vector<128x128xf32>
    %133 = arith.mulf %128, %132 : vector<128x128xf32>
    %cst_48 = arith.constant dense<0.000000e+00> : vector<128xf32>
    %134 = vector.multi_reduction <add>, %133, %cst_48 [0] : vector<128x128xf32> to vector<128xf32>
    %135 = vector.shape_cast %134 : vector<128xf32> to vector<1x128xf32>
    %136 = arith.addf %122, %135 : vector<1x128xf32>
    %137 = arith.divf %136, %131 : vector<1x128xf32>
    %138 = vector.broadcast %8 : f32 to vector<1x128xf32>
    %139 = arith.mulf %138, %137 : vector<1x128xf32>
    %140 = arith.addf %139, %88 : vector<1x128xf32>
    %cst_49 = arith.constant 1.000000e+00 : f32
    %141 = vector.broadcast %cst_49 : f32 to vector<1x128xf32>
    %142 = arith.addf %140, %141 : vector<1x128xf32>
    %143 = tpu.concatenate %75, %142 in 0 : vector<1x128xf32>, vector<1x128xf32> -> vector<2x128xf32>
    %c0_50 = arith.constant 0 : index
    %c0_51 = arith.constant 0 : index
    %144 = vector.load %arg10[%c0_50, %c0_51] : memref<2x128xf32, #tpu.memory_space<vmem>>, vector<2x128xf32>
    tpu.vector_store %arg10[%c0_50, %c0_51], %143 {strides = array<i32>} : memref<2x128xf32, #tpu.memory_space<vmem>>, vector<2x128xf32>,
    return
  }
  func.func @transform_0(%arg0: i32) -> (i32, i32) {
    %c0_i32 = arith.constant 0 : i32
    %c0_i32_0 = arith.constant 0 : i32
    return %arg0, %c0_i32 : i32, i32
  }
  func.func @transform_1(%arg0: i32) -> (i32, i32) {
    %c0_i32 = arith.constant 0 : i32
    %c0_i32_0 = arith.constant 0 : i32
    return %arg0, %c0_i32 : i32, i32
  }
  func.func @transform_2(%arg0: i32) -> (i32, i32) {
    %c0_i32 = arith.constant 0 : i32
    %c0_i32_0 = arith.constant 0 : i32
    %c0_i32_1 = arith.constant 0 : i32
    return %c0_i32, %c0_i32_0 : i32, i32
  }
  func.func @transform_3(%arg0: i32) -> (i32, i32) {
    %c0_i32 = arith.constant 0 : i32
    %c0_i32_0 = arith.constant 0 : i32
    %c0_i32_1 = arith.constant 0 : i32
    return %c0_i32, %c0_i32_0 : i32, i32
  }
  func.func @transform_4(%arg0: i32) -> (i32, i32) {
    %c0_i32 = arith.constant 0 : i32
    %c0_i32_0 = arith.constant 0 : i32
    %c0_i32_1 = arith.constant 0 : i32
    return %c0_i32, %c0_i32_0 : i32, i32
  }
  func.func @transform_5(%arg0: i32) -> (i32, i32) {
    %c0_i32 = arith.constant 0 : i32
    %c0_i32_0 = arith.constant 0 : i32
    %c0_i32_1 = arith.constant 0 : i32
    return %c0_i32, %c0_i32_0 : i32, i32
  }
  func.func @transform_6(%arg0: i32) -> (i32, i32) {
    %c0_i32 = arith.constant 0 : i32
    %c0_i32_0 = arith.constant 0 : i32
    %c0_i32_1 = arith.constant 0 : i32
    return %c0_i32, %c0_i32_0 : i32, i32
  }
  func.func @transform_7(%arg0: i32) -> (i32, i32) {
    %c0_i32 = arith.constant 0 : i32
    %c0_i32_0 = arith.constant 0 : i32
    %c0_i32_1 = arith.constant 0 : i32
    return %c0_i32, %c0_i32_0 : i32, i32
  }
  func.func @transform_8(%arg0: i32) -> (i32, i32) {
    %c0_i32 = arith.constant 0 : i32
    %c0_i32_0 = arith.constant 0 : i32
    %c0_i32_1 = arith.constant 0 : i32
    return %c0_i32, %c0_i32_0 : i32, i32
  }
  func.func @transform_9(%arg0: i32) -> (i32, i32) {
    %c0_i32 = arith.constant 0 : i32
    %c0_i32_0 = arith.constant 0 : i32
    return %arg0, %c0_i32 : i32, i32
  }
}

module attributes {stable_mosaic.version = 11 : i64} {
  func.func @_scale_kernel(%arg0: i32, %arg1: i32, %arg2: memref<128x256xf32, #tpu.memory_space<vmem>>, %arg3: memref<128x1xf32, #tpu.memory_space<vmem>>, %arg4: memref<128x256xf32, #tpu.memory_space<vmem>>) attributes {dimension_semantics = [#tpu.dimension_semantics<parallel>, #tpu.dimension_semantics<parallel>], iteration_bounds = array<i64: 2, 1>, scalar_prefetch = 0 : i64, scratch_operands = 0 : i64, tpu.core_type = #tpu.core_type<tc>, window_params = [{transform_indices = @transform_0, window_bounds = array<i64: 128, 256>}, {transform_indices = @transform_1, window_bounds = array<i64: 128, 1>}, {transform_indices = @transform_2, window_bounds = array<i64: 128, 256>}]} {
    %c0 = arith.constant 0 : index
    %c0_0 = arith.constant 0 : index
    %0 = vector.load %arg2[%c0, %c0_0] : memref<128x256xf32, #tpu.memory_space<vmem>>, vector<128x256xf32>
    %c0_1 = arith.constant 0 : index
    %c0_2 = arith.constant 0 : index
    %1 = vector.load %arg3[%c0_1, %c0_2] : memref<128x1xf32, #tpu.memory_space<vmem>>, vector<128x1xf32>
    %2 = vector.broadcast %1 : vector<128x1xf32> to vector<128x256xf32>
    %3 = arith.mulf %0, %2 : vector<128x256xf32>
    %c0_3 = arith.constant 0 : index
    %c0_4 = arith.constant 0 : index
    %4 = vector.load %arg4[%c0_3, %c0_4] : memref<128x256xf32, #tpu.memory_space<vmem>>, vector<128x256xf32>
    tpu.vector_store %arg4[%c0_3, %c0_4], %3 {strides = array<i32>} : memref<128x256xf32, #tpu.memory_space<vmem>>, vector<128x256xf32>,
    return
  }
  func.func @transform_0(%arg0: i32, %arg1: i32) -> (i32, i32) {
    %c0_i32 = arith.constant 0 : i32
    return %arg0, %arg1 : i32, i32
  }
  func.func @transform_1(%arg0: i32, %arg1: i32) -> (i32, i32) {
    %c0_i32 = arith.constant 0 : i32
    %c0_i32_0 = arith.constant 0 : i32
    return %arg0, %c0_i32 : i32, i32
  }
  func.func @transform_2(%arg0: i32, %arg1: i32) -> (i32, i32) {
    %c0_i32 = arith.constant 0 : i32
    return %arg0, %arg1 : i32, i32
  }
}

</mosaic_0001>

<bundles_post_ra>
// kernel: bottleneck_forward.3
= control target key start
LH: loop header
LB: loop body
LE: loop exit
PB: predicated region body
PF: predicated region fallthrough
CT: control target
= control target key end

     0   :  { %s2699_s6 = smov 0   ;;  %s2701_s7 = smov 0   ;;  %s3435_s0 = inlined_call_operand.vmem [shape: f32[256,256], index: 0, kind: input, shape index: {}]   ;;  %s3436_s1 = inlined_call_operand.vmem [shape: f32[256,1], index: 1, kind: output, shape index: {}]  }
   0x1   :  { %s2703_s8 = smov 0  }
   0x2 LB: > { %s23_s9 = sadd.s32 1, %s2680_s7  ;;  %p2626_p0 = scmp.ge.s32.totalorder %s2684_s8, 1  ;;  %s2684_s8 = sphi %s2703_s8, %s11_s8   ;;  %s2680_s7 = sphi %s2701_s7, %s3438_s7   ;;  %s2676_s6 = sphi %s2699_s6, %s3437_s6  }
   0x3   : > { %p25_p1 = scmp.ge.s32.totalorder %s23_s9, 2  ;;  %p108_p2 = scmp.lt.s32.totalorder %s2684_s8, 3 }
   0x5   : > { %s3440_s9 = smov (%p25_p1, %s23_s9), 0  ;;  %p109_p3 = pnand %p2626_p0, %p108_p2 }
   0x6   : > { %s2627_s10 = sshll.u32 (!%p109_p3), %s2676_s6, 4 }
   0x7   : > { %112 = sbr.rel (%p109_p3) target bundleno = 487 (0x1e7), region = 24  ;;  %p135_p4 = scmp.lt.s32.totalorder (!%p109_p3), %s2627_s10, 31 }
   0xc   : > { %v223_v0 = vlaneseq  ;;  %v2686_v1 = vmov 1983009808   ;;  %v2687_v3 = vmov 1934713408   ;;  %s3442_s10 = smov (!%p135_p4, %s2627_s10), 31  ;;  %vm1275_vm0 = vcmask 1041408  }
   0xd   : > { %v221_v2 = vunpack.c.l.s4 %v2686_v1  ;;  %v252_v4 = vunpack.c.l.s4 %v2687_v3  ;;  %s2634_s11 = sshll.u32 %s3442_s10, 4  ;;  %v2688_v13 = vmov 0.0   ;;  %vm2300_vm1 = vcmask 1041409   ;;  %s2631_s15 = sshll.u32 %s3442_s10, 3 }
   0xe   : > { %v224_v5 = vshrl.u32 %v223_v0, 7  ;;  %s2725_s14 = scalar_lea.vmem %s3435_s0, %s2634_s11  ;;  %vm2302_vm2 = vcmask 1042434   ;;  %vm2304_vm3 = vcmask 1043459   ;;  %vm2306_vm4 = vcmask 1044484   ;;  %s3383_s18 = scalar_lea.vmem %s3436_s1, %s2631_s15 }
   0xf   : > { %v222_v6 = vunpack.c.0.s8 %v221_v2  ;;  %v253_v7 = vunpack.c.0.s8 %v252_v4  ;;  %v175_v9 = vld [vmem:[%s2725_s14 + $0x20] sm:$0xff]  ;;  %v176_v10 = vld [vmem:[%s2725_s14 + $0x28] sm:$0xff]  ;;  %vm2308_vm5 = vcmask 1045509   ;;  %vm2310_vm6 = vcmask 1046534  }
  0x10   : > { %v171_v12 = vld [vmem:[%s2725_s14] sm:$0xff]  ;;  %v351_v14 = vcombine.high %v175_v9, %v2688_v13  ;;  %v366_v16 = vcombine.high %v176_v10, %v2688_v13  ;;  %v172_v18 = vld [vmem:[%s2725_s14 + $0x8] sm:$0xff]  ;;  %vm2312_vm7 = vcmask 1047559   ;;  %vm2534_vm8 = vcmask 7168  }
  0x11   : > { %v2720_v8 = vsub.s32 %v222_v6, %v224_v5  ;;  %v2729_v11 = vsub.s32 %v253_v7, %v224_v5  ;;  %v219_v19 = vcombine.high %v171_v12, %v2688_v13  ;;  %v234_v21 = vcombine.high %v172_v18, %v2688_v13 }
  0x13   : > { %v358_v15 = vrot.slane %v175_v9, %v2720_v8  ;;  %v373_v17 = vrot.slane %v176_v10, %v2720_v8  ;;  %v226_v20 = vrot.slane %v171_v12, %v2720_v8  ;;  %v241_v22 = vrot.slane %v172_v18, %v2720_v8 }
  0x14   : > { %v365_v23 = vrot.slane %v351_v14, %v2720_v8  ;;  %v380_v24 = vrot.slane %v366_v16, %v2720_v8  ;;  %v233_v27 = vrot.slane %v219_v19, %v2720_v8  ;;  %v248_v28 = vrot.slane %v234_v21, %v2720_v8 }
  0x15   : > { %v381_v25 = vcombine.low %v358_v15, %v373_v17  ;;  %v382_v26 = vcombine.high %v358_v15, %v373_v17  ;;  %v249_v29 = vcombine.low %v226_v20, %v241_v22  ;;  %v250_v30 = vcombine.high %v226_v20, %v241_v22 }
  0x16   : > { %v397_v33 = vcombine.low %v365_v23, %v380_v24  ;;  %v398_v34 = vcombine.high %v365_v23, %v380_v24  ;;  %v265_v37 = vcombine.low %v233_v27, %v248_v28  ;;  %v266_v38 = vcombine.high %v233_v27, %v248_v28 }
  0x17   : > { %v389_v31 = vrot.slane %v381_v25, %v2729_v11  ;;  %v396_v32 = vrot.slane %v382_v26, %v2729_v11  ;;  %v2748_v35 = vrot.slane %v249_v29, %v2729_v11  ;;  %v2751_v36 = vrot.slane %v250_v30, %v2729_v11 }
  0x18   : > { %v405_v39 = vrot.slane %v397_v33, %v2729_v11  ;;  %v412_v40 = vrot.slane %v398_v34, %v2729_v11  ;;  %v2760_v45 = vrot.slane %v265_v37, %v2729_v11  ;;  %v2763_v46 = vrot.slane %v266_v38, %v2729_v11 }
  0x19   : > { %v413_v41 = vcombine.high %v389_v31, %v2688_v13  ;;  %v414_v42 = vcombine.high %v396_v32, %v2688_v13  ;;  %v1388_v43 = vsel %vm1275_vm0, %v389_v31, 0.0  ;;  %v1402_v44 = vsel %vm1275_vm0, %v396_v32, 0.0 }
  0x1a   : > { %v415_v47 = vcombine.high %v405_v39, %v2688_v13  ;;  %v416_v48 = vcombine.high %v412_v40, %v2688_v13  ;;  %v1389_v49 = vrot.slane %v1388_v43, 4  ;;  %v1403_v52 = vrot.slane %v1402_v44, 4 }
  0x1b   : > { %v1395_v50 = vsel %vm1275_vm0, %v413_v41, 0.0  ;;  %v1409_v53 = vsel %vm1275_vm0, %v414_v42, 0.0  ;;  %v1416_v54 = vsel %vm1275_vm0, %v405_v39, 0.0  ;;  %v1430_v62 = vsel %vm1275_vm0, %v412_v40, 0.0 }
  0x1c   : > { %v1396_v51 = vrot.slane %v1395_v50, 4  ;;  %v1390_v55 = vadd.f32 %v1389_v49, %v1388_v43  ;;  %v1410_v56 = vrot.slane %v1409_v53, 4  ;;  %v1417_v57 = vrot.slane %v1416_v54, 4 }
  0x1d   : > { %v1423_v58 = vsel %vm1275_vm0, %v415_v47, 0.0  ;;  %v1404_v60 = vadd.f32 %v1403_v52, %v1402_v44  ;;  %v1431_v2 = vrot.slane %v1430_v62, 4  ;;  %v1437_v6 = vsel %vm1275_vm0, %v416_v48, 0.0 }
  0x1e   : > { %v1397_v59 = vadd.f32 %v1396_v51, %v1395_v50  ;;  %v1424_v61 = vrot.slane %v1423_v58, 4  ;;  %v1391_v63 = vrot.slane %v1390_v55, 2  ;;  %v1411_v0 = vadd.f32 %v1410_v56, %v1409_v53 }
  0x1f   : > { %v1418_v1 = vadd.f32 %v1417_v57, %v1416_v54  ;;  %v1405_v4 = vrot.slane %v1404_v60, 2  ;;  %v1432_v12 = vadd.f32 %v1431_v2, %v1430_v62  ;;  %v1438_v17 = vrot.slane %v1437_v6, 4 }
  0x20   : > { %v1398_v3 = vrot.slane %v1397_v59, 2  ;;  %v1425_v5 = vadd.f32 %v1424_v61, %v1423_v58  ;;  %v1392_v7 = vadd.f32 %v1391_v63, %v1390_v55  ;;  %v1412_v9 = vrot.slane %v1411_v0, 2 }
  0x21   : > { %v1419_v10 = vrot.slane %v1418_v1, 2  ;;  %v1406_v15 = vadd.f32 %v1405_v4, %v1404_v60  ;;  %v1433_v21 = vrot.slane %v1432_v12, 2  ;;  %v1439_v25 = vadd.f32 %v1438_v17, %v1437_v6 }
  0x22   : > { %v1399_v14 = vadd.f32 %v1398_v3, %v1397_v59  ;;  %v1426_v16 = vrot.slane %v1425_v5, 2  ;;  %v1393_v18 = vrot.slane %v1392_v7, 1  ;;  %v1413_v19 = vadd.f32 %v1412_v9, %v1411_v0 }
  0x23   : > { %v1420_v20 = vadd.f32 %v1419_v10, %v1418_v1  ;;  %v1407_v23 = vrot.slane %v1406_v15, 1  ;;  %v1434_v29 = vadd.f32 %v1433_v21, %v1432_v12  ;;  %v1440_v33 = vrot.slane %v1439_v25, 2 }
  0x24   : > { %v1400_v22 = vrot.slane %v1399_v14, 1  ;;  %v1427_v24 = vadd.f32 %v1426_v16, %v1425_v5  ;;  %v1394_v26 = vadd.f32 %v1393_v18, %v1392_v7  ;;  %v1414_v27 = vrot.slane %v1413_v19, 1 }
  0x25   : > { %v1421_v28 = vrot.slane %v1420_v20, 1  ;;  %v1408_v31 = vadd.f32 %v1407_v23, %v1406_v15  ;;  %v1435_v38 = vrot.slane %v1434_v29, 1  ;;  %v281_v39 = vcombine.high %v2748_v35, %v2688_v13 }
  0x26   : > { %v1401_v30 = vadd.f32 %v1400_v22, %v1399_v14  ;;  %v1428_v32 = vrot.slane %v1427_v24, 1  ;;  %v1415_v34 = vadd.f32 %v1414_v27, %v1413_v19  ;;  %v1441_v41 = vadd.f32 %v1440_v33, %v1439_v25 }
  0x27   : > { %v1422_v37 = vadd.f32 %v1421_v28, %v1420_v20  ;;  %v282_v43 = vcombine.high %v2751_v36, %v2688_v13  ;;  %v1436_v44 = vadd.f32 %v1435_v38, %v1434_v29  ;;  %v283_v48 = vcombine.high %v2760_v45, %v2688_v13 }
  0x28   : > { %v1429_v40 = vadd.f32 %v1428_v32, %v1427_v24  ;;  %v2321_v42 = vsel %vm2300_vm1, %v1401_v30, %v1394_v26  ;;  %v284_v49 = vcombine.high %v2763_v46, %v2688_v13  ;;  %v1442_v50 = vrot.slane %v1441_v41, 1 }
  0x29   : > { %v2322_v47 = vsel %vm2302_vm2, %v1408_v31, %v2321_v42  ;;  %v1276_v52 = vsel %vm1275_vm0, %v2748_v35, 0.0  ;;  %v1283_v53 = vsel %vm1275_vm0, %v281_v39, 0.0  ;;  %v1290_v57 = vsel %vm1275_vm0, %v2751_v36, 0.0  ;;  %v177_v39 = vld [vmem:[%s2725_s14 + $0x30] sm:$0xff] }
  0x2a   : > { %v2323_v51 = vsel %vm2304_vm3, %v1415_v34, %v2322_v47  ;;  %v1277_v55 = vrot.slane %v1276_v52, 4  ;;  %v1284_v56 = vrot.slane %v1283_v53, 4  ;;  %v1443_v58 = vadd.f32 %v1442_v50, %v1441_v41  ;;  %v178_v50 = vld [vmem:[%s2725_s14 + $0x38] sm:$0xff] }
  0x2b   : > { %v2324_v54 = vsel %vm2306_vm4, %v1422_v37, %v2323_v51  ;;  %v1291_v60 = vrot.slane %v1290_v57, 4  ;;  %v1297_v61 = vsel %vm1275_vm0, %v282_v43, 0.0  ;;  %v1304_v3 = vsel %vm1275_vm0, %v2760_v45, 0.0  ;;  %v173_v51 = vld [vmem:[%s2725_s14 + $0x10] sm:$0xff] }
  0x2c   : > { %v2325_v59 = vsel %vm2308_vm5, %v1429_v40, %v2324_v54  ;;  %v1278_v63 = vadd.f32 %v1277_v55, %v1276_v52  ;;  %v1285_v0 = vadd.f32 %v1284_v56, %v1283_v53  ;;  %v1298_v35 = vrot.slane %v1297_v61, 4 }
  0x2d   : > { %v2326_v62 = vsel %vm2310_vm6, %v1436_v44, %v2325_v59  ;;  %v1292_v2 = vadd.f32 %v1291_v60, %v1290_v57  ;;  %v1311_v4 = vsel %vm1275_vm0, %v283_v48, 0.0  ;;  %v1305_v7 = vrot.slane %v1304_v3, 4 }
  0x2e   : > { %v2327_v1 = vsel %vm2312_vm7, %v1443_v58, %v2326_v62  ;;  %v1279_v36 = vrot.slane %v1278_v63, 2  ;;  %v1286_v5 = vrot.slane %v1285_v0, 2  ;;  %v1299_v6 = vadd.f32 %v1298_v35, %v1297_v61  ;;  %v174_v62 = vld [vmem:[%s2725_s14 + $0x18] sm:$0xff] }
  0x2f   : > { %2490 = vadd.xlane.f32.xlu1 %v2327_v1  ;;  %v1293_v9 = vrot.slane %v1292_v2, 2  ;;  %v1312_v10 = vrot.slane %v1311_v4, 4  ;;  %v1318_v12 = vsel %vm1275_vm0, %v2763_v46, 0.0  ;;  %v1325_v14 = vsel %vm1275_vm0, %v284_v49, 0.0 }
  0x30   : > { %v1280_v15 = vadd.f32 %v1279_v36, %v1278_v63  ;;  %v1287_v16 = vadd.f32 %v1286_v5, %v1285_v0  ;;  %v1300_v17 = vrot.slane %v1299_v6, 2  ;;  %v1306_v18 = vadd.f32 %v1305_v7, %v1304_v3 }
  0x31   : > { %v1294_v19 = vadd.f32 %v1293_v9, %v1292_v2  ;;  %v1313_v45 = vadd.f32 %v1312_v10, %v1311_v4  ;;  %v1319_v20 = vrot.slane %v1318_v12, 4  ;;  %v1326_v21 = vrot.slane %v1325_v14, 4 }
  0x32   : > { %v1281_v22 = vrot.slane %v1280_v15, 1  ;;  %v1288_v23 = vrot.slane %v1287_v16, 1  ;;  %v1301_v24 = vadd.f32 %v1300_v17, %v1299_v6  ;;  %v1307_v25 = vrot.slane %v1306_v18, 2 }
  0x33   : > { %v1295_v26 = vrot.slane %v1294_v19, 1  ;;  %v1314_v27 = vrot.slane %v1313_v45, 2  ;;  %v1320_v28 = vadd.f32 %v1319_v20, %v1318_v12  ;;  %v1327_v29 = vadd.f32 %v1326_v21, %v1325_v14 }
  0x34   : > { %v1282_v46 = vadd.f32 %v1281_v22, %v1280_v15  ;;  %v1289_v30 = vadd.f32 %v1288_v23, %v1287_v16  ;;  %v1302_v31 = vrot.slane %v1301_v24, 1  ;;  %v1308_v32 = vadd.f32 %v1307_v25, %v1306_v18 }
  0x35   : > { %v1296_v33 = vadd.f32 %v1295_v26, %v1294_v19  ;;  %v1315_v34 = vadd.f32 %v1314_v27, %v1313_v45  ;;  %v1321_v37 = vrot.slane %v1320_v28, 2  ;;  %v1328_v38 = vrot.slane %v1327_v29, 2 }
  0x36   : > { %v1303_v40 = vadd.f32 %v1302_v31, %v1301_v24  ;;  %v1309_v41 = vrot.slane %v1308_v32, 1  ;;  %v2301_v42 = vsel %vm2300_vm1, %v1289_v30, %v1282_v46  ;;  %v417_v43 = vcombine.high %v177_v39, %v2688_v13 }
  0x37   : > { %v1316_v44 = vrot.slane %v1315_v34, 1  ;;  %v1322_v47 = vadd.f32 %v1321_v37, %v1320_v28  ;;  %v1329_v48 = vadd.f32 %v1328_v38, %v1327_v29  ;;  %v2303_v49 = vsel %vm2302_vm2, %v1296_v33, %v2301_v42 }
  0x38   : > { %v1310_v52 = vadd.f32 %v1309_v41, %v1308_v32  ;;  %v2305_v53 = vsel %vm2304_vm3, %v1303_v40, %v2303_v49  ;;  %v424_v54 = vrot.slane %v177_v39, %v2720_v8  ;;  %v431_v55 = vrot.slane %v417_v43, %v2720_v8 }
  0x39   : > { %v1317_v56 = vadd.f32 %v1316_v44, %v1315_v34  ;;  %v1323_v57 = vrot.slane %v1322_v47, 1  ;;  %v1330_v58 = vrot.slane %v1329_v48, 1  ;;  %v432_v59 = vcombine.high %v178_v50, %v2688_v13 }
  0x3a   : > { %v2307_v60 = vsel %vm2306_vm4, %v1310_v52, %v2305_v53  ;;  %v439_v61 = vrot.slane %v178_v50, %v2720_v8  ;;  %v285_v63 = vcombine.high %v173_v51, %v2688_v13  ;;  %v2815_v0 = vrot.slane %v173_v51, %v2720_v8 }
  0x3b   : > { %v1324_v35 = vadd.f32 %v1323_v57, %v1322_v47  ;;  %v1331_v1 = vadd.f32 %v1330_v58, %v1329_v48  ;;  %v2309_v2 = vsel %vm2308_vm5, %v1317_v56, %v2307_v60  ;;  %v446_v3 = vrot.slane %v432_v59, %v2720_v8 }
  0x3c   : > { %v447_v4 = vcombine.low %v424_v54, %v439_v61  ;;  %v448_v36 = vcombine.high %v424_v54, %v439_v61  ;;  %v2820_v5 = vrot.slane %v285_v63, %v2720_v8  ;;  %v300_v6 = vcombine.high %v174_v62, %v2688_v13 }
  0x3d   : > { %v2311_v7 = vsel %vm2310_vm6, %v1324_v35, %v2309_v2  ;;  %v463_v9 = vcombine.low %v431_v55, %v446_v3  ;;  %v464_v10 = vcombine.high %v431_v55, %v446_v3  ;;  %v2825_v12 = vrot.slane %v174_v62, %v2720_v8 }
  0x3e   : > { %v2313_v14 = vsel %vm2312_vm7, %v1331_v1, %v2311_v7  ;;  %v455_v15 = vrot.slane %v447_v4, %v2729_v11  ;;  %v462_v16 = vrot.slane %v448_v36, %v2729_v11  ;;  %v2831_v17 = vrot.slane %v300_v6, %v2720_v8 }
  0x3f   : > { %2486 = vadd.xlane.f32.xlu0 %v2313_v14  ;;  %v471_v18 = vrot.slane %v463_v9, %v2729_v11  ;;  %v478_v19 = vrot.slane %v464_v10, %v2729_v11  ;;  %v315_v45 = vcombine.low %v2815_v0, %v2825_v12  ;;  %v316_v20 = vcombine.high %v2815_v0, %v2825_v12 }
  0x40   : > { %v479_v21 = vcombine.high %v455_v15, %v2688_v13  ;;  %v480_v22 = vcombine.high %v462_v16, %v2688_v13  ;;  %v1444_v23 = vsel %vm1275_vm0, %v455_v15, 0.0  ;;  %v1458_v24 = vsel %vm1275_vm0, %v462_v16, 0.0 }
  0x41   : > { %v481_v25 = vcombine.high %v471_v18, %v2688_v13  ;;  %v482_v26 = vcombine.high %v478_v19, %v2688_v13  ;;  %v1445_v27 = vrot.slane %v1444_v23, 4  ;;  %v1459_v28 = vrot.slane %v1458_v24, 4 }
  0x42   : > { %v1451_v29 = vsel %vm1275_vm0, %v479_v21, 0.0  ;;  %v1465_v46 = vsel %vm1275_vm0, %v480_v22, 0.0  ;;  %v1472_v30 = vsel %vm1275_vm0, %v471_v18, 0.0  ;;  %v1486_v31 = vsel %vm1275_vm0, %v478_v19, 0.0 }
  0x43   : > { %v1446_v32 = vadd.f32 %v1445_v27, %v1444_v23  ;;  %v1452_v33 = vrot.slane %v1451_v29, 4  ;;  %v1460_v34 = vadd.f32 %v1459_v28, %v1458_v24  ;;  %v1466_v37 = vrot.slane %v1465_v46, 4 }
  0x44   : > { %v1473_v38 = vrot.slane %v1472_v30, 4  ;;  %v1479_v39 = vsel %vm1275_vm0, %v481_v25, 0.0  ;;  %v1487_v40 = vrot.slane %v1486_v31, 4  ;;  %v1493_v41 = vsel %vm1275_vm0, %v482_v26, 0.0 }
  0x45   : > { %v1447_v42 = vrot.slane %v1446_v32, 2  ;;  %v1453_v43 = vadd.f32 %v1452_v33, %v1451_v29  ;;  %v1461_v44 = vrot.slane %v1460_v34, 2  ;;  %v1467_v47 = vadd.f32 %v1466_v37, %v1465_v46 }
  0x46   : > { %v1474_v48 = vadd.f32 %v1473_v38, %v1472_v30  ;;  %v1480_v49 = vrot.slane %v1479_v39, 4  ;;  %v1488_v50 = vadd.f32 %v1487_v40, %v1486_v31  ;;  %v1494_v51 = vrot.slane %v1493_v41, 4 }
  0x47   : > { %v1448_v52 = vadd.f32 %v1447_v42, %v1446_v32  ;;  %v1454_v53 = vrot.slane %v1453_v43, 2  ;;  %v1462_v54 = vadd.f32 %v1461_v44, %v1460_v34  ;;  %v1468_v55 = vrot.slane %v1467_v47, 2 }
  0x48   : > { %v1475_v56 = vrot.slane %v1474_v48, 2  ;;  %v1481_v57 = vadd.f32 %v1480_v49, %v1479_v39  ;;  %v1489_v58 = vrot.slane %v1488_v50, 2  ;;  %v1495_v59 = vadd.f32 %v1494_v51, %v1493_v41 }
  0x49   : > { %v1449_v60 = vrot.slane %v1448_v52, 1  ;;  %v1455_v61 = vadd.f32 %v1454_v53, %v1453_v43  ;;  %v1463_v62 = vrot.slane %v1462_v54, 1  ;;  %v1469_v63 = vadd.f32 %v1468_v55, %v1467_v47 }
  0x4a   : > { %v1476_v0 = vadd.f32 %v1475_v56, %v1474_v48  ;;  %v1482_v35 = vrot.slane %v1481_v57, 2  ;;  %v1490_v1 = vadd.f32 %v1489_v58, %v1488_v50  ;;  %v1496_v2 = vrot.slane %v1495_v59, 2 }
  0x4b   : > { %v1450_v3 = vadd.f32 %v1449_v60, %v1448_v52  ;;  %v1456_v4 = vrot.slane %v1455_v61, 1  ;;  %v1464_v36 = vadd.f32 %v1463_v62, %v1462_v54  ;;  %v1470_v6 = vrot.slane %v1469_v63, 1 }
  0x4c   : > { %v1477_v7 = vrot.slane %v1476_v0, 1  ;;  %v1483_v9 = vadd.f32 %v1482_v35, %v1481_v57  ;;  %v1491_v10 = vrot.slane %v1490_v1, 1  ;;  %v1497_v12 = vadd.f32 %v1496_v2, %v1495_v59 }
  0x4d   : > { %v1457_v14 = vadd.f32 %v1456_v4, %v1455_v61  ;;  %v1471_v15 = vadd.f32 %v1470_v6, %v1469_v63  ;;  %v323_v16 = vrot.slane %v315_v45, %v2729_v11  ;;  %v330_v18 = vrot.slane %v316_v20, %v2729_v11 }
  0x4e   : > { %v1478_v19 = vadd.f32 %v1477_v7, %v1476_v0  ;;  %v1484_v21 = vrot.slane %v1483_v9, 1  ;;  %v1492_v22 = vadd.f32 %v1491_v10, %v1490_v1  ;;  %v1498_v23 = vrot.slane %v1497_v12, 1 }
  0x4f   : > { %v2328_v24 = vsel %vm2300_vm1, %v1457_v14, %v1450_v3  ;;  %v331_v25 = vcombine.low %v2820_v5, %v2831_v17  ;;  %v332_v26 = vcombine.high %v2820_v5, %v2831_v17  ;;  %v347_v27 = vcombine.high %v323_v16, %v2688_v13 }
  0x50   : > { %v1485_v28 = vadd.f32 %v1484_v21, %v1483_v9  ;;  %v1499_v29 = vadd.f32 %v1498_v23, %v1497_v12  ;;  %v2329_v45 = vsel %vm2302_vm2, %v1464_v36, %v2328_v24  ;;  %v348_v20 = vcombine.high %v330_v18, %v2688_v13  ;;  %v181_v23 = vld [vmem:[%s2725_s14 + $0x50] sm:$0xff] }
  0x51   : > { %v2330_v46 = vsel %vm2304_vm3, %v1471_v15, %v2329_v45  ;;  %v339_v30 = vrot.slane %v331_v25, %v2729_v11  ;;  %v346_v31 = vrot.slane %v332_v26, %v2729_v11  ;;  %v1332_v32 = vsel %vm1275_vm0, %v323_v16, 0.0 }
  0x52   : > { %v2331_v33 = vsel %vm2306_vm4, %v1478_v19, %v2330_v46  ;;  %v1333_v34 = vrot.slane %v1332_v32, 4  ;;  %v1339_v5 = vsel %vm1275_vm0, %v347_v27, 0.0  ;;  %v1346_v17 = vsel %vm1275_vm0, %v330_v18, 0.0  ;;  %v182_v46 = vld [vmem:[%s2725_s14 + $0x58] sm:$0xff] }
  0x53   : > { %v2332_v37 = vsel %vm2308_vm5, %v1485_v28, %v2331_v33  ;;  %v349_v38 = vcombine.high %v339_v30, %v2688_v13  ;;  %v350_v39 = vcombine.high %v346_v31, %v2688_v13  ;;  %v1340_v40 = vrot.slane %v1339_v5, 4 }
  0x54   : > { %v2333_v41 = vsel %vm2310_vm6, %v1492_v22, %v2332_v37  ;;  %v1334_v42 = vadd.f32 %v1333_v34, %v1332_v32  ;;  %v1347_v43 = vrot.slane %v1346_v17, 4  ;;  %v1353_v44 = vsel %vm1275_vm0, %v348_v20, 0.0  ;;  %v179_v34 = vld [vmem:[%s2725_s14 + $0x40] sm:$0xff] }
  0x55   : > { %v2334_v47 = vsel %vm2312_vm7, %v1499_v29, %v2333_v41  ;;  %v1341_v48 = vadd.f32 %v1340_v40, %v1339_v5  ;;  %v1354_v49 = vrot.slane %v1353_v44, 4  ;;  %v1360_v50 = vsel %vm1275_vm0, %v339_v30, 0.0 }
  0x56   : > { %2492 = vadd.xlane.f32.xlu1 %v2334_v47  ;;  %v1335_v51 = vrot.slane %v1334_v42, 2  ;;  %v1348_v52 = vadd.f32 %v1347_v43, %v1346_v17  ;;  %v1361_v53 = vrot.slane %v1360_v50, 4  ;;  %v1367_v54 = vsel %vm1275_vm0, %v349_v38, 0.0  ;;  %v180_v43 = vld [vmem:[%s2725_s14 + $0x48] sm:$0xff] }
  0x57   : > { %v1342_v55 = vrot.slane %v1341_v48, 2  ;;  %v1355_v56 = vadd.f32 %v1354_v49, %v1353_v44  ;;  %v1368_v57 = vrot.slane %v1367_v54, 4  ;;  %v1374_v58 = vsel %vm1275_vm0, %v346_v31, 0.0 }
  0x58   : > { %v1336_v59 = vadd.f32 %v1335_v51, %v1334_v42  ;;  %v1349_v60 = vrot.slane %v1348_v52, 2  ;;  %v1362_v61 = vadd.f32 %v1361_v53, %v1360_v50  ;;  %v1375_v62 = vrot.slane %v1374_v58, 4 }
  0x59   : > { %v1343_v63 = vadd.f32 %v1342_v55, %v1341_v48  ;;  %v1356_v0 = vrot.slane %v1355_v56, 2  ;;  %v1369_v35 = vadd.f32 %v1368_v57, %v1367_v54  ;;  %v1381_v1 = vsel %vm1275_vm0, %v350_v39, 0.0 }
  0x5a   : > { %v1337_v2 = vrot.slane %v1336_v59, 1  ;;  %v1350_v3 = vadd.f32 %v1349_v60, %v1348_v52  ;;  %v1363_v4 = vrot.slane %v1362_v61, 2  ;;  %v1376_v36 = vadd.f32 %v1375_v62, %v1374_v58 }
  0x5b   : > { %v1344_v6 = vrot.slane %v1343_v63, 1  ;;  %v1357_v7 = vadd.f32 %v1356_v0, %v1355_v56  ;;  %v1370_v9 = vrot.slane %v1369_v35, 2  ;;  %v1382_v10 = vrot.slane %v1381_v1, 4 }
  0x5c   : > { %v1338_v12 = vadd.f32 %v1337_v2, %v1336_v59  ;;  %v1351_v14 = vrot.slane %v1350_v3, 1  ;;  %v1364_v15 = vadd.f32 %v1363_v4, %v1362_v61  ;;  %v1377_v16 = vrot.slane %v1376_v36, 2 }
  0x5d   : > { %v1345_v18 = vadd.f32 %v1344_v6, %v1343_v63  ;;  %v1358_v19 = vrot.slane %v1357_v7, 1  ;;  %v1371_v21 = vadd.f32 %v1370_v9, %v1369_v35  ;;  %v1383_v22 = vadd.f32 %v1382_v10, %v1381_v1 }
  0x5e   : > { %v1352_v24 = vadd.f32 %v1351_v14, %v1350_v3  ;;  %v1365_v25 = vrot.slane %v1364_v15, 1  ;;  %v1378_v26 = vadd.f32 %v1377_v16, %v1376_v36  ;;  %v549_v27 = vcombine.high %v181_v23, %v2688_v13 }
  0x5f   : > { %v1359_v28 = vadd.f32 %v1358_v19, %v1357_v7  ;;  %v1372_v29 = vrot.slane %v1371_v21, 1  ;;  %v1384_v45 = vrot.slane %v1383_v22, 2  ;;  %v2314_v20 = vsel %vm2300_vm1, %v1345_v18, %v1338_v12 }
  0x60   : > { %v1366_v30 = vadd.f32 %v1365_v25, %v1364_v15  ;;  %v1379_v31 = vrot.slane %v1378_v26, 1  ;;  %v2315_v32 = vsel %vm2302_vm2, %v1352_v24, %v2314_v20  ;;  %v556_v33 = vrot.slane %v181_v23, %v2720_v8 }
  0x61   : > { %v1373_v5 = vadd.f32 %v1372_v29, %v1371_v21  ;;  %v1385_v17 = vadd.f32 %v1384_v45, %v1383_v22  ;;  %v2316_v37 = vsel %vm2304_vm3, %v1359_v28, %v2315_v32  ;;  %v563_v38 = vrot.slane %v549_v27, %v2720_v8 }
  0x62   : > { %v1380_v39 = vadd.f32 %v1379_v31, %v1378_v26  ;;  %v2317_v40 = vsel %vm2306_vm4, %v1366_v30, %v2316_v37  ;;  %v564_v41 = vcombine.high %v182_v46, %v2688_v13  ;;  %v571_v42 = vrot.slane %v182_v46, %v2720_v8 }
  0x63   : > { %v1386_v44 = vrot.slane %v1385_v17, 1  ;;  %v2318_v47 = vsel %vm2308_vm5, %v1373_v5, %v2317_v40  ;;  %v483_v48 = vcombine.high %v179_v34, %v2688_v13  ;;  %v490_v49 = vrot.slane %v179_v34, %v2720_v8 }
  0x64   : > { %v2319_v50 = vsel %vm2310_vm6, %v1380_v39, %v2318_v47  ;;  %v578_v51 = vrot.slane %v564_v41, %v2720_v8  ;;  %v579_v52 = vcombine.low %v556_v33, %v571_v42  ;;  %v580_v53 = vcombine.high %v556_v33, %v571_v42 }
  0x65   : > { %v1387_v54 = vadd.f32 %v1386_v44, %v1385_v17  ;;  %v2897_v55 = vrot.slane %v483_v48, %v2720_v8  ;;  %v498_v56 = vcombine.high %v180_v43, %v2688_v13  ;;  %v505_v57 = vrot.slane %v180_v43, %v2720_v8 }
  0x66   : > { %v587_v58 = vrot.slane %v579_v52, %v2729_v11  ;;  %v594_v59 = vrot.slane %v580_v53, %v2729_v11  ;;  %v595_v60 = vcombine.low %v563_v38, %v578_v51  ;;  %v596_v61 = vcombine.high %v563_v38, %v578_v51 }
  0x67   : > { %v2320_v62 = vsel %vm2312_vm7, %v1387_v54, %v2319_v50  ;;  %v2905_v63 = vrot.slane %v498_v56, %v2720_v8  ;;  %v513_v0 = vcombine.low %v490_v49, %v505_v57  ;;  %v514_v35 = vcombine.high %v490_v49, %v505_v57 }
  0x68   : > { %2488 = vadd.xlane.f32.xlu0 %v2320_v62  ;;  %v603_v1 = vrot.slane %v595_v60, %v2729_v11  ;;  %v610_v2 = vrot.slane %v596_v61, %v2729_v11  ;;  %v611_v3 = vcombine.high %v587_v58, %v2688_v13  ;;  %v612_v4 = vcombine.high %v594_v59, %v2688_v13 }
  0x69   : > { %v1556_v36 = vsel %vm1275_vm0, %v587_v58, 0.0  ;;  %v1570_v6 = vsel %vm1275_vm0, %v594_v59, 0.0  ;;  %v2914_v7 = vrot.slane %v513_v0, %v2729_v11  ;;  %v2917_v9 = vrot.slane %v514_v35, %v2729_v11 }
  0x6a   : > { %v613_v10 = vcombine.high %v603_v1, %v2688_v13  ;;  %v614_v12 = vcombine.high %v610_v2, %v2688_v13  ;;  %v1557_v14 = vrot.slane %v1556_v36, 4  ;;  %v1563_v15 = vsel %vm1275_vm0, %v611_v3, 0.0 }
  0x6b   : > { %v1564_v16 = vrot.slane %v1563_v15, 4  ;;  %v1571_v18 = vrot.slane %v1570_v6, 4  ;;  %v1577_v19 = vsel %vm1275_vm0, %v612_v4, 0.0  ;;  %v1584_v21 = vsel %vm1275_vm0, %v603_v1, 0.0 }
  0x6c   : > { %v1558_v22 = vadd.f32 %v1557_v14, %v1556_v36  ;;  %v1578_v23 = vrot.slane %v1577_v19, 4  ;;  %v1585_v24 = vrot.slane %v1584_v21, 4  ;;  %v1591_v25 = vsel %vm1275_vm0, %v613_v10, 0.0 }
  0x6d   : > { %v1565_v26 = vadd.f32 %v1564_v16, %v1563_v15  ;;  %v1572_v27 = vadd.f32 %v1571_v18, %v1570_v6  ;;  %v1592_v28 = vrot.slane %v1591_v25, 4  ;;  %v1598_v29 = vsel %vm1275_vm0, %v610_v2, 0.0 }
  0x6e   : > { %v1559_v45 = vrot.slane %v1558_v22, 2  ;;  %v1579_v20 = vadd.f32 %v1578_v23, %v1577_v19  ;;  %v1586_v46 = vadd.f32 %v1585_v24, %v1584_v21  ;;  %v1599_v30 = vrot.slane %v1598_v29, 4 }
  0x6f   : > { %v1566_v31 = vrot.slane %v1565_v26, 2  ;;  %v1573_v32 = vrot.slane %v1572_v27, 2  ;;  %v1593_v33 = vadd.f32 %v1592_v28, %v1591_v25  ;;  %v1605_v34 = vsel %vm1275_vm0, %v614_v12, 0.0 }
  0x70   : > { %v1560_v5 = vadd.f32 %v1559_v45, %v1558_v22  ;;  %v1580_v17 = vrot.slane %v1579_v20, 2  ;;  %v1587_v37 = vrot.slane %v1586_v46, 2  ;;  %v1600_v38 = vadd.f32 %v1599_v30, %v1598_v29 }
  0x71   : > { %v1567_v39 = vadd.f32 %v1566_v31, %v1565_v26  ;;  %v1574_v40 = vadd.f32 %v1573_v32, %v1572_v27  ;;  %v1594_v41 = vrot.slane %v1593_v33, 2  ;;  %v1606_v42 = vrot.slane %v1605_v34, 4 }
  0x72   : > { %v1561_v43 = vrot.slane %v1560_v5, 1  ;;  %v1581_v44 = vadd.f32 %v1580_v17, %v1579_v20  ;;  %v1588_v47 = vadd.f32 %v1587_v37, %v1586_v46  ;;  %v1601_v48 = vrot.slane %v1600_v38, 2 }
  0x73   : > { %v1568_v49 = vrot.slane %v1567_v39, 1  ;;  %v1575_v50 = vrot.slane %v1574_v40, 1  ;;  %v1595_v51 = vadd.f32 %v1594_v41, %v1593_v33  ;;  %v1607_v52 = vadd.f32 %v1606_v42, %v1605_v34 }
  0x74   : > { %v1562_v53 = vadd.f32 %v1561_v43, %v1560_v5  ;;  %v1582_v54 = vrot.slane %v1581_v44, 1  ;;  %v1589_v56 = vrot.slane %v1588_v47, 1  ;;  %v1602_v57 = vadd.f32 %v1601_v48, %v1600_v38 }
  0x75   : > { %v1569_v58 = vadd.f32 %v1568_v49, %v1567_v39  ;;  %v1576_v59 = vadd.f32 %v1575_v50, %v1574_v40  ;;  %v1596_v60 = vrot.slane %v1595_v51, 1  ;;  %v1608_v61 = vrot.slane %v1607_v52, 2 }
  0x76   : > { %v1583_v62 = vadd.f32 %v1582_v54, %v1581_v44  ;;  %v1590_v0 = vadd.f32 %v1589_v56, %v1588_v47  ;;  %v1603_v35 = vrot.slane %v1602_v57, 1  ;;  %v529_v1 = vcombine.low %v2897_v55, %v2905_v63 }
  0x77   : > { %v1597_v2 = vadd.f32 %v1596_v60, %v1595_v51  ;;  %v1609_v3 = vadd.f32 %v1608_v61, %v1607_v52  ;;  %v2342_v4 = vsel %vm2300_vm1, %v1569_v58, %v1562_v53  ;;  %v530_v36 = vcombine.high %v2897_v55, %v2905_v63 }
  0x78   : > { %v1604_v6 = vadd.f32 %v1603_v35, %v1602_v57  ;;  %v2343_v10 = vsel %vm2302_vm2, %v1576_v59, %v2342_v4  ;;  %v537_v12 = vrot.slane %v529_v1, %v2729_v11  ;;  %v545_v14 = vcombine.high %v2914_v7, %v2688_v13 }
  0x79   : > { %v1610_v15 = vrot.slane %v1609_v3, 1  ;;  %v2344_v16 = vsel %vm2304_vm3, %v1583_v62, %v2343_v10  ;;  %v544_v18 = vrot.slane %v530_v36, %v2729_v11  ;;  %v546_v19 = vcombine.high %v2917_v9, %v2688_v13  ;;  %v185_v36 = vld [vmem:[%s2725_s14 + $0x70] sm:$0xff] }
  0x7a   : > { %v2345_v21 = vsel %vm2306_vm4, %v1590_v0, %v2344_v16  ;;  %v547_v55 = vcombine.high %v537_v12, %v2688_v13  ;;  %v1500_v63 = vsel %vm1275_vm0, %v2914_v7, 0.0  ;;  %v1507_v22 = vsel %vm1275_vm0, %v545_v14, 0.0 }
  0x7b   : > { %v1611_v23 = vadd.f32 %v1610_v15, %v1609_v3  ;;  %v2346_v24 = vsel %vm2308_vm5, %v1597_v2, %v2345_v21  ;;  %v548_v25 = vcombine.high %v544_v18, %v2688_v13  ;;  %v1501_v26 = vrot.slane %v1500_v63, 4  ;;  %v186_v21 = vld [vmem:[%s2725_s14 + $0x78] sm:$0xff] }
  0x7c   : > { %v2347_v27 = vsel %vm2310_vm6, %v1604_v6, %v2346_v24  ;;  %v1508_v28 = vrot.slane %v1507_v22, 4  ;;  %v1514_v29 = vsel %vm1275_vm0, %v2917_v9, 0.0  ;;  %v1521_v45 = vsel %vm1275_vm0, %v546_v19, 0.0  ;;  %v183_v24 = vld [vmem:[%s2725_s14 + $0x60] sm:$0xff] }
  0x7d   : > { %v2348_v20 = vsel %vm2312_vm7, %v1611_v23, %v2347_v27  ;;  %v1502_v46 = vadd.f32 %v1501_v26, %v1500_v63  ;;  %v1515_v7 = vrot.slane %v1514_v29, 4  ;;  %v1522_v30 = vrot.slane %v1521_v45, 4 }
  0x7e   : > { %2496 = vadd.xlane.f32.xlu1 %v2348_v20  ;;  %v1509_v31 = vadd.f32 %v1508_v28, %v1507_v22  ;;  %v1528_v32 = vsel %vm1275_vm0, %v537_v12, 0.0  ;;  %v1535_v33 = vsel %vm1275_vm0, %v547_v55, 0.0  ;;  %v1542_v34 = vsel %vm1275_vm0, %v544_v18, 0.0 }
  0x7f   : > { %v1503_v5 = vrot.slane %v1502_v46, 2  ;;  %v1516_v17 = vadd.f32 %v1515_v7, %v1514_v29  ;;  %v1523_v37 = vadd.f32 %v1522_v30, %v1521_v45  ;;  %v1529_v38 = vrot.slane %v1528_v32, 4 }
  0x80   : > { %v1510_v9 = vrot.slane %v1509_v31, 2  ;;  %v1536_v39 = vrot.slane %v1535_v33, 4  ;;  %v1543_v40 = vrot.slane %v1542_v34, 4  ;;  %v1549_v41 = vsel %vm1275_vm0, %v548_v25, 0.0 }
  0x81   : > { %v1504_v42 = vadd.f32 %v1503_v5, %v1502_v46  ;;  %v1517_v43 = vrot.slane %v1516_v17, 2  ;;  %v1524_v44 = vrot.slane %v1523_v37, 2  ;;  %v1530_v47 = vadd.f32 %v1529_v38, %v1528_v32  ;;  %v184_v46 = vld [vmem:[%s2725_s14 + $0x68] sm:$0xff] }
  0x82   : > { %v1511_v48 = vadd.f32 %v1510_v9, %v1509_v31  ;;  %v1537_v49 = vadd.f32 %v1536_v39, %v1535_v33  ;;  %v1544_v50 = vadd.f32 %v1543_v40, %v1542_v34  ;;  %v1550_v51 = vrot.slane %v1549_v41, 4 }
  0x83   : > { %v1505_v52 = vrot.slane %v1504_v42, 1  ;;  %v1518_v53 = vadd.f32 %v1517_v43, %v1516_v17  ;;  %v1525_v54 = vadd.f32 %v1524_v44, %v1523_v37  ;;  %v1531_v56 = vrot.slane %v1530_v47, 2 }
  0x84   : > { %v1512_v57 = vrot.slane %v1511_v48, 1  ;;  %v1538_v58 = vrot.slane %v1537_v49, 2  ;;  %v1545_v59 = vrot.slane %v1544_v50, 2  ;;  %v1551_v60 = vadd.f32 %v1550_v51, %v1549_v41 }
  0x85   : > { %v1506_v61 = vadd.f32 %v1505_v52, %v1504_v42  ;;  %v1519_v62 = vrot.slane %v1518_v53, 1  ;;  %v1526_v0 = vrot.slane %v1525_v54, 1  ;;  %v1532_v35 = vadd.f32 %v1531_v56, %v1530_v47 }
  0x86   : > { %v1513_v1 = vadd.f32 %v1512_v57, %v1511_v48  ;;  %v1539_v2 = vadd.f32 %v1538_v58, %v1537_v49  ;;  %v1546_v3 = vadd.f32 %v1545_v59, %v1544_v50  ;;  %v1552_v4 = vrot.slane %v1551_v60, 2 }
  0x87   : > { %v1520_v6 = vadd.f32 %v1519_v62, %v1518_v53  ;;  %v1527_v10 = vadd.f32 %v1526_v0, %v1525_v54  ;;  %v1533_v12 = vrot.slane %v1532_v35, 1  ;;  %v681_v14 = vcombine.high %v185_v36, %v2688_v13 }
  0x88   : > { %v1540_v15 = vrot.slane %v1539_v2, 1  ;;  %v1547_v16 = vrot.slane %v1546_v3, 1  ;;  %v1553_v18 = vadd.f32 %v1552_v4, %v1551_v60  ;;  %v2335_v19 = vsel %vm2300_vm1, %v1513_v1, %v1506_v61 }
  0x89   : > { %v1534_v55 = vadd.f32 %v1533_v12, %v1532_v35  ;;  %v2336_v63 = vsel %vm2302_vm2, %v1520_v6, %v2335_v19  ;;  %v688_v22 = vrot.slane %v185_v36, %v2720_v8  ;;  %v695_v23 = vrot.slane %v681_v14, %v2720_v8 }
  0x8a   : > { %v1541_v25 = vadd.f32 %v1540_v15, %v1539_v2  ;;  %v1548_v26 = vadd.f32 %v1547_v16, %v1546_v3  ;;  %v1554_v27 = vrot.slane %v1553_v18, 1  ;;  %v2337_v28 = vsel %vm2304_vm3, %v1527_v10, %v2336_v63 }
  0x8b   : > { %v2338_v29 = vsel %vm2306_vm4, %v1534_v55, %v2337_v28  ;;  %v696_v45 = vcombine.high %v186_v21, %v2688_v13  ;;  %v703_v20 = vrot.slane %v186_v21, %v2720_v8  ;;  %v615_v7 = vcombine.high %v183_v24, %v2688_v13 }
  0x8c   : > { %v1555_v30 = vadd.f32 %v1554_v27, %v1553_v18  ;;  %v2339_v31 = vsel %vm2308_vm5, %v1541_v25, %v2338_v29  ;;  %v622_v32 = vrot.slane %v183_v24, %v2720_v8  ;;  %v630_v33 = vcombine.high %v184_v46, %v2688_v13 }
  0x8d   : > { %v2340_v34 = vsel %vm2310_vm6, %v1548_v26, %v2339_v31  ;;  %v710_v5 = vrot.slane %v696_v45, %v2720_v8  ;;  %v711_v17 = vcombine.low %v688_v22, %v703_v20  ;;  %v712_v37 = vcombine.high %v688_v22, %v703_v20 }
  0x8e   : > { %v2341_v38 = vsel %vm2312_vm7, %v1555_v30, %v2340_v34  ;;  %v2977_v9 = vrot.slane %v615_v7, %v2720_v8  ;;  %v637_v39 = vrot.slane %v184_v46, %v2720_v8  ;;  %v2981_v40 = vrot.slane %v630_v33, %v2720_v8 }
  0x8f   : > { %2494 = vadd.xlane.f32.xlu0 %v2341_v38  ;;  %v719_v41 = vrot.slane %v711_v17, %v2729_v11  ;;  %v726_v42 = vrot.slane %v712_v37, %v2729_v11  ;;  %v727_v43 = vcombine.low %v695_v23, %v710_v5  ;;  %v728_v44 = vcombine.high %v695_v23, %v710_v5 }
  0x90   : > { %v645_v47 = vcombine.low %v622_v32, %v637_v39  ;;  %v646_v48 = vcombine.high %v622_v32, %v637_v39  ;;  %v661_v49 = vcombine.low %v2977_v9, %v2981_v40  ;;  %v662_v50 = vcombine.high %v2977_v9, %v2981_v40 }
  0x91   : > { %v735_v51 = vrot.slane %v727_v43, %v2729_v11  ;;  %v742_v52 = vrot.slane %v728_v44, %v2729_v11  ;;  %v743_v53 = vcombine.high %v719_v41, %v2688_v13  ;;  %v744_v54 = vcombine.high %v726_v42, %v2688_v13 }
  0x92   : > { %v1668_v56 = vsel %vm1275_vm0, %v719_v41, 0.0  ;;  %v1682_v57 = vsel %vm1275_vm0, %v726_v42, 0.0  ;;  %v2996_v58 = vrot.slane %v645_v47, %v2729_v11  ;;  %v2999_v59 = vrot.slane %v646_v48, %v2729_v11 }
  0x93   : > { %v745_v60 = vcombine.high %v735_v51, %v2688_v13  ;;  %v746_v61 = vcombine.high %v742_v52, %v2688_v13  ;;  %v1669_v62 = vrot.slane %v1668_v56, 4  ;;  %v1675_v0 = vsel %vm1275_vm0, %v743_v53, 0.0 }
  0x94   : > { %v1676_v35 = vrot.slane %v1675_v0, 4  ;;  %v1683_v1 = vrot.slane %v1682_v57, 4  ;;  %v1689_v2 = vsel %vm1275_vm0, %v744_v54, 0.0  ;;  %v1696_v3 = vsel %vm1275_vm0, %v735_v51, 0.0 }
  0x95   : > { %v1670_v4 = vadd.f32 %v1669_v62, %v1668_v56  ;;  %v1690_v36 = vrot.slane %v1689_v2, 4  ;;  %v1697_v6 = vrot.slane %v1696_v3, 4  ;;  %v1703_v10 = vsel %vm1275_vm0, %v745_v60, 0.0 }
  0x96   : > { %v1677_v12 = vadd.f32 %v1676_v35, %v1675_v0  ;;  %v1684_v14 = vadd.f32 %v1683_v1, %v1682_v57  ;;  %v1704_v15 = vrot.slane %v1703_v10, 4  ;;  %v1710_v16 = vsel %vm1275_vm0, %v742_v52, 0.0 }
  0x97   : > { %v1671_v18 = vrot.slane %v1670_v4, 2  ;;  %v1691_v19 = vadd.f32 %v1690_v36, %v1689_v2  ;;  %v1698_v21 = vadd.f32 %v1697_v6, %v1696_v3  ;;  %v1711_v55 = vrot.slane %v1710_v16, 4 }
  0x98   : > { %v1678_v63 = vrot.slane %v1677_v12, 2  ;;  %v1685_v22 = vrot.slane %v1684_v14, 2  ;;  %v1705_v23 = vadd.f32 %v1704_v15, %v1703_v10  ;;  %v1717_v24 = vsel %vm1275_vm0, %v746_v61, 0.0 }
  0x99   : > { %v1672_v25 = vadd.f32 %v1671_v18, %v1670_v4  ;;  %v1692_v26 = vrot.slane %v1691_v19, 2  ;;  %v1699_v27 = vrot.slane %v1698_v21, 2  ;;  %v1712_v28 = vadd.f32 %v1711_v55, %v1710_v16 }
  0x9a   : > { %v1679_v29 = vadd.f32 %v1678_v63, %v1677_v12  ;;  %v1686_v45 = vadd.f32 %v1685_v22, %v1684_v14  ;;  %v1706_v20 = vrot.slane %v1705_v23, 2  ;;  %v1718_v46 = vrot.slane %v1717_v24, 4 }
  0x9b   : > { %v1673_v7 = vrot.slane %v1672_v25, 1  ;;  %v1693_v30 = vadd.f32 %v1692_v26, %v1691_v19  ;;  %v1700_v31 = vadd.f32 %v1699_v27, %v1698_v21  ;;  %v1713_v32 = vrot.slane %v1712_v28, 2 }
  0x9c   : > { %v1680_v33 = vrot.slane %v1679_v29, 1  ;;  %v1687_v34 = vrot.slane %v1686_v45, 1  ;;  %v1707_v5 = vadd.f32 %v1706_v20, %v1705_v23  ;;  %v1719_v17 = vadd.f32 %v1718_v46, %v1717_v24 }
  0x9d   : > { %v1674_v37 = vadd.f32 %v1673_v7, %v1672_v25  ;;  %v1694_v38 = vrot.slane %v1693_v30, 1  ;;  %v1701_v39 = vrot.slane %v1700_v31, 1  ;;  %v1714_v41 = vadd.f32 %v1713_v32, %v1712_v28 }
  0x9e   : > { %v1681_v42 = vadd.f32 %v1680_v33, %v1679_v29  ;;  %v1688_v43 = vadd.f32 %v1687_v34, %v1686_v45  ;;  %v1708_v44 = vrot.slane %v1707_v5, 1  ;;  %v1720_v47 = vrot.slane %v1719_v17, 2 }
  0x9f   : > { %v1695_v48 = vadd.f32 %v1694_v38, %v1693_v30  ;;  %v1702_v51 = vadd.f32 %v1701_v39, %v1700_v31  ;;  %v1715_v52 = vrot.slane %v1714_v41, 1  ;;  %v669_v53 = vrot.slane %v661_v49, %v2729_v11 }
  0xa0   : > { %v1709_v54 = vadd.f32 %v1708_v44, %v1707_v5  ;;  %v1721_v56 = vadd.f32 %v1720_v47, %v1719_v17  ;;  %v2356_v57 = vsel %vm2300_vm1, %v1681_v42, %v1674_v37  ;;  %v676_v60 = vrot.slane %v662_v50, %v2729_v11 }
  0xa1   : > { %v1716_v61 = vadd.f32 %v1715_v52, %v1714_v41  ;;  %v2357_v62 = vsel %vm2302_vm2, %v1688_v43, %v2356_v57  ;;  %v677_v0 = vcombine.high %v2996_v58, %v2688_v13  ;;  %v678_v35 = vcombine.high %v2999_v59, %v2688_v13 }
  0xa2   : > { %v1722_v1 = vrot.slane %v1721_v56, 1  ;;  %v2358_v49 = vsel %vm2304_vm3, %v1695_v48, %v2357_v62  ;;  %v679_v2 = vcombine.high %v669_v53, %v2688_v13  ;;  %v680_v3 = vcombine.high %v676_v60, %v2688_v13 }
  0xa3   : > { %v2359_v4 = vsel %vm2306_vm4, %v1702_v51, %v2358_v49  ;;  %v1612_v9 = vsel %vm1275_vm0, %v2996_v58, 0.0  ;;  %v1619_v40 = vsel %vm1275_vm0, %v677_v0, 0.0  ;;  %v1626_v50 = vsel %vm1275_vm0, %v2999_v59, 0.0 }
  0xa4   : > { %v1723_v36 = vadd.f32 %v1722_v1, %v1721_v56  ;;  %v2360_v6 = vsel %vm2308_vm5, %v1709_v54, %v2359_v4  ;;  %v1613_v10 = vrot.slane %v1612_v9, 4  ;;  %v1620_v12 = vrot.slane %v1619_v40, 4  ;;  %v190_v4 = vld [vmem:[%s2725_s14 + $0x98] sm:$0xff] }
  0xa5   : > { %v2361_v14 = vsel %vm2310_vm6, %v1716_v61, %v2360_v6  ;;  %v1627_v15 = vrot.slane %v1626_v50, 4  ;;  %v1633_v16 = vsel %vm1275_vm0, %v678_v35, 0.0  ;;  %v1640_v18 = vsel %vm1275_vm0, %v669_v53, 0.0 }
  0xa6   : > { %v2362_v19 = vsel %vm2312_vm7, %v1723_v36, %v2361_v14  ;;  %v1614_v58 = vadd.f32 %v1613_v10, %v1612_v9  ;;  %v1621_v21 = vadd.f32 %v1620_v12, %v1619_v40  ;;  %v1634_v55 = vrot.slane %v1633_v16, 4  ;;  %v187_v9 = vld [vmem:[%s2725_s14 + $0x80] sm:$0xff] }
  0xa7   : > { %2500 = vadd.xlane.f32.xlu1 %v2362_v19  ;;  %v1628_v63 = vadd.f32 %v1627_v15, %v1626_v50  ;;  %v1641_v59 = vrot.slane %v1640_v18, 4  ;;  %v1647_v22 = vsel %vm1275_vm0, %v679_v2, 0.0  ;;  %v1654_v23 = vsel %vm1275_vm0, %v676_v60, 0.0  ;;  %v189_v60 = vld [vmem:[%s2725_s14 + $0x90] sm:$0xff] }
  0xa8   : > { %v1615_v24 = vrot.slane %v1614_v58, 2  ;;  %v1622_v25 = vrot.slane %v1621_v21, 2  ;;  %v1635_v26 = vadd.f32 %v1634_v55, %v1633_v16  ;;  %v1648_v27 = vrot.slane %v1647_v22, 4  ;;  %v188_v16 = vld [vmem:[%s2725_s14 + $0x88] sm:$0xff] }
  0xa9   : > { %v1629_v28 = vrot.slane %v1628_v63, 2  ;;  %v1642_v29 = vadd.f32 %v1641_v59, %v1640_v18  ;;  %v1655_v45 = vrot.slane %v1654_v23, 4  ;;  %v1661_v20 = vsel %vm1275_vm0, %v680_v3, 0.0 }
  0xaa   : > { %v1616_v46 = vadd.f32 %v1615_v24, %v1614_v58  ;;  %v1623_v7 = vadd.f32 %v1622_v25, %v1621_v21  ;;  %v1636_v30 = vrot.slane %v1635_v26, 2  ;;  %v1649_v31 = vadd.f32 %v1648_v27, %v1647_v22 }
  0xab   : > { %v1630_v32 = vadd.f32 %v1629_v28, %v1628_v63  ;;  %v1643_v33 = vrot.slane %v1642_v29, 2  ;;  %v1656_v34 = vadd.f32 %v1655_v45, %v1654_v23  ;;  %v1662_v5 = vrot.slane %v1661_v20, 4 }
  0xac   : > { %v1617_v17 = vrot.slane %v1616_v46, 1  ;;  %v1624_v37 = vrot.slane %v1623_v7, 1  ;;  %v1637_v38 = vadd.f32 %v1636_v30, %v1635_v26  ;;  %v1650_v39 = vrot.slane %v1649_v31, 2 }
  0xad   : > { %v1631_v41 = vrot.slane %v1630_v32, 1  ;;  %v1644_v42 = vadd.f32 %v1643_v33, %v1642_v29  ;;  %v1657_v43 = vrot.slane %v1656_v34, 2  ;;  %v1663_v44 = vadd.f32 %v1662_v5, %v1661_v20 }
  0xae   : > { %v1618_v47 = vadd.f32 %v1617_v17, %v1616_v46  ;;  %v1625_v48 = vadd.f32 %v1624_v37, %v1623_v7  ;;  %v1638_v51 = vrot.slane %v1637_v38, 1  ;;  %v1651_v52 = vadd.f32 %v1650_v39, %v1649_v31 }
  0xaf   : > { %v1632_v53 = vadd.f32 %v1631_v41, %v1630_v32  ;;  %v1645_v54 = vrot.slane %v1644_v42, 1  ;;  %v1658_v56 = vadd.f32 %v1657_v43, %v1656_v34  ;;  %v1664_v57 = vrot.slane %v1663_v44, 2 }
  0xb0   : > { %v1639_v61 = vadd.f32 %v1638_v51, %v1637_v38  ;;  %v1652_v62 = vrot.slane %v1651_v52, 1  ;;  %v2349_v0 = vsel %vm2300_vm1, %v1625_v48, %v1618_v47  ;;  %v813_v35 = vcombine.high %v189_v60, %v2688_v13 }
  0xb1   : > { %v1646_v1 = vadd.f32 %v1645_v54, %v1644_v42  ;;  %v1659_v49 = vrot.slane %v1658_v56, 1  ;;  %v1665_v2 = vadd.f32 %v1664_v57, %v1663_v44  ;;  %v2350_v3 = vsel %vm2302_vm2, %v1632_v53, %v2349_v0 }
  0xb2   : > { %v1653_v40 = vadd.f32 %v1652_v62, %v1651_v52  ;;  %v2351_v50 = vsel %vm2304_vm3, %v1639_v61, %v2350_v3  ;;  %v820_v36 = vrot.slane %v189_v60, %v2720_v8  ;;  %v827_v6 = vrot.slane %v813_v35, %v2720_v8 }
  0xb3   : > { %v1660_v10 = vadd.f32 %v1659_v49, %v1658_v56  ;;  %v1666_v12 = vrot.slane %v1665_v2, 1  ;;  %v2352_v14 = vsel %vm2306_vm4, %v1646_v1, %v2351_v50  ;;  %v828_v15 = vcombine.high %v190_v4, %v2688_v13 }
  0xb4   : > { %v2353_v18 = vsel %vm2308_vm5, %v1653_v40, %v2352_v14  ;;  %v835_v19 = vrot.slane %v190_v4, %v2720_v8  ;;  %v747_v58 = vcombine.high %v187_v9, %v2688_v13  ;;  %v3053_v21 = vrot.slane %v187_v9, %v2720_v8 }
  0xb5   : > { %v1667_v55 = vadd.f32 %v1666_v12, %v1665_v2  ;;  %v2354_v63 = vsel %vm2310_vm6, %v1660_v10, %v2353_v18  ;;  %v842_v59 = vrot.slane %v828_v15, %v2720_v8  ;;  %v762_v22 = vcombine.high %v188_v16, %v2688_v13 }
  0xb6   : > { %v843_v23 = vcombine.low %v820_v36, %v835_v19  ;;  %v844_v24 = vcombine.high %v820_v36, %v835_v19  ;;  %v3059_v25 = vrot.slane %v747_v58, %v2720_v8  ;;  %v3062_v26 = vrot.slane %v188_v16, %v2720_v8 }
  0xb7   : > { %v2355_v27 = vsel %vm2312_vm7, %v1667_v55, %v2354_v63  ;;  %v859_v28 = vcombine.low %v827_v6, %v842_v59  ;;  %v860_v29 = vcombine.high %v827_v6, %v842_v59  ;;  %v3066_v45 = vrot.slane %v762_v22, %v2720_v8 }
  0xb8   : > { %2498 = vadd.xlane.f32.xlu0 %v2355_v27  ;;  %v851_v20 = vrot.slane %v843_v23, %v2729_v11  ;;  %v858_v46 = vrot.slane %v844_v24, %v2729_v11  ;;  %v777_v7 = vcombine.low %v3053_v21, %v3062_v26  ;;  %v778_v30 = vcombine.high %v3053_v21, %v3062_v26 }
  0xb9   : > { %v867_v31 = vrot.slane %v859_v28, %v2729_v11  ;;  %v874_v32 = vrot.slane %v860_v29, %v2729_v11  ;;  %v793_v33 = vcombine.low %v3059_v25, %v3066_v45  ;;  %v794_v34 = vcombine.high %v3059_v25, %v3066_v45 }
  0xba   : > { %v875_v5 = vcombine.high %v851_v20, %v2688_v13  ;;  %v876_v17 = vcombine.high %v858_v46, %v2688_v13  ;;  %v1780_v37 = vsel %vm1275_vm0, %v851_v20, 0.0  ;;  %v1794_v38 = vsel %vm1275_vm0, %v858_v46, 0.0 }
  0xbb   : > { %v877_v39 = vcombine.high %v867_v31, %v2688_v13  ;;  %v878_v41 = vcombine.high %v874_v32, %v2688_v13  ;;  %v1781_v42 = vrot.slane %v1780_v37, 4  ;;  %v1795_v43 = vrot.slane %v1794_v38, 4 }
  0xbc   : > { %v1787_v44 = vsel %vm1275_vm0, %v875_v5, 0.0  ;;  %v1801_v47 = vsel %vm1275_vm0, %v876_v17, 0.0  ;;  %v1808_v48 = vsel %vm1275_vm0, %v867_v31, 0.0  ;;  %v1822_v51 = vsel %vm1275_vm0, %v874_v32, 0.0 }
  0xbd   : > { %v1782_v52 = vadd.f32 %v1781_v42, %v1780_v37  ;;  %v1788_v53 = vrot.slane %v1787_v44, 4  ;;  %v1796_v54 = vadd.f32 %v1795_v43, %v1794_v38  ;;  %v1802_v56 = vrot.slane %v1801_v47, 4 }
  0xbe   : > { %v1809_v57 = vrot.slane %v1808_v48, 4  ;;  %v1815_v60 = vsel %vm1275_vm0, %v877_v39, 0.0  ;;  %v1823_v61 = vrot.slane %v1822_v51, 4  ;;  %v1829_v62 = vsel %vm1275_vm0, %v878_v41, 0.0 }
  0xbf   : > { %v1783_v0 = vrot.slane %v1782_v52, 2  ;;  %v1789_v35 = vadd.f32 %v1788_v53, %v1787_v44  ;;  %v1797_v1 = vrot.slane %v1796_v54, 2  ;;  %v1803_v49 = vadd.f32 %v1802_v56, %v1801_v47 }
  0xc0   : > { %v1810_v2 = vadd.f32 %v1809_v57, %v1808_v48  ;;  %v1816_v3 = vrot.slane %v1815_v60, 4  ;;  %v1824_v4 = vadd.f32 %v1823_v61, %v1822_v51  ;;  %v1830_v9 = vrot.slane %v1829_v62, 4 }
  0xc1   : > { %v1784_v40 = vadd.f32 %v1783_v0, %v1782_v52  ;;  %v1790_v50 = vrot.slane %v1789_v35, 2  ;;  %v1798_v36 = vadd.f32 %v1797_v1, %v1796_v54  ;;  %v1804_v6 = vrot.slane %v1803_v49, 2 }
  0xc2   : > { %v1811_v10 = vrot.slane %v1810_v2, 2  ;;  %v1817_v12 = vadd.f32 %v1816_v3, %v1815_v60  ;;  %v1825_v14 = vrot.slane %v1824_v4, 2  ;;  %v1831_v15 = vadd.f32 %v1830_v9, %v1829_v62 }
  0xc3   : > { %v1785_v16 = vrot.slane %v1784_v40, 1  ;;  %v1791_v18 = vadd.f32 %v1790_v50, %v1789_v35  ;;  %v1799_v19 = vrot.slane %v1798_v36, 1  ;;  %v1805_v58 = vadd.f32 %v1804_v6, %v1803_v49 }
  0xc4   : > { %v1812_v21 = vadd.f32 %v1811_v10, %v1810_v2  ;;  %v1818_v55 = vrot.slane %v1817_v12, 2  ;;  %v1826_v63 = vadd.f32 %v1825_v14, %v1824_v4  ;;  %v1832_v59 = vrot.slane %v1831_v15, 2 }
  0xc5   : > { %v1786_v22 = vadd.f32 %v1785_v16, %v1784_v40  ;;  %v1792_v23 = vrot.slane %v1791_v18, 1  ;;  %v1800_v24 = vadd.f32 %v1799_v19, %v1798_v36  ;;  %v1806_v26 = vrot.slane %v1805_v58, 1 }
  0xc6   : > { %v1813_v27 = vrot.slane %v1812_v21, 1  ;;  %v1819_v28 = vadd.f32 %v1818_v55, %v1817_v12  ;;  %v1827_v29 = vrot.slane %v1826_v63, 1  ;;  %v1833_v20 = vadd.f32 %v1832_v59, %v1831_v15 }
  0xc7   : > { %v1793_v46 = vadd.f32 %v1792_v23, %v1791_v18  ;;  %v1807_v31 = vadd.f32 %v1806_v26, %v1805_v58  ;;  %v785_v32 = vrot.slane %v777_v7, %v2729_v11  ;;  %v792_v5 = vrot.slane %v778_v30, %v2729_v11 }
  0xc8   : > { %v1814_v17 = vadd.f32 %v1813_v27, %v1812_v21  ;;  %v1820_v37 = vrot.slane %v1819_v28, 1  ;;  %v1828_v38 = vadd.f32 %v1827_v29, %v1826_v63  ;;  %v1834_v39 = vrot.slane %v1833_v20, 1 }
  0xc9   : > { %v2370_v41 = vsel %vm2300_vm1, %v1793_v46, %v1786_v22  ;;  %v801_v42 = vrot.slane %v793_v33, %v2729_v11  ;;  %v808_v43 = vrot.slane %v794_v34, %v2729_v11  ;;  %v809_v7 = vcombine.high %v785_v32, %v2688_v13 }
  0xca   : > { %v1821_v44 = vadd.f32 %v1820_v37, %v1819_v28  ;;  %v1835_v30 = vadd.f32 %v1834_v39, %v1833_v20  ;;  %v2371_v47 = vsel %vm2302_vm2, %v1800_v24, %v2370_v41  ;;  %v810_v48 = vcombine.high %v792_v5, %v2688_v13 }
  0xcb   : > { %v2372_v51 = vsel %vm2304_vm3, %v1807_v31, %v2371_v47  ;;  %v811_v52 = vcombine.high %v801_v42, %v2688_v13  ;;  %v812_v53 = vcombine.high %v808_v43, %v2688_v13  ;;  %v1724_v33 = vsel %vm1275_vm0, %v785_v32, 0.0 }
  0xcc   : > { %v2373_v54 = vsel %vm2306_vm4, %v1814_v17, %v2372_v51  ;;  %v1725_v25 = vrot.slane %v1724_v33, 4  ;;  %v1731_v45 = vsel %vm1275_vm0, %v809_v7, 0.0  ;;  %v1738_v34 = vsel %vm1275_vm0, %v792_v5, 0.0  ;;  %v193_v5 = vld [vmem:[%s2725_s14 + $0xb0] sm:$0xff]  ;;  %v194_v7 = vld [vmem:[%s2725_s14 + $0xb8] sm:$0xff] }
  0xcd   : > { %v2374_v56 = vsel %vm2308_vm5, %v1821_v44, %v2373_v54  ;;  %v1732_v57 = vrot.slane %v1731_v45, 4  ;;  %v1739_v60 = vrot.slane %v1738_v34, 4  ;;  %v1745_v61 = vsel %vm1275_vm0, %v810_v48, 0.0 }
  0xce   : > { %v2375_v62 = vsel %vm2310_vm6, %v1828_v38, %v2374_v56  ;;  %v1726_v0 = vadd.f32 %v1725_v25, %v1724_v33  ;;  %v1746_v35 = vrot.slane %v1745_v61, 4  ;;  %v1752_v1 = vsel %vm1275_vm0, %v801_v42, 0.0 }
  0xcf   : > { %v2376_v49 = vsel %vm2312_vm7, %v1835_v30, %v2375_v62  ;;  %v1733_v2 = vadd.f32 %v1732_v57, %v1731_v45  ;;  %v1740_v3 = vadd.f32 %v1739_v60, %v1738_v34  ;;  %v1753_v4 = vrot.slane %v1752_v1, 4  ;;  %v191_v57 = vld [vmem:[%s2725_s14 + $0xa0] sm:$0xff] }
  0xd0   : > { %2504 = vadd.xlane.f32.xlu1 %v2376_v49  ;;  %v1727_v9 = vrot.slane %v1726_v0, 2  ;;  %v1747_v40 = vadd.f32 %v1746_v35, %v1745_v61  ;;  %v1759_v50 = vsel %vm1275_vm0, %v811_v52, 0.0  ;;  %v1766_v36 = vsel %vm1275_vm0, %v808_v43, 0.0 }
  0xd1   : > { %v1734_v6 = vrot.slane %v1733_v2, 2  ;;  %v1741_v10 = vrot.slane %v1740_v3, 2  ;;  %v1754_v12 = vadd.f32 %v1753_v4, %v1752_v1  ;;  %v1760_v14 = vrot.slane %v1759_v50, 4 }
  0xd2   : > { %v1728_v15 = vadd.f32 %v1727_v9, %v1726_v0  ;;  %v1748_v16 = vrot.slane %v1747_v40, 2  ;;  %v1767_v18 = vrot.slane %v1766_v36, 4  ;;  %v1773_v19 = vsel %vm1275_vm0, %v812_v53, 0.0 }
  0xd3   : > { %v1735_v58 = vadd.f32 %v1734_v6, %v1733_v2  ;;  %v1742_v21 = vadd.f32 %v1741_v10, %v1740_v3  ;;  %v1755_v55 = vrot.slane %v1754_v12, 2  ;;  %v1761_v63 = vadd.f32 %v1760_v14, %v1759_v50  ;;  %v192_v3 = vld [vmem:[%s2725_s14 + $0xa8] sm:$0xff]  ;;  %v3147_v14 = vld [vmem:[%s2725_s14 + $0xd0] sm:$0xff] }
  0xd4   : > { %v1729_v59 = vrot.slane %v1728_v15, 1  ;;  %v1749_v22 = vadd.f32 %v1748_v16, %v1747_v40  ;;  %v1768_v23 = vadd.f32 %v1767_v18, %v1766_v36  ;;  %v1774_v24 = vrot.slane %v1773_v19, 4 }
  0xd5   : > { %v1736_v26 = vrot.slane %v1735_v58, 1  ;;  %v1743_v27 = vrot.slane %v1742_v21, 1  ;;  %v1756_v28 = vadd.f32 %v1755_v55, %v1754_v12  ;;  %v1762_v29 = vrot.slane %v1761_v63, 2 }
  0xd6   : > { %v1730_v20 = vadd.f32 %v1729_v59, %v1728_v15  ;;  %v1750_v46 = vrot.slane %v1749_v22, 1  ;;  %v1769_v31 = vrot.slane %v1768_v23, 2  ;;  %v1775_v32 = vadd.f32 %v1774_v24, %v1773_v19 }
  0xd7   : > { %v1737_v17 = vadd.f32 %v1736_v26, %v1735_v58  ;;  %v1744_v37 = vadd.f32 %v1743_v27, %v1742_v21  ;;  %v1757_v38 = vrot.slane %v1756_v28, 1  ;;  %v1763_v39 = vadd.f32 %v1762_v29, %v1761_v63 }
  0xd8   : > { %v1751_v41 = vadd.f32 %v1750_v46, %v1749_v22  ;;  %v1770_v42 = vadd.f32 %v1769_v31, %v1768_v23  ;;  %v1776_v43 = vrot.slane %v1775_v32, 2  ;;  %v945_v44 = vcombine.high %v193_v5, %v2688_v13 }
  0xd9   : > { %v1758_v30 = vadd.f32 %v1757_v38, %v1756_v28  ;;  %v1764_v47 = vrot.slane %v1763_v39, 1  ;;  %v2363_v48 = vsel %vm2300_vm1, %v1737_v17, %v1730_v20  ;;  %v952_v51 = vrot.slane %v193_v5, %v2720_v8 }
  0xda   : > { %v1771_v52 = vrot.slane %v1770_v42, 1  ;;  %v1777_v53 = vadd.f32 %v1776_v43, %v1775_v32  ;;  %v2364_v33 = vsel %vm2302_vm2, %v1744_v37, %v2363_v48  ;;  %v959_v54 = vrot.slane %v945_v44, %v2720_v8 }
  0xdb   : > { %v1765_v25 = vadd.f32 %v1764_v47, %v1763_v39  ;;  %v2365_v45 = vsel %vm2304_vm3, %v1751_v41, %v2364_v33  ;;  %v960_v34 = vcombine.high %v194_v7, %v2688_v13  ;;  %v967_v56 = vrot.slane %v194_v7, %v2720_v8 }
  0xdc   : > { %v1772_v60 = vadd.f32 %v1771_v52, %v1770_v42  ;;  %v1778_v61 = vrot.slane %v1777_v53, 1  ;;  %v2366_v62 = vsel %vm2306_vm4, %v1758_v30, %v2365_v45  ;;  %v879_v0 = vcombine.high %v191_v57, %v2688_v13 }
  0xdd   : > { %v2367_v35 = vsel %vm2308_vm5, %v1765_v25, %v2366_v62  ;;  %v974_v1 = vrot.slane %v960_v34, %v2720_v8  ;;  %v975_v49 = vcombine.low %v952_v51, %v967_v56  ;;  %v976_v2 = vcombine.high %v952_v51, %v967_v56 }
  0xde   : > { %v1779_v4 = vadd.f32 %v1778_v61, %v1777_v53  ;;  %v2368_v9 = vsel %vm2310_vm6, %v1772_v60, %v2367_v35  ;;  %v3139_v40 = vrot.slane %v191_v57, %v2720_v8  ;;  %v3142_v50 = vrot.slane %v879_v0, %v2720_v8 }
  0xdf   : > { %v983_v36 = vrot.slane %v975_v49, %v2729_v11  ;;  %v990_v6 = vrot.slane %v976_v2, %v2729_v11  ;;  %v991_v10 = vcombine.low %v959_v54, %v974_v1  ;;  %v992_v12 = vcombine.high %v959_v54, %v974_v1 }
  0xe0   : > { %v2369_v15 = vsel %vm2312_vm7, %v1779_v4, %v2368_v9  ;;  %v894_v16 = vcombine.high %v192_v3, %v2688_v13  ;;  %v3152_v18 = vrot.slane %v192_v3, %v2720_v8  ;;  %v3156_v19 = vcombine.high %v3147_v14, %v2688_v13 }
  0xe1   : > { %2502 = vadd.xlane.f32.xlu0 %v2369_v15  ;;  %v999_v58 = vrot.slane %v991_v10, %v2729_v11  ;;  %v1006_v21 = vrot.slane %v992_v12, %v2729_v11  ;;  %v1007_v55 = vcombine.high %v983_v36, %v2688_v13  ;;  %v1008_v63 = vcombine.high %v990_v6, %v2688_v13 }
  0xe2   : > { %v1892_v59 = vsel %vm1275_vm0, %v983_v36, 0.0  ;;  %v1906_v22 = vsel %vm1275_vm0, %v990_v6, 0.0  ;;  %v3165_v23 = vrot.slane %v894_v16, %v2720_v8  ;;  %v909_v24 = vcombine.low %v3139_v40, %v3152_v18 }
  0xe3   : > { %v1009_v26 = vcombine.high %v999_v58, %v2688_v13  ;;  %v1010_v27 = vcombine.high %v1006_v21, %v2688_v13  ;;  %v1893_v28 = vrot.slane %v1892_v59, 4  ;;  %v1899_v29 = vsel %vm1275_vm0, %v1007_v55, 0.0 }
  0xe4   : > { %v1900_v20 = vrot.slane %v1899_v29, 4  ;;  %v1907_v46 = vrot.slane %v1906_v22, 4  ;;  %v1913_v31 = vsel %vm1275_vm0, %v1008_v63, 0.0  ;;  %v1920_v32 = vsel %vm1275_vm0, %v999_v58, 0.0 }
  0xe5   : > { %v1894_v5 = vadd.f32 %v1893_v28, %v1892_v59  ;;  %v1914_v17 = vrot.slane %v1913_v31, 4  ;;  %v1921_v37 = vrot.slane %v1920_v32, 4  ;;  %v1927_v38 = vsel %vm1275_vm0, %v1009_v26, 0.0 }
  0xe6   : > { %v1901_v39 = vadd.f32 %v1900_v20, %v1899_v29  ;;  %v1908_v41 = vadd.f32 %v1907_v46, %v1906_v22  ;;  %v1928_v42 = vrot.slane %v1927_v38, 4  ;;  %v1934_v43 = vsel %vm1275_vm0, %v1006_v21, 0.0 }
  0xe7   : > { %v1895_v7 = vrot.slane %v1894_v5, 2  ;;  %v1915_v44 = vadd.f32 %v1914_v17, %v1913_v31  ;;  %v1922_v30 = vadd.f32 %v1921_v37, %v1920_v32  ;;  %v1935_v47 = vrot.slane %v1934_v43, 4 }
  0xe8   : > { %v1902_v48 = vrot.slane %v1901_v39, 2  ;;  %v1909_v51 = vrot.slane %v1908_v41, 2  ;;  %v1929_v52 = vadd.f32 %v1928_v42, %v1927_v38  ;;  %v1941_v53 = vsel %vm1275_vm0, %v1010_v27, 0.0 }
  0xe9   : > { %v1896_v33 = vadd.f32 %v1895_v7, %v1894_v5  ;;  %v1916_v54 = vrot.slane %v1915_v44, 2  ;;  %v1923_v25 = vrot.slane %v1922_v30, 2  ;;  %v1936_v45 = vadd.f32 %v1935_v47, %v1934_v43 }
  0xea   : > { %v1903_v34 = vadd.f32 %v1902_v48, %v1901_v39  ;;  %v1910_v56 = vadd.f32 %v1909_v51, %v1908_v41  ;;  %v1930_v57 = vrot.slane %v1929_v52, 2  ;;  %v1942_v60 = vrot.slane %v1941_v53, 4 }
  0xeb   : > { %v1897_v61 = vrot.slane %v1896_v33, 1  ;;  %v1917_v62 = vadd.f32 %v1916_v54, %v1915_v44  ;;  %v1924_v0 = vadd.f32 %v1923_v25, %v1922_v30  ;;  %v1937_v35 = vrot.slane %v1936_v45, 2 }
  0xec   : > { %v1904_v1 = vrot.slane %v1903_v34, 1  ;;  %v1911_v49 = vrot.slane %v1910_v56, 1  ;;  %v1931_v2 = vadd.f32 %v1930_v57, %v1929_v52  ;;  %v1943_v3 = vadd.f32 %v1942_v60, %v1941_v53 }
  0xed   : > { %v1898_v4 = vadd.f32 %v1897_v61, %v1896_v33  ;;  %v1918_v9 = vrot.slane %v1917_v62, 1  ;;  %v1925_v36 = vrot.slane %v1924_v0, 1  ;;  %v1938_v6 = vadd.f32 %v1937_v35, %v1936_v45 }
  0xee   : > { %v1905_v10 = vadd.f32 %v1904_v1, %v1903_v34  ;;  %v1912_v12 = vadd.f32 %v1911_v49, %v1910_v56  ;;  %v1932_v15 = vrot.slane %v1931_v2, 1  ;;  %v1944_v16 = vrot.slane %v1943_v3, 2 }
  0xef   : > { %v1919_v58 = vadd.f32 %v1918_v9, %v1917_v62  ;;  %v1926_v21 = vadd.f32 %v1925_v36, %v1924_v0  ;;  %v1939_v55 = vrot.slane %v1938_v6, 1  ;;  %v910_v63 = vcombine.high %v3139_v40, %v3152_v18 }
  0xf0   : > { %v1933_v59 = vadd.f32 %v1932_v15, %v1931_v2  ;;  %v1945_v22 = vadd.f32 %v1944_v16, %v1943_v3  ;;  %v2384_v26 = vsel %vm2300_vm1, %v1905_v10, %v1898_v4  ;;  %v917_v27 = vrot.slane %v909_v24, %v2729_v11 }
  0xf1   : > { %v1940_v28 = vadd.f32 %v1939_v55, %v1938_v6  ;;  %v2385_v29 = vsel %vm2302_vm2, %v1912_v12, %v2384_v26  ;;  %v924_v20 = vrot.slane %v910_v63, %v2729_v11  ;;  %v925_v46 = vcombine.low %v3142_v50, %v3165_v23 }
  0xf2   : > { %v1946_v31 = vrot.slane %v1945_v22, 1  ;;  %v2386_v32 = vsel %vm2304_vm3, %v1919_v58, %v2385_v29  ;;  %v926_v40 = vcombine.high %v3142_v50, %v3165_v23  ;;  %v941_v18 = vcombine.high %v917_v27, %v2688_v13 }
  0xf3   : > { %v2387_v5 = vsel %vm2306_vm4, %v1926_v21, %v2386_v32  ;;  %v933_v24 = vrot.slane %v925_v46, %v2729_v11  ;;  %v942_v17 = vcombine.high %v924_v20, %v2688_v13  ;;  %v1836_v37 = vsel %vm1275_vm0, %v917_v27, 0.0 }
  0xf4   : > { %v1947_v38 = vadd.f32 %v1946_v31, %v1945_v22  ;;  %v2388_v39 = vsel %vm2308_vm5, %v1933_v59, %v2387_v5  ;;  %v940_v41 = vrot.slane %v926_v40, %v2729_v11  ;;  %v1837_v42 = vrot.slane %v1836_v37, 4 }
  0xf5   : > { %v2389_v43 = vsel %vm2310_vm6, %v1940_v28, %v2388_v39  ;;  %v943_v50 = vcombine.high %v933_v24, %v2688_v13  ;;  %v1843_v23 = vsel %vm1275_vm0, %v941_v18, 0.0  ;;  %v1850_v7 = vsel %vm1275_vm0, %v924_v20, 0.0 }
  0xf6   : > { %v2390_v44 = vsel %vm2312_vm7, %v1947_v38, %v2389_v43  ;;  %v944_v30 = vcombine.high %v940_v41, %v2688_v13  ;;  %v1838_v47 = vadd.f32 %v1837_v42, %v1836_v37  ;;  %v1844_v48 = vrot.slane %v1843_v23, 4 }
  0xf7   : > { %2508 = vadd.xlane.f32.xlu1 %v2390_v44  ;;  %v1851_v51 = vrot.slane %v1850_v7, 4  ;;  %v1857_v52 = vsel %vm1275_vm0, %v942_v17, 0.0  ;;  %v1864_v53 = vsel %vm1275_vm0, %v933_v24, 0.0  ;;  %v1871_v33 = vsel %vm1275_vm0, %v943_v50, 0.0  ;;  %v198_v24 = vld [vmem:[%s2725_s14 + $0xd8] sm:$0xff] }
  0xf8   : > { %v1839_v54 = vrot.slane %v1838_v47, 2  ;;  %v1845_v25 = vadd.f32 %v1844_v48, %v1843_v23  ;;  %v1858_v45 = vrot.slane %v1857_v52, 4  ;;  %v1865_v34 = vrot.slane %v1864_v53, 4 }
  0xf9   : > { %v1852_v56 = vadd.f32 %v1851_v51, %v1850_v7  ;;  %v1872_v57 = vrot.slane %v1871_v33, 4  ;;  %v1878_v60 = vsel %vm1275_vm0, %v940_v41, 0.0  ;;  %v1885_v61 = vsel %vm1275_vm0, %v944_v30, 0.0  ;;  %v195_v41 = vld [vmem:[%s2725_s14 + $0xc0] sm:$0xff]  ;;  %v196_v30 = vld [vmem:[%s2725_s14 + $0xc8] sm:$0xff] }
  0xfa   : > { %v1840_v62 = vadd.f32 %v1839_v54, %v1838_v47  ;;  %v1846_v0 = vrot.slane %v1845_v25, 2  ;;  %v1859_v35 = vadd.f32 %v1858_v45, %v1857_v52  ;;  %v1866_v1 = vadd.f32 %v1865_v34, %v1864_v53 }
  0xfb   : > { %v1853_v49 = vrot.slane %v1852_v56, 2  ;;  %v1873_v2 = vadd.f32 %v1872_v57, %v1871_v33  ;;  %v1879_v3 = vrot.slane %v1878_v60, 4  ;;  %v1886_v4 = vrot.slane %v1885_v61, 4 }
  0xfc   : > { %v1841_v9 = vrot.slane %v1840_v62, 1  ;;  %v1847_v36 = vadd.f32 %v1846_v0, %v1845_v25  ;;  %v1860_v6 = vrot.slane %v1859_v35, 2  ;;  %v1867_v10 = vrot.slane %v1866_v1, 2 }
  0xfd   : > { %v1854_v12 = vadd.f32 %v1853_v49, %v1852_v56  ;;  %v1874_v15 = vrot.slane %v1873_v2, 2  ;;  %v1880_v16 = vadd.f32 %v1879_v3, %v1878_v60  ;;  %v1887_v58 = vadd.f32 %v1886_v4, %v1885_v61 }
  0xfe   : > { %v1842_v21 = vadd.f32 %v1841_v9, %v1840_v62  ;;  %v1848_v55 = vrot.slane %v1847_v36, 1  ;;  %v1861_v63 = vadd.f32 %v1860_v6, %v1859_v35  ;;  %v1868_v59 = vadd.f32 %v1867_v10, %v1866_v1 }
  0xff   : > { %v1855_v22 = vrot.slane %v1854_v12, 1  ;;  %v1875_v26 = vadd.f32 %v1874_v15, %v1873_v2  ;;  %v1881_v27 = vrot.slane %v1880_v16, 2  ;;  %v1888_v28 = vrot.slane %v1887_v58, 2 }
 0x100   : > { %v1849_v29 = vadd.f32 %v1848_v55, %v1847_v36  ;;  %v1862_v20 = vrot.slane %v1861_v63, 1  ;;  %v1869_v46 = vrot.slane %v1868_v59, 1  ;;  %v1084_v31 = vrot.slane %v3147_v14, %v2720_v8 }
 0x101   : > { %v1856_v32 = vadd.f32 %v1855_v22, %v1854_v12  ;;  %v1876_v40 = vrot.slane %v1875_v26, 1  ;;  %v1882_v18 = vadd.f32 %v1881_v27, %v1880_v16  ;;  %v1889_v5 = vadd.f32 %v1888_v28, %v1887_v58 }
 0x102   : > { %v1863_v17 = vadd.f32 %v1862_v20, %v1861_v63  ;;  %v1870_v37 = vadd.f32 %v1869_v46, %v1868_v59  ;;  %v2377_v38 = vsel %vm2300_vm1, %v1849_v29, %v1842_v21  ;;  %v1091_v39 = vrot.slane %v3156_v19, %v2720_v8 }
 0x103   : > { %v1877_v42 = vadd.f32 %v1876_v40, %v1875_v26  ;;  %v1883_v43 = vrot.slane %v1882_v18, 1  ;;  %v1890_v50 = vrot.slane %v1889_v5, 1  ;;  %v2378_v23 = vsel %vm2302_vm2, %v1856_v32, %v2377_v38 }
 0x104   : > { %v2379_v14 = vsel %vm2304_vm3, %v1863_v17, %v2378_v23  ;;  %v1092_v7 = vcombine.high %v198_v24, %v2688_v13  ;;  %v1099_v44 = vrot.slane %v198_v24, %v2720_v8  ;;  %v1011_v47 = vcombine.high %v195_v41, %v2688_v13 }
 0x105   : > { %v1884_v48 = vadd.f32 %v1883_v43, %v1882_v18  ;;  %v1891_v51 = vadd.f32 %v1890_v50, %v1889_v5  ;;  %v2380_v52 = vsel %vm2306_vm4, %v1870_v37, %v2379_v14  ;;  %v3221_v19 = vrot.slane %v195_v41, %v2720_v8 }
 0x106   : > { %v2381_v53 = vsel %vm2308_vm5, %v1877_v42, %v2380_v52  ;;  %v1106_v33 = vrot.slane %v1092_v7, %v2720_v8  ;;  %v1107_v54 = vcombine.low %v1084_v31, %v1099_v44  ;;  %v1108_v25 = vcombine.high %v1084_v31, %v1099_v44 }
 0x107   : > { %v2382_v45 = vsel %vm2310_vm6, %v1884_v48, %v2381_v53  ;;  %v3227_v34 = vrot.slane %v1011_v47, %v2720_v8  ;;  %v1026_v56 = vcombine.high %v196_v30, %v2688_v13  ;;  %v3231_v57 = vrot.slane %v196_v30, %v2720_v8 }
 0x108   : > { %v2383_v60 = vsel %vm2312_vm7, %v1891_v51, %v2382_v45  ;;  %v1115_v61 = vrot.slane %v1107_v54, %v2729_v11  ;;  %v1122_v62 = vrot.slane %v1108_v25, %v2729_v11  ;;  %v1123_v0 = vcombine.low %v1091_v39, %v1106_v33 }
 0x109   : > { %2506 = vadd.xlane.f32.xlu0 %v2383_v60  ;;  %v1124_v35 = vcombine.high %v1091_v39, %v1106_v33  ;;  %v3237_v1 = vrot.slane %v1026_v56, %v2720_v8  ;;  %v1041_v49 = vcombine.low %v3221_v19, %v3231_v57  ;;  %v1042_v2 = vcombine.high %v3221_v19, %v3231_v57 }
 0x10a   : > { %v1131_v3 = vrot.slane %v1123_v0, %v2729_v11  ;;  %v1139_v4 = vcombine.high %v1115_v61, %v2688_v13  ;;  %v1140_v9 = vcombine.high %v1122_v62, %v2688_v13  ;;  %v2004_v36 = vsel %vm1275_vm0, %v1115_v61, 0.0 }
 0x10b   : > { %v1138_v6 = vrot.slane %v1124_v35, %v2729_v11  ;;  %v2005_v10 = vrot.slane %v2004_v36, 4  ;;  %v2018_v12 = vsel %vm1275_vm0, %v1122_v62, 0.0  ;;  %v3250_v15 = vrot.slane %v1041_v49, %v2729_v11 }
 0x10c   : > { %v1141_v16 = vcombine.high %v1131_v3, %v2688_v13  ;;  %v2011_v58 = vsel %vm1275_vm0, %v1139_v4, 0.0  ;;  %v2019_v21 = vrot.slane %v2018_v12, 4  ;;  %v2025_v55 = vsel %vm1275_vm0, %v1140_v9, 0.0 }
 0x10d   : > { %v1142_v63 = vcombine.high %v1138_v6, %v2688_v13  ;;  %v2006_v59 = vadd.f32 %v2005_v10, %v2004_v36  ;;  %v2012_v22 = vrot.slane %v2011_v58, 4  ;;  %v2026_v26 = vrot.slane %v2025_v55, 4 }
 0x10e   : > { %v2020_v27 = vadd.f32 %v2019_v21, %v2018_v12  ;;  %v2032_v28 = vsel %vm1275_vm0, %v1131_v3, 0.0  ;;  %v2039_v29 = vsel %vm1275_vm0, %v1141_v16, 0.0  ;;  %v2046_v20 = vsel %vm1275_vm0, %v1138_v6, 0.0 }
 0x10f   : > { %v2007_v46 = vrot.slane %v2006_v59, 2  ;;  %v2013_v31 = vadd.f32 %v2012_v22, %v2011_v58  ;;  %v2027_v32 = vadd.f32 %v2026_v26, %v2025_v55  ;;  %v2033_v40 = vrot.slane %v2032_v28, 4 }
 0x110   : > { %v2021_v18 = vrot.slane %v2020_v27, 2  ;;  %v2040_v5 = vrot.slane %v2039_v29, 4  ;;  %v2047_v24 = vrot.slane %v2046_v20, 4  ;;  %v2053_v17 = vsel %vm1275_vm0, %v1142_v63, 0.0 }
 0x111   : > { %v2008_v37 = vadd.f32 %v2007_v46, %v2006_v59  ;;  %v2014_v38 = vrot.slane %v2013_v31, 2  ;;  %v2028_v39 = vrot.slane %v2027_v32, 2  ;;  %v2034_v41 = vadd.f32 %v2033_v40, %v2032_v28 }
 0x112   : > { %v2022_v42 = vadd.f32 %v2021_v18, %v2020_v27  ;;  %v2041_v43 = vadd.f32 %v2040_v5, %v2039_v29  ;;  %v2048_v50 = vadd.f32 %v2047_v24, %v2046_v20  ;;  %v2054_v23 = vrot.slane %v2053_v17, 4 }
 0x113   : > { %v2009_v14 = vrot.slane %v2008_v37, 1  ;;  %v2015_v7 = vadd.f32 %v2014_v38, %v2013_v31  ;;  %v2029_v44 = vadd.f32 %v2028_v39, %v2027_v32  ;;  %v2035_v30 = vrot.slane %v2034_v41, 2 }
 0x114   : > { %v2023_v47 = vrot.slane %v2022_v42, 1  ;;  %v2042_v48 = vrot.slane %v2041_v43, 2  ;;  %v2049_v51 = vrot.slane %v2048_v50, 2  ;;  %v2055_v52 = vadd.f32 %v2054_v23, %v2053_v17 }
 0x115   : > { %v2010_v19 = vadd.f32 %v2009_v14, %v2008_v37  ;;  %v2016_v53 = vrot.slane %v2015_v7, 1  ;;  %v2030_v33 = vrot.slane %v2029_v44, 1  ;;  %v2036_v54 = vadd.f32 %v2035_v30, %v2034_v41 }
 0x116   : > { %v2024_v25 = vadd.f32 %v2023_v47, %v2022_v42  ;;  %v2043_v45 = vadd.f32 %v2042_v48, %v2041_v43  ;;  %v2050_v56 = vadd.f32 %v2049_v51, %v2048_v50  ;;  %v2056_v57 = vrot.slane %v2055_v52, 2 }
 0x117   : > { %v2017_v60 = vadd.f32 %v2016_v53, %v2015_v7  ;;  %v2031_v61 = vadd.f32 %v2030_v33, %v2029_v44  ;;  %v2037_v62 = vrot.slane %v2036_v54, 1  ;;  %v1056_v0 = vrot.slane %v1042_v2, %v2729_v11 }
 0x118   : > { %v2044_v35 = vrot.slane %v2043_v45, 1  ;;  %v2051_v49 = vrot.slane %v2050_v56, 1  ;;  %v2057_v3 = vadd.f32 %v2056_v57, %v2055_v52  ;;  %v1057_v4 = vcombine.low %v3227_v34, %v3237_v1 }
 0x119   : > { %v2038_v9 = vadd.f32 %v2037_v62, %v2036_v54  ;;  %v2398_v36 = vsel %vm2300_vm1, %v2017_v60, %v2010_v19  ;;  %v1058_v6 = vcombine.high %v3227_v34, %v3237_v1  ;;  %v1073_v10 = vcombine.high %v3250_v15, %v2688_v13 }
 0x11a   : > { %v2045_v12 = vadd.f32 %v2044_v35, %v2043_v45  ;;  %v2052_v16 = vadd.f32 %v2051_v49, %v2050_v56  ;;  %v2058_v58 = vrot.slane %v2057_v3, 1  ;;  %v2399_v2 = vsel %vm2302_vm2, %v2024_v25, %v2398_v36 }
 0x11b   : > { %v2400_v21 = vsel %vm2304_vm3, %v2031_v61, %v2399_v2  ;;  %v1065_v55 = vrot.slane %v1057_v4, %v2729_v11  ;;  %v1072_v63 = vrot.slane %v1058_v6, %v2729_v11  ;;  %v1074_v59 = vcombine.high %v1056_v0, %v2688_v13 }
 0x11c   : > { %v2059_v22 = vadd.f32 %v2058_v58, %v2057_v3  ;;  %v2401_v26 = vsel %vm2306_vm4, %v2038_v9, %v2400_v21  ;;  %v1948_v34 = vsel %vm1275_vm0, %v3250_v15, 0.0  ;;  %v1955_v1 = vsel %vm1275_vm0, %v1073_v10, 0.0  ;;  %v201_v10 = vld [vmem:[%s2725_s14 + $0xf0] sm:$0xff] }
 0x11d   : > { %v2402_v27 = vsel %vm2308_vm5, %v2045_v12, %v2401_v26  ;;  %v1075_v28 = vcombine.high %v1065_v55, %v2688_v13  ;;  %v1076_v29 = vcombine.high %v1072_v63, %v2688_v13  ;;  %v1949_v20 = vrot.slane %v1948_v34, 4 }
 0x11e   : > { %v2403_v46 = vsel %vm2310_vm6, %v2052_v16, %v2402_v27  ;;  %v1956_v31 = vrot.slane %v1955_v1, 4  ;;  %v1962_v32 = vsel %vm1275_vm0, %v1056_v0, 0.0  ;;  %v1969_v40 = vsel %vm1275_vm0, %v1074_v59, 0.0 }
 0x11f   : > { %v2404_v18 = vsel %vm2312_vm7, %v2059_v22, %v2403_v46  ;;  %v1950_v5 = vadd.f32 %v1949_v20, %v1948_v34  ;;  %v1963_v15 = vrot.slane %v1962_v32, 4  ;;  %v1970_v24 = vrot.slane %v1969_v40, 4  ;;  %v202_v22 = vld [vmem:[%s2725_s14 + $0xf8] sm:$0xff] }
 0x120   : > { %2512 = vadd.xlane.f32.xlu1 %v2404_v18  ;;  %v1957_v17 = vadd.f32 %v1956_v31, %v1955_v1  ;;  %v1976_v37 = vsel %vm1275_vm0, %v1065_v55, 0.0  ;;  %v1983_v38 = vsel %vm1275_vm0, %v1075_v28, 0.0  ;;  %v1990_v39 = vsel %vm1275_vm0, %v1072_v63, 0.0  ;;  %v199_v28 = vld [vmem:[%s2725_s14 + $0xe0] sm:$0xff] }
 0x121   : > { %v1951_v41 = vrot.slane %v1950_v5, 2  ;;  %v1964_v42 = vadd.f32 %v1963_v15, %v1962_v32  ;;  %v1971_v43 = vadd.f32 %v1970_v24, %v1969_v40  ;;  %v1977_v50 = vrot.slane %v1976_v37, 4 }
 0x122   : > { %v1958_v23 = vrot.slane %v1957_v17, 2  ;;  %v1984_v14 = vrot.slane %v1983_v38, 4  ;;  %v1991_v7 = vrot.slane %v1990_v39, 4  ;;  %v1997_v44 = vsel %vm1275_vm0, %v1076_v29, 0.0 }
 0x123   : > { %v1952_v30 = vadd.f32 %v1951_v41, %v1950_v5  ;;  %v1965_v47 = vrot.slane %v1964_v42, 2  ;;  %v1972_v48 = vrot.slane %v1971_v43, 2  ;;  %v1978_v51 = vadd.f32 %v1977_v50, %v1976_v37  ;;  %v200_v5 = vld [vmem:[%s2725_s14 + $0xe8] sm:$0xff] }
 0x124   : > { %v1959_v52 = vadd.f32 %v1958_v23, %v1957_v17  ;;  %v1985_v19 = vadd.f32 %v1984_v14, %v1983_v38  ;;  %v1992_v53 = vadd.f32 %v1991_v7, %v1990_v39  ;;  %v1998_v33 = vrot.slane %v1997_v44, 4 }
 0x125   : > { %v1953_v54 = vrot.slane %v1952_v30, 1  ;;  %v1966_v25 = vadd.f32 %v1965_v47, %v1964_v42  ;;  %v1973_v45 = vadd.f32 %v1972_v48, %v1971_v43  ;;  %v1979_v56 = vrot.slane %v1978_v51, 2 }
 0x126   : > { %v1960_v57 = vrot.slane %v1959_v52, 1  ;;  %v1986_v60 = vrot.slane %v1985_v19, 2  ;;  %v1993_v61 = vrot.slane %v1992_v53, 2  ;;  %v1999_v62 = vadd.f32 %v1998_v33, %v1997_v44 }
 0x127   : > { %v1954_v0 = vadd.f32 %v1953_v54, %v1952_v30  ;;  %v1967_v35 = vrot.slane %v1966_v25, 1  ;;  %v1974_v49 = vrot.slane %v1973_v45, 1  ;;  %v1980_v3 = vadd.f32 %v1979_v56, %v1978_v51 }
 0x128   : > { %v1961_v4 = vadd.f32 %v1960_v57, %v1959_v52  ;;  %v1987_v9 = vadd.f32 %v1986_v60, %v1985_v19  ;;  %v1994_v36 = vadd.f32 %v1993_v61, %v1992_v53  ;;  %v2000_v6 = vrot.slane %v1999_v62, 2 }
 0x129   : > { %v1968_v12 = vadd.f32 %v1967_v35, %v1966_v25  ;;  %v1975_v16 = vadd.f32 %v1974_v49, %v1973_v45  ;;  %v1981_v58 = vrot.slane %v1980_v3, 1  ;;  %v1209_v2 = vcombine.high %v201_v10, %v2688_v13 }
 0x12a   : > { %v1988_v21 = vrot.slane %v1987_v9, 1  ;;  %v1995_v55 = vrot.slane %v1994_v36, 1  ;;  %v2001_v63 = vadd.f32 %v2000_v6, %v1999_v62  ;;  %v2391_v59 = vsel %vm2300_vm1, %v1961_v4, %v1954_v0 }
 0x12b   : > { %v1982_v26 = vadd.f32 %v1981_v58, %v1980_v3  ;;  %v2392_v34 = vsel %vm2302_vm2, %v1968_v12, %v2391_v59  ;;  %v1216_v1 = vrot.slane %v201_v10, %v2720_v8  ;;  %v1223_v27 = vrot.slane %v1209_v2, %v2720_v8 }
 0x12c   : > { %v1989_v29 = vadd.f32 %v1988_v21, %v1987_v9  ;;  %v1996_v20 = vadd.f32 %v1995_v55, %v1994_v36  ;;  %v2002_v46 = vrot.slane %v2001_v63, 1  ;;  %v2393_v31 = vsel %vm2304_vm3, %v1975_v16, %v2392_v34 }
 0x12d   : > { %v2394_v32 = vsel %vm2306_vm4, %v1982_v26, %v2393_v31  ;;  %v1224_v40 = vcombine.high %v202_v22, %v2688_v13  ;;  %v1231_v18 = vrot.slane %v202_v22, %v2720_v8  ;;  %v1143_v15 = vcombine.high %v199_v28, %v2688_v13 }
 0x12e   : > { %v2003_v24 = vadd.f32 %v2002_v46, %v2001_v63  ;;  %v2395_v17 = vsel %vm2308_vm5, %v1989_v29, %v2394_v32  ;;  %v1150_v37 = vrot.slane %v199_v28, %v2720_v8  ;;  %v1158_v38 = vcombine.high %v200_v5, %v2688_v13 }
 0x12f   : > { %v2396_v39 = vsel %vm2310_vm6, %v1996_v20, %v2395_v17  ;;  %v1238_v41 = vrot.slane %v1224_v40, %v2720_v8  ;;  %v1239_v42 = vcombine.low %v1216_v1, %v1231_v18  ;;  %v1240_v43 = vcombine.high %v1216_v1, %v1231_v18 }
 0x130   : > { %v2397_v50 = vsel %vm2312_vm7, %v2003_v24, %v2396_v39  ;;  %v3309_v23 = vrot.slane %v1143_v15, %v2720_v8  ;;  %v1165_v14 = vrot.slane %v200_v5, %v2720_v8  ;;  %v3313_v7 = vrot.slane %v1158_v38, %v2720_v8 }
 0x131   : > { %2510 = vadd.xlane.f32.xlu0 %v2397_v50  ;;  %v1247_v44 = vrot.slane %v1239_v42, %v2729_v11  ;;  %v1254_v30 = vrot.slane %v1240_v43, %v2729_v11  ;;  %v1255_v47 = vcombine.low %v1223_v27, %v1238_v41  ;;  %v1256_v48 = vcombine.high %v1223_v27, %v1238_v41 }
 0x132   : > { %v1173_v51 = vcombine.low %v1150_v37, %v1165_v14  ;;  %v1174_v52 = vcombine.high %v1150_v37, %v1165_v14  ;;  %v1189_v19 = vcombine.low %v3309_v23, %v3313_v7  ;;  %v1190_v53 = vcombine.high %v3309_v23, %v3313_v7 }
 0x133   : > { %v1263_v33 = vrot.slane %v1255_v47, %v2729_v11  ;;  %v1270_v8 = vrot.slane %v1256_v48, %v2729_v11  ;;  %v1271_v54 = vcombine.high %v1247_v44, %v2688_v13  ;;  %v1272_v25 = vcombine.high %v1254_v30, %v2688_v13 }
 0x134   : > { %v2116_v45 = vsel %vm1275_vm0, %v1247_v44, 0.0  ;;  %v2130_v56 = vsel %vm1275_vm0, %v1254_v30, 0.0  ;;  %v3328_v57 = vrot.slane %v1173_v51, %v2729_v11  ;;  %v3331_v60 = vrot.slane %v1174_v52, %v2729_v11 }
 0x135   : > { %v1273_v61 = vcombine.high %v1263_v33, %v2688_v13  ;;  %v1274_v62 = vcombine.high %v1270_v8, %v2688_v13  ;;  %v2117_v0 = vrot.slane %v2116_v45, 4  ;;  %v2123_v35 = vsel %vm1275_vm0, %v1271_v54, 0.0  ;;  %v3342_v54 = vpop.xlane.xlu1 %2490 }
 0x136   : > { %v2124_v49 = vrot.slane %v2123_v35, 4  ;;  %v2131_v3 = vrot.slane %v2130_v56, 4  ;;  %v2137_v4 = vsel %vm1275_vm0, %v1272_v25, 0.0  ;;  %v2144_v9 = vsel %vm1275_vm0, %v1263_v33, 0.0 }
 0x137   : > { %v2118_v36 = vadd.f32 %v2117_v0, %v2116_v45  ;;  %v2138_v6 = vrot.slane %v2137_v4, 4  ;;  %v2145_v10 = vrot.slane %v2144_v9, 4  ;;  %v2151_v12 = vsel %vm1275_vm0, %v1273_v61, 0.0 }
 0x138   : > { %v2125_v16 = vadd.f32 %v2124_v49, %v2123_v35  ;;  %v2132_v58 = vadd.f32 %v2131_v3, %v2130_v56  ;;  %v2152_v2 = vrot.slane %v2151_v12, 4  ;;  %v2158_v21 = vsel %vm1275_vm0, %v1270_v8, 0.0 }
 0x139   : > { %v2119_v55 = vrot.slane %v2118_v36, 2  ;;  %v2139_v63 = vadd.f32 %v2138_v6, %v2137_v4  ;;  %v2146_v59 = vadd.f32 %v2145_v10, %v2144_v9  ;;  %v2159_v22 = vrot.slane %v2158_v21, 4 }
 0x13a   : > { %v2126_v26 = vrot.slane %v2125_v16, 2  ;;  %v2133_v34 = vrot.slane %v2132_v58, 2  ;;  %v2153_v1 = vadd.f32 %v2152_v2, %v2151_v12  ;;  %v2165_v27 = vsel %vm1275_vm0, %v1274_v62, 0.0  ;;  %v3349_v62 = vpop.xlane.xlu0 %2486 }
 0x13b   : > { %v2120_v28 = vadd.f32 %v2119_v55, %v2118_v36  ;;  %v2140_v29 = vrot.slane %v2139_v63, 2  ;;  %v2147_v20 = vrot.slane %v2146_v59, 2  ;;  %v2160_v46 = vadd.f32 %v2159_v22, %v2158_v21  ;;  %v3369_v55 = vpop.xlane.xlu1 %2492 }
 0x13c   : > { %v2127_v31 = vadd.f32 %v2126_v26, %v2125_v16  ;;  %v2134_v32 = vadd.f32 %v2133_v34, %v2132_v58  ;;  %v2154_v40 = vrot.slane %v2153_v1, 2  ;;  %v2166_v18 = vrot.slane %v2165_v27, 4 }
 0x13d   : > { %v2121_v5 = vrot.slane %v2120_v28, 1  ;;  %v2141_v15 = vadd.f32 %v2140_v29, %v2139_v63  ;;  %v2148_v24 = vadd.f32 %v2147_v20, %v2146_v59  ;;  %v2161_v17 = vrot.slane %v2160_v46, 2 }
 0x13e   : > { %v2128_v37 = vrot.slane %v2127_v31, 1  ;;  %v2135_v38 = vrot.slane %v2134_v32, 1  ;;  %v2155_v39 = vadd.f32 %v2154_v40, %v2153_v1  ;;  %v2167_v41 = vadd.f32 %v2166_v18, %v2165_v27 }
 0x13f   : > { %v2122_v42 = vadd.f32 %v2121_v5, %v2120_v28  ;;  %v2142_v43 = vrot.slane %v2141_v15, 1  ;;  %v2149_v50 = vrot.slane %v2148_v24, 1  ;;  %v2162_v14 = vadd.f32 %v2161_v17, %v2160_v46 }
 0x140   : > { %v2129_v44 = vadd.f32 %v2128_v37, %v2127_v31  ;;  %v2136_v30 = vadd.f32 %v2135_v38, %v2134_v32  ;;  %v2156_v47 = vrot.slane %v2155_v39, 1  ;;  %v2168_v48 = vrot.slane %v2167_v41, 2 }
 0x141   : > { %v2143_v51 = vadd.f32 %v2142_v43, %v2141_v15  ;;  %v2150_v52 = vadd.f32 %v2149_v50, %v2148_v24  ;;  %v2163_v33 = vrot.slane %v2162_v14, 1  ;;  %v1197_v8 = vrot.slane %v1189_v19, %v2729_v11 }
 0x142   : > { %v2157_v25 = vadd.f32 %v2156_v47, %v2155_v39  ;;  %v2169_v45 = vadd.f32 %v2168_v48, %v2167_v41  ;;  %v2412_v56 = vsel %vm2300_vm1, %v2129_v44, %v2122_v42  ;;  %v1204_v61 = vrot.slane %v1190_v53, %v2729_v11  ;;  %v2497_v42 = vpop.xlane.xlu1 %2496 }
 0x143   : > { %v2164_v0 = vadd.f32 %v2163_v33, %v2162_v14  ;;  %v2413_v35 = vsel %vm2302_vm2, %v2136_v30, %v2412_v56  ;;  %v1205_v49 = vcombine.high %v3328_v57, %v2688_v13  ;;  %v1206_v19 = vcombine.high %v3331_v60, %v2688_v13 }
 0x144   : > { %v2170_v3 = vrot.slane %v2169_v45, 1  ;;  %v2414_v4 = vsel %vm2304_vm3, %v2143_v51, %v2413_v35  ;;  %v1207_v9 = vcombine.high %v1197_v8, %v2688_v13  ;;  %v1208_v36 = vcombine.high %v1204_v61, %v2688_v13 }
 0x145   : > { %v2415_v11 = vsel %vm2306_vm4, %v2150_v52, %v2414_v4  ;;  %v2060_v23 = vsel %vm1275_vm0, %v3328_v57, 0.0  ;;  %v2067_v7 = vsel %vm1275_vm0, %v1205_v49, 0.0  ;;  %v2074_v53 = vsel %vm1275_vm0, %v3331_v60, 0.0  ;;  %v3372_v60 = vpop.xlane.xlu0 %2488 }
 0x146   : > { %v2171_v6 = vadd.f32 %v2170_v3, %v2169_v45  ;;  %v2416_v10 = vsel %vm2308_vm5, %v2157_v25, %v2415_v11  ;;  %v2061_v12 = vrot.slane %v2060_v23, 4  ;;  %v2068_v16 = vrot.slane %v2067_v7, 4 }
 0x147   : > { %v2417_v58 = vsel %vm2310_vm6, %v2164_v0, %v2416_v10  ;;  %v2075_v2 = vrot.slane %v2074_v53, 4  ;;  %v2081_v13 = vsel %vm1275_vm0, %v1206_v19, 0.0  ;;  %v2088_v21 = vsel %vm1275_vm0, %v1197_v8, 0.0 }
 0x148   : > { %v2418_v57 = vsel %vm2312_vm7, %v2171_v6, %v2417_v58  ;;  %v2062_v63 = vadd.f32 %v2061_v12, %v2060_v23  ;;  %v2069_v59 = vadd.f32 %v2068_v16, %v2067_v7  ;;  %v2082_v22 = vrot.slane %v2081_v13, 4  ;;  %v2501_v23 = vpop.xlane.xlu1 %2500 }
 0x149   : > { %2516 = vadd.xlane.f32.xlu1 %v2418_v57  ;;  %v2076_v26 = vadd.f32 %v2075_v2, %v2074_v53  ;;  %v2089_v34 = vrot.slane %v2088_v21, 4  ;;  %v2095_v1 = vsel %vm1275_vm0, %v1207_v9, 0.0  ;;  %v2102_v27 = vsel %vm1275_vm0, %v1204_v61, 0.0  ;;  %v2495_v30 = vpop.xlane.xlu0 %2494 }
 0x14a   : > { %v2063_v28 = vrot.slane %v2062_v63, 2  ;;  %v2070_v29 = vrot.slane %v2069_v59, 2  ;;  %v2083_v20 = vadd.f32 %v2082_v22, %v2081_v13  ;;  %v2096_v46 = vrot.slane %v2095_v1, 4 }
 0x14b   : > { %v2077_v31 = vrot.slane %v2076_v26, 2  ;;  %v2090_v32 = vadd.f32 %v2089_v34, %v2088_v21  ;;  %v2103_v40 = vrot.slane %v2102_v27, 4  ;;  %v2109_v18 = vsel %vm1275_vm0, %v1208_v36, 0.0 }
 0x14c   : > { %v2064_v5 = vadd.f32 %v2063_v28, %v2062_v63  ;;  %v2071_v15 = vadd.f32 %v2070_v29, %v2069_v59  ;;  %v2084_v24 = vrot.slane %v2083_v20, 2  ;;  %v2097_v17 = vadd.f32 %v2096_v46, %v2095_v1 }
 0x14d   : > { %v2078_v37 = vadd.f32 %v2077_v31, %v2076_v26  ;;  %v2091_v38 = vrot.slane %v2090_v32, 2  ;;  %v2104_v39 = vadd.f32 %v2103_v40, %v2102_v27  ;;  %v2110_v41 = vrot.slane %v2109_v18, 4  ;;  %v2499_v12 = vpop.xlane.xlu0 %2498 }
 0x14e   : > { %v2065_v43 = vrot.slane %v2064_v5, 1  ;;  %v2072_v50 = vrot.slane %v2071_v15, 1  ;;  %v2085_v14 = vadd.f32 %v2084_v24, %v2083_v20  ;;  %v2098_v44 = vrot.slane %v2097_v17, 2 }
 0x14f   : > { %v2079_v47 = vrot.slane %v2078_v37, 1  ;;  %v2092_v48 = vadd.f32 %v2091_v38, %v2090_v32  ;;  %v2105_v51 = vrot.slane %v2104_v39, 2  ;;  %v2111_v52 = vadd.f32 %v2110_v41, %v2109_v18 }
 0x150   : > { %v2066_v33 = vadd.f32 %v2065_v43, %v2064_v5  ;;  %v2073_v8 = vadd.f32 %v2072_v50, %v2071_v15  ;;  %v2086_v25 = vrot.slane %v2085_v14, 1  ;;  %v2099_v45 = vadd.f32 %v2098_v44, %v2097_v17 }
 0x151   : > { %v2080_v56 = vadd.f32 %v2079_v47, %v2078_v37  ;;  %v2093_v61 = vrot.slane %v2092_v48, 1  ;;  %v2106_v0 = vadd.f32 %v2105_v51, %v2104_v39  ;;  %v2112_v35 = vrot.slane %v2111_v52, 2 }
 0x152   : > { %v2087_v49 = vadd.f32 %v2086_v25, %v2085_v14  ;;  %v2100_v19 = vrot.slane %v2099_v45, 1  ;;  %v2405_v3 = vsel %vm2300_vm1, %v2073_v8, %v2066_v33  ;;  %v2520_v6 = vmul.f32 0.00390625, %v3342_v54 }
 0x153   : > { %v2094_v4 = vadd.f32 %v2093_v61, %v2092_v48  ;;  %v2107_v9 = vrot.slane %v2106_v0, 1  ;;  %v2113_v36 = vadd.f32 %v2112_v35, %v2111_v52  ;;  %v2406_v11 = vsel %vm2302_vm2, %v2080_v56, %v2405_v3 }
 0x154   : > { %v2101_v7 = vadd.f32 %v2100_v19, %v2099_v45  ;;  %v2407_v53 = vsel %vm2304_vm3, %v2087_v49, %v2406_v11  ;;  %v2518_v10 = vmul.f32 0.00390625, %v3349_v62  ;;  %v2521_v13 = vmul.f32 0.00390625, %v3369_v55  ;;  %2537 = vst.msk [vmem:[%s3383_s18 + $0x10] sm:$0xff] %vm2534_vm8, %v2520_v6 }
 0x155   : > { %v2108_v16 = vadd.f32 %v2107_v9, %v2106_v0  ;;  %v2114_v58 = vrot.slane %v2113_v36, 1  ;;  %v2408_v2 = vsel %vm2306_vm4, %v2094_v4, %v2407_v53  ;;  %v2519_v54 = vmul.f32 0.00390625, %v3372_v60 }
 0x156   : > { %v2409_v21 = vsel %vm2308_vm5, %v2101_v7, %v2408_v2  ;;  %2535 = vst.msk [vmem:[%s3383_s18] sm:$0xff] %vm2534_vm8, %v2518_v10  ;;  %v2523_v62 = vmul.f32 0.00390625, %v2497_v42  ;;  %v2522_v57 = vmul.f32 0.00390625, %v2495_v30  ;;  %2538 = vst.msk [vmem:[%s3383_s18 + $0x18] sm:$0xff] %vm2534_vm8, %v2521_v13  ;;  %v2525_v55 = vmul.f32 0.00390625, %v2501_v23 }
 0x157   : > { %v2115_v63 = vadd.f32 %v2114_v58, %v2113_v36  ;;  %v2410_v59 = vsel %vm2310_vm6, %v2108_v16, %v2409_v21  ;;  %v2524_v22 = vmul.f32 0.00390625, %v2499_v12  ;;  %2536 = vst.msk [vmem:[%s3383_s18 + $0x8] sm:$0xff] %vm2534_vm8, %v2519_v54 }
 0x158   : > { %2540 = vst.msk [vmem:[%s3383_s18 + $0x28] sm:$0xff] %vm2534_vm8, %v2523_v62  ;;  %2539 = vst.msk [vmem:[%s3383_s18 + $0x20] sm:$0xff] %vm2534_vm8, %v2522_v57 }
 0x159   : > { %v2411_v60 = vsel %vm2312_vm7, %v2115_v63, %v2410_v59  ;;  %2542 = vst.msk [vmem:[%s3383_s18 + $0x38] sm:$0xff] %vm2534_vm8, %v2525_v55  ;;  %2541 = vst.msk [vmem:[%s3383_s18 + $0x30] sm:$0xff] %vm2534_vm8, %v2524_v22  ;;  %v2505_v26 = vpop.xlane.xlu1 %2504 }
 0x15a   : > { %2514 = vadd.xlane.f32.xlu0 %v2411_v60  ;;  %v2527_v34 = vmul.f32 0.00390625, %v2505_v26 }
 0x15c   : > { %2544 = vst.msk [vmem:[%s3383_s18 + $0x48] sm:$0xff] %vm2534_vm8, %v2527_v34 }
 0x16a   : > { %v2503_v1 = vpop.xlane.xlu0 %2502 }
 0x16b   : > { %v2526_v27 = vmul.f32 0.00390625, %v2503_v1 }
 0x16d   : > { %2543 = vst.msk [vmem:[%s3383_s18 + $0x40] sm:$0xff] %vm2534_vm8, %v2526_v27 }
 0x180   : > { %v2509_v28 = vpop.xlane.xlu1 %2508 }
 0x181   : > { %v2529_v29 = vmul.f32 0.00390625, %v2509_v28 }
 0x183   : > { %2546 = vst.msk [vmem:[%s3383_s18 + $0x58] sm:$0xff] %vm2534_vm8, %v2529_v29 }
 0x192   : > { %v2507_v20 = vpop.xlane.xlu0 %2506 }
 0x193   : > { %v2528_v46 = vmul.f32 0.00390625, %v2507_v20 }
 0x195   : > { %2545 = vst.msk [vmem:[%s3383_s18 + $0x50] sm:$0xff] %vm2534_vm8, %v2528_v46 }
 0x1a9   : > { %v2513_v31 = vpop.xlane.xlu1 %2512 }
 0x1aa   : > { %v2531_v32 = vmul.f32 0.00390625, %v2513_v31 }
 0x1ac   : > { %2548 = vst.msk [vmem:[%s3383_s18 + $0x68] sm:$0xff] %vm2534_vm8, %v2531_v32 }
 0x1ba   : > { %v2511_v40 = vpop.xlane.xlu0 %2510 }
 0x1bb   : > { %v2530_v18 = vmul.f32 0.00390625, %v2511_v40 }
 0x1bd   : > { %2547 = vst.msk [vmem:[%s3383_s18 + $0x60] sm:$0xff] %vm2534_vm8, %v2530_v18 }
 0x1d2   : > { %v2517_v5 = vpop.xlane.xlu1 %2516 }
 0x1d3   : > { %v2533_v15 = vmul.f32 0.00390625, %v2517_v5 }
 0x1d5   : > { %2550 = vst.msk [vmem:[%s3383_s18 + $0x78] sm:$0xff] %vm2534_vm8, %v2533_v15 }
 0x1e3   : > { %v2515_v24 = vpop.xlane.xlu0 %2514 }
 0x1e4   : > { %v2532_v17 = vmul.f32 0.00390625, %v2515_v24 }
 0x1e6   : > { %2549 = vst.msk [vmem:[%s3383_s18 + $0x70] sm:$0xff] %vm2534_vm8, %v2532_v17 }
 0x1e7 PF: > { %s11_s8 = sadd.s32 1, %s2684_s8   ;;  %s3437_s6 = smov %s2680_s7 }
 0x1e8   : > { %p8_p5 = scmp.ge.s32.totalorder %s11_s8, 4   ;;  %s3438_s7 = smov %s3440_s9 }
 0x1ea   :  { %10 = sbr.rel (!%p8_p5) target bundleno = 2 (0x2), region = 62 }

// kernel: bottleneck_forward.5
= control target key start
LH: loop header
LB: loop body
LE: loop exit
PB: predicated region body
PF: predicated region fallthrough
CT: control target
= control target key end

     0   :  { %s591_s9 = smov 0   ;;  %s593_s10 = smov 0   ;;  %s699_s0 = inlined_call_operand.vmem [shape: f32[256,256], index: 0, kind: input, shape index: {}]   ;;  %s700_s1 = inlined_call_operand.vmem [shape: f32[256,1], index: 1, kind: input, shape index: {}]   ;;  %s701_s2 = inlined_call_operand.vmem [shape: f32[256,256], index: 2, kind: output, shape index: {}]  }
   0x1   :  { %s595_s11 = smov 0  }
   0x2 LB: > { %s24_s12 = sadd.s32 1, %s569_s10  ;;  %p511_p0 = scmp.ge.s32.totalorder %s573_s11, 1  ;;  %s573_s11 = sphi %s595_s11, %s12_s11   ;;  %s569_s10 = sphi %s593_s10, %s703_s10   ;;  %s565_s9 = sphi %s591_s9, %s702_s9  }
   0x3   : > { %p26_p1 = scmp.ge.s32.totalorder %s24_s12, 2  ;;  %p146_p2 = scmp.lt.s32.totalorder %s573_s11, 3 }
   0x5   : > { %s705_s12 = smov (%p26_p1, %s24_s12), 0  ;;  %p147_p3 = pnand %p511_p0, %p146_p2 }
   0x6   : > { %s512_s13 = sshll.u32 (!%p147_p3), %s565_s9, 4 }
   0x7   : > { %150 = sbr.rel (%p147_p3) target bundleno = 172 (0xac), region = 28  ;;  %p185_p4 = scmp.lt.s32.totalorder (!%p147_p3), %s512_s13, 31 }
   0xc   : > { %v575_v0 = vmov 0   ;;  %s707_s13 = smov (!%p185_p4, %s512_s13), 31 }
   0xd   : > { %550 = vset.pattern.permute.xlu1 %v575_v0  ;;  %549 = vset.pattern.permute.xlu0 %v575_v0  ;;  %s516_s14 = sshll.u32 %s707_s13, 3  ;;  %s522_s18 = sshll.u32 %s707_s13, 4 }
   0xe   : > { %s199_s17 = scalar_lea.vmem %s700_s1, %s516_s14  ;;  %s619_s21 = scalar_lea.vmem %s699_s0, %s522_s18 }
   0xf   : > { %v247_v1 = vld [vmem:[%s199_s17 + $0x10] sm:$0xff]  ;;  %v245_v2 = vld [vmem:[%s199_s17] sm:$0xff]  ;;  %v248_v3 = vld [vmem:[%s199_s17 + $0x18] sm:$0xff]  ;;  %s628_s24 = scalar_lea.vmem %s701_s2, %s522_s18 }
  0x10   : > { %273 = vperm.xlu1 %550, %v247_v1   ;;  %263 = vperm.xlu0 %549, %v245_v2   ;;  %v246_v4 = vld [vmem:[%s199_s17 + $0x8] sm:$0xff]  ;;  %v249_v6 = vld [vmem:[%s199_s17 + $0x20] sm:$0xff]  ;;  %v252_v7 = vld [vmem:[%s199_s17 + $0x38] sm:$0xff] }
  0x11   : > { %v250_v5 = vld [vmem:[%s199_s17 + $0x28] sm:$0xff]  ;;  %v251_v8 = vld [vmem:[%s199_s17 + $0x30] sm:$0xff]  ;;  %v253_v10 = vld [vmem:[%s199_s17 + $0x40] sm:$0xff] }
  0x12   : > { %v254_v9 = vld [vmem:[%s199_s17 + $0x48] sm:$0xff]  ;;  %v256_v11 = vld [vmem:[%s199_s17 + $0x58] sm:$0xff]  ;;  %v255_v12 = vld [vmem:[%s199_s17 + $0x50] sm:$0xff] }
  0x13   : > { %v258_v13 = vld [vmem:[%s199_s17 + $0x68] sm:$0xff]  ;;  %v257_v14 = vld [vmem:[%s199_s17 + $0x60] sm:$0xff]  ;;  %v260_v15 = vld [vmem:[%s199_s17 + $0x78] sm:$0xff] }
  0x14   : > { %278 = vperm.xlu1 %550, %v248_v3   ;;  %268 = vperm.xlu0 %549, %v246_v4   ;;  %v259_v16 = vld [vmem:[%s199_s17 + $0x70] sm:$0xff]  ;;  %v217_v17 = vld [vmem:[%s619_s21 + $0x20] sm:$0xff]  ;;  %v218_v18 = vld [vmem:[%s619_s21 + $0x28] sm:$0xff] }
  0x15   : > { %v213_v19 = vld [vmem:[%s619_s21] sm:$0xff]  ;;  %v214_v20 = vld [vmem:[%s619_s21 + $0x8] sm:$0xff]  ;;  %v219_v27 = vld [vmem:[%s619_s21 + $0x30] sm:$0xff] }
  0x16   : > { %v220_v28 = vld [vmem:[%s619_s21 + $0x38] sm:$0xff]  ;;  %v215_v29 = vld [vmem:[%s619_s21 + $0x10] sm:$0xff]  ;;  %v221_v39 = vld [vmem:[%s619_s21 + $0x40] sm:$0xff] }
  0x17   : > { %v216_v30 = vld [vmem:[%s619_s21 + $0x18] sm:$0xff]  ;;  %v223_v37 = vld [vmem:[%s619_s21 + $0x50] sm:$0xff]  ;;  %v222_v40 = vld [vmem:[%s619_s21 + $0x48] sm:$0xff] }
  0x18   : > { %288 = vperm.xlu1 %550, %v250_v5   ;;  %283 = vperm.xlu0 %549, %v249_v6   ;;  %v224_v38 = vld [vmem:[%s619_s21 + $0x58] sm:$0xff]  ;;  %v227_v47 = vld [vmem:[%s619_s21 + $0x70] sm:$0xff]  ;;  %v225_v49 = vld [vmem:[%s619_s21 + $0x60] sm:$0xff] }
  0x19   : > { %v228_v48 = vld [vmem:[%s619_s21 + $0x78] sm:$0xff]  ;;  %v226_v50 = vld [vmem:[%s619_s21 + $0x68] sm:$0xff]  ;;  %v231_v57 = vld [vmem:[%s619_s21 + $0x90] sm:$0xff] }
  0x1a   : > { %v232_v58 = vld [vmem:[%s619_s21 + $0x98] sm:$0xff]  ;;  %v229_v59 = vld [vmem:[%s619_s21 + $0x80] sm:$0xff]  ;;  %v230_v60 = vld [vmem:[%s619_s21 + $0x88] sm:$0xff] }
  0x1b   : > { %v235_v3 = vld [vmem:[%s619_s21 + $0xb0] sm:$0xff]  ;;  %v236_v4 = vld [vmem:[%s619_s21 + $0xb8] sm:$0xff]  ;;  %v233_v5 = vld [vmem:[%s619_s21 + $0xa0] sm:$0xff] }
  0x1c   : > { %298 = vperm.xlu1 %550, %v252_v7   ;;  %293 = vperm.xlu0 %549, %v251_v8   ;;  %v234_v6 = vld [vmem:[%s619_s21 + $0xa8] sm:$0xff] }
  0x20   : > { %308 = vperm.xlu1 %550, %v254_v9   ;;  %303 = vperm.xlu0 %549, %v253_v10  }
  0x24   : > { %318 = vperm.xlu1 %550, %v256_v11   ;;  %313 = vperm.xlu0 %549, %v255_v12  }
  0x28   : > { %328 = vperm.xlu1 %550, %v258_v13   ;;  %323 = vperm.xlu0 %549, %v257_v14   ;;  %v239_v13 = vld [vmem:[%s619_s21 + $0xd0] sm:$0xff]  ;;  %v240_v14 = vld [vmem:[%s619_s21 + $0xd8] sm:$0xff] }
  0x2c   : > { %338 = vperm.xlu1 %550, %v260_v15   ;;  %333 = vperm.xlu0 %549, %v259_v16   ;;  %v237_v15 = vld [vmem:[%s619_s21 + $0xc0] sm:$0xff]  ;;  %v238_v16 = vld [vmem:[%s619_s21 + $0xc8] sm:$0xff] }
  0x8b   : > { %v274_v21 = vpop.permute.xlu1 %273  ;;  %v264_v22 = vpop.permute.xlu0 %263 }
  0x8c   : > { %v345_v23 = vmul.f32 %v274_v21, %v217_v17  ;;  %v346_v24 = vmul.f32 %v274_v21, %v218_v18  ;;  %v341_v25 = vmul.f32 %v264_v22, %v213_v19  ;;  %v342_v26 = vmul.f32 %v264_v22, %v214_v20 }
  0x8e   : > { %377 = vst [vmem:[%s628_s24 + $0x20] sm:$0xff] %v345_v23  ;;  %378 = vst [vmem:[%s628_s24 + $0x28] sm:$0xff] %v346_v24  ;;  %v243_v23 = vld [vmem:[%s619_s21 + $0xf0] sm:$0xff]  ;;  %v244_v24 = vld [vmem:[%s619_s21 + $0xf8] sm:$0xff] }
  0x8f   : > { %373 = vst [vmem:[%s628_s24] sm:$0xff] %v341_v25  ;;  %374 = vst [vmem:[%s628_s24 + $0x8] sm:$0xff] %v342_v26  ;;  %v279_v31 = vpop.permute.xlu1 %278  ;;  %v269_v32 = vpop.permute.xlu0 %268  ;;  %v241_v25 = vld [vmem:[%s619_s21 + $0xe0] sm:$0xff]  ;;  %v242_v26 = vld [vmem:[%s619_s21 + $0xe8] sm:$0xff] }
  0x90   : > { %v347_v33 = vmul.f32 %v279_v31, %v219_v27  ;;  %v348_v34 = vmul.f32 %v279_v31, %v220_v28  ;;  %v343_v35 = vmul.f32 %v269_v32, %v215_v29  ;;  %v344_v36 = vmul.f32 %v269_v32, %v216_v30 }
  0x92   : > { %379 = vst [vmem:[%s628_s24 + $0x30] sm:$0xff] %v347_v33  ;;  %380 = vst [vmem:[%s628_s24 + $0x38] sm:$0xff] %v348_v34 }
  0x93   : > { %375 = vst [vmem:[%s628_s24 + $0x10] sm:$0xff] %v343_v35  ;;  %376 = vst [vmem:[%s628_s24 + $0x18] sm:$0xff] %v344_v36  ;;  %v289_v41 = vpop.permute.xlu1 %288  ;;  %v284_v42 = vpop.permute.xlu0 %283 }
  0x94   : > { %v351_v43 = vmul.f32 %v289_v41, %v223_v37  ;;  %v352_v44 = vmul.f32 %v289_v41, %v224_v38  ;;  %v349_v45 = vmul.f32 %v284_v42, %v221_v39  ;;  %v350_v46 = vmul.f32 %v284_v42, %v222_v40 }
  0x96   : > { %383 = vst [vmem:[%s628_s24 + $0x50] sm:$0xff] %v351_v43  ;;  %384 = vst [vmem:[%s628_s24 + $0x58] sm:$0xff] %v352_v44 }
  0x97   : > { %381 = vst [vmem:[%s628_s24 + $0x40] sm:$0xff] %v349_v45  ;;  %382 = vst [vmem:[%s628_s24 + $0x48] sm:$0xff] %v350_v46  ;;  %v299_v51 = vpop.permute.xlu1 %298  ;;  %v294_v52 = vpop.permute.xlu0 %293 }
  0x98   : > { %v355_v53 = vmul.f32 %v299_v51, %v227_v47  ;;  %v356_v54 = vmul.f32 %v299_v51, %v228_v48  ;;  %v353_v55 = vmul.f32 %v294_v52, %v225_v49  ;;  %v354_v56 = vmul.f32 %v294_v52, %v226_v50 }
  0x9a   : > { %387 = vst [vmem:[%s628_s24 + $0x70] sm:$0xff] %v355_v53  ;;  %388 = vst [vmem:[%s628_s24 + $0x78] sm:$0xff] %v356_v54 }
  0x9b   : > { %385 = vst [vmem:[%s628_s24 + $0x60] sm:$0xff] %v353_v55  ;;  %386 = vst [vmem:[%s628_s24 + $0x68] sm:$0xff] %v354_v56  ;;  %v309_v61 = vpop.permute.xlu1 %308  ;;  %v304_v62 = vpop.permute.xlu0 %303 }
  0x9c   : > { %v359_v63 = vmul.f32 %v309_v61, %v231_v57  ;;  %v360_v0 = vmul.f32 %v309_v61, %v232_v58  ;;  %v357_v1 = vmul.f32 %v304_v62, %v229_v59  ;;  %v358_v2 = vmul.f32 %v304_v62, %v230_v60 }
  0x9e   : > { %391 = vst [vmem:[%s628_s24 + $0x90] sm:$0xff] %v359_v63  ;;  %392 = vst [vmem:[%s628_s24 + $0x98] sm:$0xff] %v360_v0 }
  0x9f   : > { %389 = vst [vmem:[%s628_s24 + $0x80] sm:$0xff] %v357_v1  ;;  %390 = vst [vmem:[%s628_s24 + $0x88] sm:$0xff] %v358_v2  ;;  %v319_v7 = vpop.permute.xlu1 %318  ;;  %v314_v8 = vpop.permute.xlu0 %313 }
  0xa0   : > { %v363_v9 = vmul.f32 %v319_v7, %v235_v3  ;;  %v364_v10 = vmul.f32 %v319_v7, %v236_v4  ;;  %v361_v11 = vmul.f32 %v314_v8, %v233_v5  ;;  %v362_v12 = vmul.f32 %v314_v8, %v234_v6 }
  0xa2   : > { %395 = vst [vmem:[%s628_s24 + $0xb0] sm:$0xff] %v363_v9  ;;  %396 = vst [vmem:[%s628_s24 + $0xb8] sm:$0xff] %v364_v10 }
  0xa3   : > { %393 = vst [vmem:[%s628_s24 + $0xa0] sm:$0xff] %v361_v11  ;;  %394 = vst [vmem:[%s628_s24 + $0xa8] sm:$0xff] %v362_v12  ;;  %v329_v17 = vpop.permute.xlu1 %328  ;;  %v324_v18 = vpop.permute.xlu0 %323 }
  0xa4   : > { %v367_v19 = vmul.f32 %v329_v17, %v239_v13  ;;  %v368_v20 = vmul.f32 %v329_v17, %v240_v14  ;;  %v365_v21 = vmul.f32 %v324_v18, %v237_v15  ;;  %v366_v22 = vmul.f32 %v324_v18, %v238_v16 }
  0xa6   : > { %399 = vst [vmem:[%s628_s24 + $0xd0] sm:$0xff] %v367_v19  ;;  %400 = vst [vmem:[%s628_s24 + $0xd8] sm:$0xff] %v368_v20 }
  0xa7   : > { %397 = vst [vmem:[%s628_s24 + $0xc0] sm:$0xff] %v365_v21  ;;  %398 = vst [vmem:[%s628_s24 + $0xc8] sm:$0xff] %v366_v22  ;;  %v339_v27 = vpop.permute.xlu1 %338  ;;  %v334_v28 = vpop.permute.xlu0 %333 }
  0xa8   : > { %v371_v29 = vmul.f32 %v339_v27, %v243_v23  ;;  %v372_v30 = vmul.f32 %v339_v27, %v244_v24  ;;  %v369_v31 = vmul.f32 %v334_v28, %v241_v25  ;;  %v370_v32 = vmul.f32 %v334_v28, %v242_v26 }
  0xaa   : > { %403 = vst [vmem:[%s628_s24 + $0xf0] sm:$0xff] %v371_v29  ;;  %404 = vst [vmem:[%s628_s24 + $0xf8] sm:$0xff] %v372_v30 }
  0xab   : > { %401 = vst [vmem:[%s628_s24 + $0xe0] sm:$0xff] %v369_v31  ;;  %402 = vst [vmem:[%s628_s24 + $0xe8] sm:$0xff] %v370_v32 }
  0xac PF: > { %s12_s11 = sadd.s32 1, %s573_s11   ;;  %s702_s9 = smov %s569_s10 }
  0xad   : > { %p9_p5 = scmp.ge.s32.totalorder %s12_s11, 4   ;;  %s703_s10 = smov %s705_s12 }
  0xaf   :  { %11 = sbr.rel (!%p9_p5) target bundleno = 2 (0x2), region = 61 }

// kernel: bottleneck_forward.4
= control target key start
LH: loop header
LB: loop body
LE: loop exit
PB: predicated region body
PF: predicated region fallthrough
CT: control target
= control target key end

     0   :  { %v135_v0 = vlaneseq  ;;  %v1249_v1 = vmov 0   ;;  %vm257_vm0 = vcmask 64512   ;;  %vm1169_vm1 = vcmask 1040384   ;;  %s2281_s1 = inlined_call_operand.vmem [shape: f32[256,1], index: 1, kind: input, shape index: {}]   ;;  %s2282_s0 = inlined_call_operand.vmem [shape: f32[2,128], index: 0, kind: input, shape index: {}]   ;;  %s2283_s2 = inlined_call_operand.vmem [shape: f32[16,128], index: 2, kind: input, shape index: {}]   ;;  %s2284_s6 = inlined_call_operand.vmem [shape: f32[128,8], index: 6, kind: input, shape index: {}]   ;;  %s2285_s3 = inlined_call_operand.vmem [shape: f32[16,128], index: 3, kind: input, shape index: {}]   ;;  %s2286_s4 = inlined_call_operand.vmem [shape: f32[128,8], index: 4, kind: input, shape index: {}]   ;;  %s2287_s5 = inlined_call_operand.vmem [shape: f32[128,8], index: 5, kind: input, shape index: {}]   ;;  %s2288_s7 = inlined_call_operand.vmem [shape: f32[128,8], index: 7, kind: input, shape index: {}]   ;;  %s2289_s8 = inlined_call_operand.<no memory space> [shape: f32[1,1], index: 8, kind: input, shape index: {}]   ;;  %s2290_s9 = inlined_call_operand.vmem [shape: f32[2,128], index: 9, kind: output, shape index: {}]  }
   0x1   :  { %1177 = vset.pattern.permute.xlu1 %v1249_v1  ;;  %v34_v2 = vld [vmem:[%s2281_s1] sm:$0xff]  ;;  %1178 = vset.pattern.permute.xlu0 %v1249_v1  ;;  %v35_v4 = vld [vmem:[%s2281_s1 + $0x8] sm:$0xff]  ;;  %v37_v9 = vld [vmem:[%s2281_s1 + $0x18] sm:$0xff] }
   0x2   :  { %163 = vperm.xlu1 %1177, %v34_v2   ;;  %v1303_v3 = vshrl.u32 %v135_v0, 7  ;;  %v1311_v5 = vld [vmem:[%s2282_s0] sm:$0x3]  ;;  %v1324_v10 = vld [vmem:[%s2283_s2 + $0x8] sm:$0xff]  ;;  %v52_v15 = vld [vmem:[%s2281_s1 + $0x90] sm:$0xff] }
   0x3   :  { %v66_v7 = vld [vmem:[%s2283_s2] sm:$0xff]  ;;  %v51_v14 = vld [vmem:[%s2281_s1 + $0x88] sm:$0xff]  ;;  %v53_v16 = vld [vmem:[%s2281_s1 + $0x98] sm:$0xff] }
   0x4   :  { %v137_v6 = vsub.s32 0, %v1303_v3  ;;  %v50_v13 = vld [vmem:[%s2281_s1 + $0x80] sm:$0xff]  ;;  %v36_v19 = vld [vmem:[%s2281_s1 + $0x10] sm:$0xff]  ;;  %v39_v20 = vld [vmem:[%s2281_s1 + $0x28] sm:$0xff] }
   0x5   :  { %v38_v17 = vld [vmem:[%s2281_s1 + $0x20] sm:$0xff]  ;;  %v41_v21 = vld [vmem:[%s2281_s1 + $0x38] sm:$0xff]  ;;  %v55_v22 = vld [vmem:[%s2281_s1 + $0xa8] sm:$0xff] }
   0x6   :  { %168 = vperm.xlu1 %1177, %v35_v4   ;;  %v138_v8 = vrot.slane %v1311_v5, %v137_v6  ;;  %v54_v18 = vld [vmem:[%s2281_s1 + $0xa0] sm:$0xff]  ;;  %v40_v24 = vld [vmem:[%s2281_s1 + $0x30] sm:$0xff]  ;;  %v43_v25 = vld [vmem:[%s2281_s1 + $0x48] sm:$0xff] }
   0x7   :  { %v42_v23 = vld [vmem:[%s2281_s1 + $0x40] sm:$0xff]  ;;  %v56_v26 = vld [vmem:[%s2281_s1 + $0xb0] sm:$0xff]  ;;  %v57_v28 = vld [vmem:[%s2281_s1 + $0xb8] sm:$0xff] }
   0x8   :  { %v139_v11 = vmul.f32 %v138_v8, %v66_v7  ;;  %v140_v12 = vmul.f32 %v138_v8, %v1324_v10  ;;  %v44_v27 = vld [vmem:[%s2281_s1 + $0x50] sm:$0xff]  ;;  %v45_v29 = vld [vmem:[%s2281_s1 + $0x58] sm:$0xff]  ;;  %v58_v30 = vld [vmem:[%s2281_s1 + $0xc0] sm:$0xff] }
   0x9   :  { %v46_v31 = vld [vmem:[%s2281_s1 + $0x60] sm:$0xff]  ;;  %v59_v32 = vld [vmem:[%s2281_s1 + $0xc8] sm:$0xff]  ;;  %v60_v34 = vld [vmem:[%s2281_s1 + $0xd0] sm:$0xff] }
   0xa   :  { %178 = vperm.xlu1 %1177, %v37_v9   ;;  %141 = vadd.xlane.f32.xlu0 %v139_v11  ;;  %v47_v33 = vld [vmem:[%s2281_s1 + $0x68] sm:$0xff]  ;;  %v48_v35 = vld [vmem:[%s2281_s1 + $0x70] sm:$0xff]  ;;  %v61_v36 = vld [vmem:[%s2281_s1 + $0xd8] sm:$0xff] }
   0xb   :  { %v49_v37 = vld [vmem:[%s2281_s1 + $0x78] sm:$0xff]  ;;  %v62_v38 = vld [vmem:[%s2281_s1 + $0xe0] sm:$0xff]  ;;  %v63_v39 = vld [vmem:[%s2281_s1 + $0xe8] sm:$0xff] }
   0xc   :  { %v64_v40 = vld [vmem:[%s2281_s1 + $0xf0] sm:$0xff]  ;;  %v65_v41 = vld [vmem:[%s2281_s1 + $0xf8] sm:$0xff]  ;;  %v103_v46 = vld [vmem:[%s2284_s6 + $0x8] sm:$0xff] }
   0xd   :  { %v102_v49 = vld [vmem:[%s2284_s6] sm:$0xff]  ;;  %v104_v50 = vld [vmem:[%s2284_s6 + $0x10] sm:$0xff]  ;;  %v105_v61 = vld [vmem:[%s2284_s6 + $0x18] sm:$0xff] }
   0xe   :  { %681 = vperm.xlu1 %1177, %v50_v13   ;;  %143 = vadd.xlane.f32.xlu0 %v140_v12  ;;  %v68_v55 = vld [vmem:[%s2285_s3] sm:$0xff]  ;;  %v1454_v4 = vld [vmem:[%s2286_s4 + $0x8] sm:$0xff] }
   0xf   :  { %v1449_v2 = vld [vmem:[%s2286_s4] sm:$0xff] }
  0x12   :  { %686 = vperm.xlu1 %1177, %v51_v14  }
  0x16   :  { %691 = vperm.xlu1 %1177, %v52_v15   ;;  %v1464_v15 = vld [vmem:[%s2286_s4 + $0x18] sm:$0xff] }
  0x1a   :  { %696 = vperm.xlu1 %1177, %v53_v16   ;;  %v106_v16 = vld [vmem:[%s2284_s6 + $0x20] sm:$0xff] }
  0x1e   :  { %183 = vperm.xlu1 %1177, %v38_v17  }
  0x22   :  { %701 = vperm.xlu1 %1177, %v54_v18  }
  0x24   :  { %173 = vperm.xlu0 %1178, %v36_v19  }
  0x26   :  { %188 = vperm.xlu1 %1177, %v39_v20  }
  0x28   :  { %198 = vperm.xlu0 %1178, %v41_v21  }
  0x2a   :  { %706 = vperm.xlu1 %1177, %v55_v22  }
  0x2c   :  { %203 = vperm.xlu0 %1178, %v42_v23  }
  0x2e   :  { %193 = vperm.xlu1 %1177, %v40_v24   ;;  %v1479_v24 = vld [vmem:[%s2286_s4 + $0x10] sm:$0xff] }
  0x30   :  { %208 = vperm.xlu0 %1178, %v43_v25  }
  0x32   :  { %711 = vperm.xlu1 %1177, %v56_v26   ;;  %v1485_v26 = vld [vmem:[%s2286_s4 + $0x20] sm:$0xff] }
  0x34   :  { %213 = vperm.xlu0 %1178, %v44_v27  }
  0x36   :  { %716 = vperm.xlu1 %1177, %v57_v28  }
  0x38   :  { %218 = vperm.xlu0 %1178, %v45_v29  }
  0x3a   :  { %721 = vperm.xlu1 %1177, %v58_v30  }
  0x3c   :  { %223 = vperm.xlu0 %1178, %v46_v31  }
  0x3e   :  { %726 = vperm.xlu1 %1177, %v59_v32  }
  0x40   :  { %228 = vperm.xlu0 %1178, %v47_v33  }
  0x42   :  { %731 = vperm.xlu1 %1177, %v60_v34  }
  0x44   :  { %233 = vperm.xlu0 %1178, %v48_v35   ;;  %v107_v35 = vld [vmem:[%s2284_s6 + $0x28] sm:$0xff] }
  0x46   :  { %736 = vperm.xlu1 %1177, %v61_v36  }
  0x48   :  { %238 = vperm.xlu0 %1178, %v49_v37  }
  0x4a   :  { %741 = vperm.xlu1 %1177, %v62_v38  }
  0x4e   :  { %746 = vperm.xlu1 %1177, %v63_v39  }
  0x52   :  { %751 = vperm.xlu1 %1177, %v64_v40   ;;  %v1498_v40 = vld [vmem:[%s2286_s4 + $0x28] sm:$0xff] }
  0x56   :  { %756 = vperm.xlu1 %1177, %v65_v41  }
  0x7d   :  { %v164_v42 = vpop.permute.xlu1 %163 }
  0x7e   :  { %v241_v9 = vmul.f32 %v164_v42, %v1449_v2  ;;  %v360_v11 = vmul.f32 %v164_v42, %v102_v49 }
  0x80   :  { %v258_v19 = vsel %vm257_vm0, %v241_v9, 0.0  ;;  %v376_v20 = vsel %vm257_vm0, %v360_v11, 0.0 }
  0x81   :  { %v169_v43 = vpop.permute.xlu1 %168 }
  0x82   :  { %v242_v12 = vmul.f32 %v169_v43, %v1454_v4  ;;  %v361_v13 = vmul.f32 %v169_v43, %v103_v46 }
  0x84   :  { %v259_v21 = vsel %vm257_vm0, %v242_v12, 0.0  ;;  %v377_v22 = vsel %vm257_vm0, %v361_v13, 0.0  ;;  %v1530_v13 = vld [vmem:[%s2284_s6 + $0x40] sm:$0xff] }
  0x85   :  { %v179_v44 = vpop.permute.xlu1 %178  ;;  %v260_v33 = vadd.f32 %v259_v21, %v258_v19  ;;  %v378_v34 = vadd.f32 %v377_v22, %v376_v20  ;;  %v1536_v19 = vld [vmem:[%s2286_s4 + $0x40] sm:$0xff] }
  0x86   :  { %v244_v25 = vmul.f32 %v179_v44, %v1464_v15  ;;  %v363_v28 = vmul.f32 %v179_v44, %v105_v61 }
  0x88   :  { %v263_v44 = vsel %vm257_vm0, %v244_v25, 0.0 }
  0x89   :  { %v1414_v45 = vpop.permute.xlu1 %681 }
  0x8a   :  { %v877_v51 = vmul.f32 %v1414_v45, %v102_v49 }
  0x8c   :  { %v893_v57 = vsel %vm257_vm0, %v877_v51, 0.0 }
  0x8d   :  { %v1419_v47 = vpop.permute.xlu1 %686 }
  0x8e   :  { %v878_v48 = vmul.f32 %v1419_v47, %v103_v46  ;;  %v381_v46 = vsel %vm257_vm0, %v363_v28, 0.0 }
  0x90   :  { %v894_v53 = vsel %vm257_vm0, %v878_v48, 0.0 }
  0x91   :  { %v1429_v52 = vpop.permute.xlu1 %691  ;;  %v895_v60 = vadd.f32 %v894_v53, %v893_v57 }
  0x92   :  { %v879_v54 = vmul.f32 %v1429_v52, %v104_v50 }
  0x93   :  { %v142_v56 = vpop.xlane.xlu0 %141 }
  0x94   :  { %v896_v58 = vsel %vm257_vm0, %v879_v54, 0.0  ;;  %v145_v59 = vmax.f32 %v142_v56, 0.0  ;;  %v1510_v56 = vld [vmem:[%s2286_s4 + $0x38] sm:$0xff] }
  0x95   :  { %v1441_v62 = vpop.permute.xlu1 %696  ;;  %v897_v1 = vadd.f32 %v896_v58, %v895_v60 }
  0x96   :  { %v1443_v63 = vmul.f32 %v145_v59, %v68_v55  ;;  %v880_v0 = vmul.f32 %v1441_v62, %v105_v61  ;;  %v109_v61 = vld [vmem:[%s2284_s6 + $0x38] sm:$0xff] }
  0x97   :  { %v1459_v14 = vpop.xlane.xlu0 %143 }
  0x98   :  { %2292 = vst [vmem:[#allocation3_spill] sm:$0xff] %v1443_v63  ;;  %v898_v6 = vsel %vm257_vm0, %v880_v0, 0.0  ;;  %v1519_v0 = vld [vmem:[%s2286_s4 + $0x30] sm:$0xff] }
  0x99   :  { %v899_v7 = vadd.f32 %v898_v6, %v897_v1  ;;  %v184_v8 = vpop.permute.xlu1 %183  ;;  %v108_v1 = vld [vmem:[%s2284_s6 + $0x30] sm:$0xff] }
  0x9a   :  { %v245_v36 = vmul.f32 %v184_v8, %v1485_v26  ;;  %v364_v37 = vmul.f32 %v184_v8, %v106_v16 }
  0x9c   :  { %v265_v54 = vsel %vm257_vm0, %v245_v36, 0.0  ;;  %v383_v55 = vsel %vm257_vm0, %v364_v37, 0.0  ;;  %v1564_v37 = vld [vmem:[%s2286_s4 + $0x48] sm:$0xff] }
  0x9d   :  { %v1469_v17 = vpop.permute.xlu1 %701 }
  0x9e   :  { %v881_v18 = vmul.f32 %v1469_v17, %v106_v16 }
  0x9f   :  { %v174_v23 = vpop.permute.xlu0 %173 }
  0xa0   :  { %v900_v27 = vsel %vm257_vm0, %v881_v18, 0.0  ;;  %v243_v30 = vmul.f32 %v174_v23, %v1479_v24  ;;  %v362_v31 = vmul.f32 %v174_v23, %v104_v50  ;;  %v760_v23 = vmul.f32 %v1419_v47, %v1454_v4 }
  0xa1   :  { %v901_v29 = vadd.f32 %v900_v27, %v899_v7  ;;  %v189_v32 = vpop.permute.xlu1 %188  ;;  %v1544_v27 = vld [vmem:[%s2284_s6 + $0x48] sm:$0xff] }
  0xa2   :  { %v261_v38 = vsel %vm257_vm0, %v243_v30, 0.0  ;;  %v379_v39 = vsel %vm257_vm0, %v362_v31, 0.0  ;;  %v365_v48 = vmul.f32 %v189_v32, %v107_v35  ;;  %v246_v53 = vmul.f32 %v189_v32, %v1498_v40 }
  0xa3   :  { %v199_v41 = vpop.permute.xlu0 %198  ;;  %v262_v42 = vadd.f32 %v261_v38, %v260_v33  ;;  %v380_v43 = vadd.f32 %v379_v39, %v378_v34  ;;  %v759_v32 = vmul.f32 %v1414_v45, %v1449_v2  ;;  %v1557_v34 = vld [vmem:[%s2284_s6 + $0x50] sm:$0xff]  ;;  %v776_v39 = vsel %vm257_vm0, %v760_v23, 0.0 }
  0xa4   :  { %v385_v6 = vsel %vm257_vm0, %v365_v48, 0.0  ;;  %v267_v9 = vsel %vm257_vm0, %v246_v53, 0.0  ;;  %v248_v16 = vmul.f32 %v199_v41, %v1510_v56  ;;  %v367_v18 = vmul.f32 %v199_v41, %v109_v61  ;;  %v1579_v53 = vld [vmem:[%s2284_s6 + $0x58] sm:$0xff] }
  0xa5   :  { %v1502_v49 = vpop.permute.xlu1 %706  ;;  %v264_v50 = vadd.f32 %v263_v44, %v262_v42  ;;  %v382_v51 = vadd.f32 %v381_v46, %v380_v43  ;;  %v761_v41 = vmul.f32 %v1429_v52, %v1479_v24  ;;  %v762_v44 = vmul.f32 %v1441_v62, %v1464_v15 }
  0xa6   :  { %v882_v57 = vmul.f32 %v1502_v49, %v107_v35  ;;  %v271_v35 = vsel %vm257_vm0, %v248_v16, 0.0  ;;  %v389_v36 = vsel %vm257_vm0, %v367_v18, 0.0  ;;  %v775_v62 = vsel %vm257_vm0, %v759_v32, 0.0 }
  0xa7   :  { %v204_v58 = vpop.permute.xlu0 %203  ;;  %v266_v59 = vadd.f32 %v265_v54, %v264_v50  ;;  %v384_v60 = vadd.f32 %v383_v55, %v382_v51 }
  0xa8   :  { %v902_v7 = vsel %vm257_vm0, %v882_v57, 0.0  ;;  %v368_v28 = vmul.f32 %v204_v58, %v1530_v13  ;;  %v249_v33 = vmul.f32 %v204_v58, %v1536_v19  ;;  %v1588_v58 = vld [vmem:[%s2286_s4 + $0x50] sm:$0xff] }
  0xa9   :  { %v194_v8 = vpop.permute.xlu1 %193  ;;  %v386_v11 = vadd.f32 %v385_v6, %v384_v60  ;;  %v903_v12 = vadd.f32 %v902_v7, %v901_v29  ;;  %v268_v25 = vadd.f32 %v267_v9, %v266_v59  ;;  %v778_v6 = vsel %vm257_vm0, %v761_v41, 0.0 }
  0xaa   :  { %v247_v20 = vmul.f32 %v194_v8, %v1519_v0  ;;  %v366_v21 = vmul.f32 %v194_v8, %v108_v1  ;;  %v391_v46 = vsel %vm257_vm0, %v368_v28, 0.0  ;;  %v273_v54 = vsel %vm257_vm0, %v249_v33, 0.0 }
  0xab   :  { %v209_v22 = vpop.permute.xlu0 %208  ;;  %v780_v9 = vsel %vm257_vm0, %v762_v44, 0.0 }
  0xac   :  { %v269_v29 = vsel %vm257_vm0, %v247_v20, 0.0  ;;  %v387_v30 = vsel %vm257_vm0, %v366_v21, 0.0  ;;  %v369_v45 = vmul.f32 %v209_v22, %v1544_v27  ;;  %v250_v24 = vmul.f32 %v209_v22, %v1564_v37  ;;  %v1605_v20 = vld [vmem:[%s2284_s6 + $0x60] sm:$0xff] }
  0xad   :  { %v1549_v31 = vpop.permute.xlu1 %711  ;;  %v270_v47 = vadd.f32 %v269_v29, %v268_v25  ;;  %v388_v4 = vadd.f32 %v387_v30, %v386_v11  ;;  %v763_v11 = vmul.f32 %v1469_v17, %v1485_v26  ;;  %v1614_v30 = vld [vmem:[%s2286_s4 + $0x60] sm:$0xff] }
  0xae   :  { %v883_v2 = vmul.f32 %v1549_v31, %v108_v1  ;;  %v393_v57 = vsel %vm257_vm0, %v369_v45, 0.0  ;;  %v777_v1 = vadd.f32 %v776_v39, %v775_v62  ;;  %v275_v21 = vsel %vm257_vm0, %v250_v24, 0.0  ;;  %v1630_v39 = vld [vmem:[%s2284_s6 + $0x68] sm:$0xff] }
  0xaf   :  { %v214_v38 = vpop.permute.xlu0 %213  ;;  %v272_v42 = vadd.f32 %v271_v35, %v270_v47  ;;  %v390_v43 = vadd.f32 %v389_v36, %v388_v4  ;;  %v782_v36 = vsel %vm257_vm0, %v763_v11, 0.0  ;;  %v764_v45 = vmul.f32 %v1502_v49, %v1498_v40 }
  0xb0   :  { %v904_v48 = vsel %vm257_vm0, %v883_v2, 0.0  ;;  %v370_v50 = vmul.f32 %v214_v38, %v1557_v34  ;;  %v251_v22 = vmul.f32 %v214_v38, %v1588_v58  ;;  %v779_v23 = vadd.f32 %v778_v6, %v777_v1  ;;  %v1625_v38 = vld [vmem:[%s2286_s4 + $0x68] sm:$0xff] }
  0xb1   :  { %v717_v51 = vpop.permute.xlu1 %716  ;;  %v392_v52 = vadd.f32 %v391_v46, %v390_v43  ;;  %v905_v55 = vadd.f32 %v904_v48, %v903_v12  ;;  %v274_v15 = vadd.f32 %v273_v54, %v272_v42  ;;  %v765_v49 = vmul.f32 %v1549_v31, %v1519_v0  ;;  %v84_v0 = vld [vmem:[%s2286_s4 + $0x70] sm:$0xff] }
  0xb2   :  { %v884_v59 = vmul.f32 %v717_v51, %v109_v61  ;;  %v395_v12 = vsel %vm257_vm0, %v370_v50, 0.0  ;;  %v1600_v61 = vld [vmem:[%s2286_s4 + $0x58] sm:$0xff]  ;;  %v781_v35 = vadd.f32 %v780_v9, %v779_v23  ;;  %v277_v41 = vsel %vm257_vm0, %v251_v22, 0.0 }
  0xb3   :  { %v219_v60 = vpop.permute.xlu0 %218  ;;  %v394_v7 = vadd.f32 %v393_v57, %v392_v52  ;;  %v276_v25 = vadd.f32 %v275_v21, %v274_v15  ;;  %v766_v62 = vmul.f32 %v717_v51, %v1510_v56  ;;  %v784_v31 = vsel %vm257_vm0, %v764_v45, 0.0 }
  0xb4   :  { %v371_v8 = vmul.f32 %v219_v60, %v1579_v53  ;;  %v906_v16 = vsel %vm257_vm0, %v884_v59, 0.0  ;;  %v252_v33 = vmul.f32 %v219_v60, %v1600_v61  ;;  %v786_v56 = vsel %vm257_vm0, %v765_v49, 0.0 }
  0xb5   :  { %v722_v18 = vpop.permute.xlu1 %721  ;;  %v396_v17 = vadd.f32 %v395_v12, %v394_v7  ;;  %v907_v26 = vadd.f32 %v906_v16, %v905_v55  ;;  %v278_v44 = vadd.f32 %v277_v41, %v276_v25  ;;  %v783_v55 = vadd.f32 %v782_v36, %v781_v35  ;;  %v85_v25 = vld [vmem:[%s2286_s4 + $0x78] sm:$0xff] }
  0xb6   :  { %v397_v28 = vsel %vm257_vm0, %v371_v8, 0.0  ;;  %v885_v29 = vmul.f32 %v722_v18, %v1530_v13  ;;  %v279_v54 = vsel %vm257_vm0, %v252_v33, 0.0  ;;  %v767_v9 = vmul.f32 %v722_v18, %v1536_v19 }
  0xb7   :  { %v224_v32 = vpop.permute.xlu0 %223  ;;  %v398_v47 = vadd.f32 %v397_v28, %v396_v17  ;;  %v280_v51 = vadd.f32 %v279_v54, %v278_v44  ;;  %v785_v21 = vadd.f32 %v784_v31, %v783_v55  ;;  %v788_v22 = vsel %vm257_vm0, %v766_v62, 0.0 }
  0xb8   :  { %v372_v4 = vmul.f32 %v224_v32, %v1605_v20  ;;  %v908_v2 = vsel %vm257_vm0, %v885_v29, 0.0  ;;  %v253_v43 = vmul.f32 %v224_v32, %v1614_v30  ;;  %v790_v35 = vsel %vm257_vm0, %v767_v9, 0.0 }
  0xb9   :  { %v727_v13 = vpop.permute.xlu1 %726  ;;  %v909_v42 = vadd.f32 %v908_v2, %v907_v26  ;;  %v787_v29 = vadd.f32 %v786_v56, %v785_v21 }
  0xba   :  { %v399_v40 = vsel %vm257_vm0, %v372_v4, 0.0  ;;  %v886_v48 = vmul.f32 %v727_v13, %v1544_v27  ;;  %v1649_v27 = vld [vmem:[%s2284_s6 + $0x70] sm:$0xff]  ;;  %v281_v59 = vsel %vm257_vm0, %v253_v43, 0.0 }
  0xbb   :  { %v400_v46 = vadd.f32 %v399_v40, %v398_v47  ;;  %v229_v50 = vpop.permute.xlu0 %228  ;;  %v282_v17 = vadd.f32 %v281_v59, %v280_v51 }
  0xbc   :  { %v254_v52 = vmul.f32 %v229_v50, %v1625_v38  ;;  %v373_v24 = vmul.f32 %v229_v50, %v1630_v39  ;;  %v910_v15 = vsel %vm257_vm0, %v886_v48, 0.0 }
  0xbd   :  { %v732_v57 = vpop.permute.xlu1 %731  ;;  %v911_v60 = vadd.f32 %v910_v15, %v909_v42 }
  0xbe   :  { %v401_v1 = vsel %vm257_vm0, %v373_v24, 0.0  ;;  %v887_v7 = vmul.f32 %v732_v57, %v1557_v34  ;;  %v283_v11 = vsel %vm257_vm0, %v254_v52, 0.0  ;;  %v768_v34 = vmul.f32 %v727_v13, %v1564_v37 }
  0xbf   :  { %v402_v6 = vadd.f32 %v401_v1, %v400_v46  ;;  %v234_v8 = vpop.permute.xlu0 %233  ;;  %v284_v32 = vadd.f32 %v283_v11, %v282_v17  ;;  %v769_v36 = vmul.f32 %v732_v57, %v1588_v58  ;;  %v789_v37 = vadd.f32 %v788_v22, %v787_v29  ;;  %v90_v22 = vld [vmem:[%s2287_s5 + $0x20] sm:$0xff]  ;;  %v88_v17 = vld [vmem:[%s2287_s5 + $0x10] sm:$0xff] }
  0xc0   :  { %v255_v12 = vmul.f32 %v234_v8, %v84_v0  ;;  %v374_v16 = vmul.f32 %v234_v8, %v1649_v27  ;;  %v912_v26 = vsel %vm257_vm0, %v887_v7, 0.0  ;;  %v792_v42 = vsel %vm257_vm0, %v768_v34, 0.0 }
  0xc1   :  { %v737_v23 = vpop.permute.xlu1 %736  ;;  %v913_v28 = vadd.f32 %v912_v26, %v911_v60  ;;  %v791_v49 = vadd.f32 %v790_v35, %v789_v37  ;;  %v794_v58 = vsel %vm257_vm0, %v769_v36, 0.0 }
  0xc2   :  { %v285_v19 = vsel %vm257_vm0, %v255_v12, 0.0  ;;  %v403_v18 = vsel %vm257_vm0, %v374_v16, 0.0  ;;  %v888_v47 = vmul.f32 %v737_v23, %v1579_v53  ;;  %v770_v43 = vmul.f32 %v737_v23, %v1600_v61  ;;  %v87_v12 = vld [vmem:[%s2287_s5 + $0x8] sm:$0xff] }
  0xc3   :  { %v1667_v33 = vadd.f32 %v403_v18, %v402_v6  ;;  %v1670_v4 = vpop.permute.xlu0 %238  ;;  %v286_v2 = vadd.f32 %v285_v19, %v284_v32  ;;  %v793_v48 = vadd.f32 %v792_v42, %v791_v49  ;;  %v92_v32 = vld [vmem:[%s2287_s5 + $0x30] sm:$0xff]  ;;  %v91_v42 = vld [vmem:[%s2287_s5 + $0x28] sm:$0xff] }
  0xc4   :  { %v256_v45 = vmul.f32 %v1670_v4, %v85_v25  ;;  %v914_v13 = vsel %vm257_vm0, %v888_v47, 0.0  ;;  %v796_v52 = vsel %vm257_vm0, %v770_v43, 0.0  ;;  %v89_v47 = vld [vmem:[%s2287_s5 + $0x18] sm:$0xff] }
  0xc5   :  { %v1676_v41 = vpop.permute.xlu1 %741  ;;  %v1680_v40 = vadd.f32 %v914_v13, %v913_v28  ;;  %v795_v24 = vadd.f32 %v794_v58, %v793_v48 }
  0xc6   :  { %v287_v53 = vsel %vm257_vm0, %v256_v45, 0.0  ;;  %v771_v46 = vmul.f32 %v1676_v41, %v1614_v30 }
  0xc7   :  { %v288_v44 = vadd.f32 %v287_v53, %v286_v2  ;;  %v797_v15 = vadd.f32 %v796_v52, %v795_v24 }
  0xc8   :  { %v798_v62 = vsel %vm257_vm0, %v771_v46, 0.0  ;;  %v93_v46 = vld [vmem:[%s2287_s5 + $0x38] sm:$0xff] }
  0xc9   :  { %v289_v50 = vrot.slane %v288_v44, 4  ;;  %v1686_v54 = vpop.permute.xlu1 %746  ;;  %v799_v1 = vadd.f32 %v798_v62, %v797_v15 }
  0xca   :  { %v772_v61 = vmul.f32 %v1686_v54, %v1625_v38 }
  0xcb   :  { %v290_v55 = vadd.f32 %v289_v50, %v288_v44 }
  0xcc   :  { %v800_v59 = vsel %vm257_vm0, %v772_v61, 0.0 }
  0xcd   :  { %v291_v57 = vrot.slane %v290_v55, 2  ;;  %v1692_v31 = vpop.permute.xlu1 %751  ;;  %v801_v6 = vadd.f32 %v800_v59, %v799_v1 }
  0xce   :  { %v773_v30 = vmul.f32 %v1692_v31, %v84_v0  ;;  %v86_v0 = vld [vmem:[%s2287_s5] sm:$0xff] }
  0xcf   :  { %v292_v60 = vadd.f32 %v291_v57, %v290_v55 }
  0xd0   :  { %v802_v56 = vsel %vm257_vm0, %v773_v30, 0.0  ;;  %v117_v30 = vld [vmem:[%s2284_s6 + $0x78] sm:$0xff] }
  0xd1   :  { %v293_v51 = vrot.slane %v292_v60, 1  ;;  %v1697_v7 = vpop.permute.xlu1 %756  ;;  %v803_v9 = vadd.f32 %v802_v56, %v801_v6  ;;  %v889_v56 = vmul.f32 %v1676_v41, %v1605_v20  ;;  %v891_v41 = vmul.f32 %v1692_v31, %v1649_v27 }
  0xd2   :  { %v774_v38 = vmul.f32 %v1697_v7, %v85_v25 }
  0xd3   :  { %v294_v8 = vadd.f32 %v293_v51, %v292_v60  ;;  %v916_v20 = vsel %vm257_vm0, %v889_v56, 0.0  ;;  %v101_v56 = vld [vmem:[%s2287_s5 + $0x78] sm:$0xff] }
  0xd4   :  { %v804_v11 = vsel %vm257_vm0, %v774_v38, 0.0  ;;  %v375_v38 = vmul.f32 %v1670_v4, %v117_v30 }
  0xd5   :  { %v1707_v16 = vmax.f32 %v294_v8, 0.0  ;;  %v805_v21 = vadd.f32 %v804_v11, %v803_v9  ;;  %v890_v8 = vmul.f32 %v1686_v54, %v1630_v39  ;;  %v94_v9 = vld [vmem:[%s2287_s5 + $0x40] sm:$0xff] }
  0xd6   :  { %v405_v39 = vsel %vm257_vm0, %v375_v38, 0.0 }
  0xd7   :  { %v806_v26 = vrot.slane %v805_v21, 4  ;;  %v297_v23 = vmul.f32 %v1707_v16, %v87_v12  ;;  %v296_v25 = vmul.f32 %v1707_v16, %v86_v0  ;;  %v300_v34 = vmul.f32 %v1707_v16, %v90_v22 }
  0xd8   :  { %v298_v29 = vmul.f32 %v1707_v16, %v88_v17  ;;  %v302_v36 = vmul.f32 %v1707_v16, %v92_v32  ;;  %v299_v13 = vmul.f32 %v1707_v16, %v89_v47  ;;  %v301_v58 = vmul.f32 %v1707_v16, %v91_v42 }
  0xd9   :  { %v807_v28 = vadd.f32 %v806_v26, %v805_v21  ;;  %v315_v19 = vsel %vm257_vm0, %v297_v23, 0.0  ;;  %v312_v18 = vsel %vm257_vm0, %v296_v25, 0.0  ;;  %v324_v37 = vsel %vm257_vm0, %v300_v34, 0.0  ;;  %v95_v23 = vld [vmem:[%s2287_s5 + $0x48] sm:$0xff] }
  0xda   :  { %316 = vadd.xlane.f32.xlu1 %v315_v19  ;;  %313 = vadd.xlane.f32.xlu0 %v312_v18  ;;  %v318_v2 = vsel %vm257_vm0, %v298_v29, 0.0  ;;  %v330_v49 = vsel %vm257_vm0, %v302_v36, 0.0  ;;  %v321_v44 = vsel %vm257_vm0, %v299_v13, 0.0  ;;  %v327_v50 = vsel %vm257_vm0, %v301_v58, 0.0 }
  0xdb   :  { %v808_v35 = vrot.slane %v807_v28, 2  ;;  %v303_v61 = vmul.f32 %v1707_v16, %v93_v46  ;;  %v918_v54 = vsel %vm257_vm0, %v890_v8, 0.0  ;;  %v892_v21 = vmul.f32 %v1697_v7, %v117_v30 }
  0xdc   :  { %v920_v26 = vsel %vm257_vm0, %v891_v41, 0.0  ;;  %v406_v7 = vadd.f32 %v405_v39, %v1667_v33  ;;  %v305_v29 = vmul.f32 %v1707_v16, %v95_v23 }
  0xdd   :  { %v809_v45 = vadd.f32 %v808_v35, %v807_v28  ;;  %v333_v62 = vsel %vm257_vm0, %v303_v61, 0.0  ;;  %v100_v61 = vld [vmem:[%s2287_s5 + $0x70] sm:$0xff] }
  0xde   :  { %325 = vadd.xlane.f32.xlu1 %v324_v37  ;;  %319 = vadd.xlane.f32.xlu0 %v318_v2  ;;  %v310_v30 = vmul.f32 %v1707_v16, %v100_v61 }
  0xdf   :  { %v810_v43 = vrot.slane %v809_v45, 1 }
  0xe0   :  { %v354_v38 = vsel %vm257_vm0, %v310_v30, 0.0 }
  0xe1   :  { %v811_v53 = vadd.f32 %v810_v43, %v809_v45  ;;  %v339_v45 = vsel %vm257_vm0, %v305_v29, 0.0 }
  0xe2   :  { %331 = vadd.xlane.f32.xlu1 %v330_v49  ;;  %322 = vadd.xlane.f32.xlu0 %v321_v44 }
  0xe3   :  { %v1740_v48 = vmax.f32 %v811_v53, 0.0  ;;  %v98_v53 = vld [vmem:[%s2287_s5 + $0x60] sm:$0xff] }
  0xe5   :  { %v813_v52 = vmul.f32 %v1740_v48, %v86_v0  ;;  %v815_v55 = vmul.f32 %v1740_v48, %v88_v17  ;;  %v814_v15 = vmul.f32 %v1740_v48, %v87_v12  ;;  %v817_v59 = vmul.f32 %v1740_v48, %v90_v22  ;;  %v96_v22 = vld [vmem:[%s2287_s5 + $0x50] sm:$0xff] }
  0xe6   :  { %328 = vadd.xlane.f32.xlu0 %v327_v50  ;;  %v816_v1 = vmul.f32 %v1740_v48, %v89_v47  ;;  %v819_v6 = vmul.f32 %v1740_v48, %v92_v32  ;;  %v818_v12 = vmul.f32 %v1740_v48, %v91_v42  ;;  %v304_v0 = vmul.f32 %v1707_v16, %v94_v9  ;;  %v97_v32 = vld [vmem:[%s2287_s5 + $0x58] sm:$0xff] }
  0xe7   :  { %v829_v24 = vsel %vm257_vm0, %v813_v52, 0.0  ;;  %v835_v57 = vsel %vm257_vm0, %v815_v55, 0.0  ;;  %v832_v60 = vsel %vm257_vm0, %v814_v15, 0.0  ;;  %v841_v51 = vsel %vm257_vm0, %v817_v59, 0.0 }
  0xe8   :  { %830 = vadd.xlane.f32.xlu1 %v829_v24  ;;  %v838_v11 = vsel %vm257_vm0, %v816_v1, 0.0  ;;  %v847_v4 = vsel %vm257_vm0, %v819_v6, 0.0  ;;  %v917_v17 = vadd.f32 %v916_v20, %v1680_v40  ;;  %v844_v27 = vsel %vm257_vm0, %v818_v12, 0.0 }
  0xe9   :  { %v820_v31 = vmul.f32 %v1740_v48, %v93_v46  ;;  %v336_v34 = vsel %vm257_vm0, %v304_v0, 0.0  ;;  %v306_v28 = vmul.f32 %v1707_v16, %v96_v22  ;;  %v922_v40 = vsel %vm257_vm0, %v892_v21, 0.0 }
  0xea   :  { %334 = vadd.xlane.f32.xlu0 %v333_v62  ;;  %v919_v25 = vadd.f32 %v918_v54, %v917_v17  ;;  %v407_v47 = vrot.slane %v406_v7, 4  ;;  %v821_v36 = vmul.f32 %v1740_v48, %v94_v9  ;;  %v307_v37 = vmul.f32 %v1707_v16, %v97_v32  ;;  %v99_v62 = vld [vmem:[%s2287_s5 + $0x68] sm:$0xff] }
  0xeb   :  { %v850_v18 = vsel %vm257_vm0, %v820_v31, 0.0  ;;  %v342_v35 = vsel %vm257_vm0, %v306_v28, 0.0  ;;  %v823_v43 = vmul.f32 %v1740_v48, %v96_v22  ;;  %v822_v44 = vmul.f32 %v1740_v48, %v95_v23 }
  0xec   :  { %836 = vadd.xlane.f32.xlu1 %v835_v57  ;;  %v921_v19 = vadd.f32 %v920_v26, %v919_v25  ;;  %v408_v2 = vadd.f32 %v407_v47, %v406_v7  ;;  %v853_v42 = vsel %vm257_vm0, %v821_v36, 0.0  ;;  %v345_v49 = vsel %vm257_vm0, %v307_v37, 0.0  ;;  %v118_v26 = vld [vmem:[%s2288_s7] sm:$0xff] }
  0xed   :  { %v859_v50 = vsel %vm257_vm0, %v823_v43, 0.0  ;;  %v308_v52 = vmul.f32 %v1707_v16, %v98_v53  ;;  %v856_v24 = vsel %vm257_vm0, %v822_v44, 0.0  ;;  %v824_v55 = vmul.f32 %v1740_v48, %v97_v32 }
  0xee   :  { %833 = vadd.xlane.f32.xlu0 %v832_v60  ;;  %v923_v33 = vadd.f32 %v922_v40, %v921_v19  ;;  %v409_v58 = vrot.slane %v408_v2, 2  ;;  %v309_v1 = vmul.f32 %v1707_v16, %v99_v62  ;;  %v825_v8 = vmul.f32 %v1740_v48, %v98_v53  ;;  %v120_v19 = vld [vmem:[%s2288_s7 + $0x10] sm:$0xff] }
  0xef   :  { %v348_v59 = vsel %vm257_vm0, %v308_v52, 0.0  ;;  %v862_v60 = vsel %vm257_vm0, %v824_v55, 0.0  ;;  %v655_v9 = vsub.s32 1, %v1303_v3  ;;  %v311_v12 = vmul.f32 %v1707_v16, %v101_v56  ;;  %v124_v52 = vld [vmem:[%s2288_s7 + $0x30] sm:$0xff] }
  0xf0   :  { %842 = vadd.xlane.f32.xlu1 %v841_v51  ;;  %v924_v13 = vrot.slane %v923_v33, 4  ;;  %v410_v15 = vadd.f32 %v409_v58, %v408_v2  ;;  %v827_v0 = vmul.f32 %v1740_v48, %v100_v61  ;;  %v826_v21 = vmul.f32 %v1740_v48, %v99_v62  ;;  %v122_v2 = vld [vmem:[%s2288_s7 + $0x20] sm:$0xff] }
  0xf1   :  { %v1831_v39 = vrot.slane %v1311_v5, %v655_v9  ;;  %v357_v54 = vsel %vm257_vm0, %v311_v12, 0.0  ;;  %v828_v31 = vmul.f32 %v1740_v48, %v101_v56 }
  0xf2   :  { %839 = vadd.xlane.f32.xlu0 %v838_v11  ;;  %v925_v46 = vadd.f32 %v924_v13, %v923_v33  ;;  %v411_v51 = vrot.slane %v410_v15, 1  ;;  %v351_v11 = vsel %vm257_vm0, %v309_v1, 0.0  ;;  %v871_v16 = vsel %vm257_vm0, %v827_v0, 0.0  ;;  %v121_v33 = vld [vmem:[%s2288_s7 + $0x18] sm:$0xff]  ;;  %v126_v1 = vld [vmem:[%s2288_s7 + $0x40] sm:$0xff] }
  0xf3   :  { %v658_v17 = vmul.f32 %v1831_v39, %v1324_v10  ;;  %v868_v5 = vsel %vm257_vm0, %v826_v21, 0.0  ;;  %v874_v10 = vsel %vm257_vm0, %v828_v31, 0.0  ;;  %v146_v31 = vmax.f32 %v1459_v14, 0.0 }
  0xf4   :  { %848 = vadd.xlane.f32.xlu1 %v847_v4  ;;  %v926_v57 = vrot.slane %v925_v46, 2  ;;  %v412_v20 = vadd.f32 %v411_v51, %v410_v15  ;;  %v865_v4 = vsel %vm257_vm0, %v825_v8, 0.0  ;;  %v125_v15 = vld [vmem:[%s2288_s7 + $0x38] sm:$0xff]  ;;  %v127_v8 = vld [vmem:[%s2288_s7 + $0x48] sm:$0xff] }
  0xf6   :  { %845 = vadd.xlane.f32.xlu0 %v844_v27  ;;  %v927_v6 = vadd.f32 %v926_v57, %v925_v46  ;;  %v1835_v3 = vmax.f32 %v412_v20, 0.0  ;;  %v119_v27 = vld [vmem:[%s2288_s7 + $0x8] sm:$0xff] }
  0xf8   :  { %337 = vadd.xlane.f32.xlu1 %v336_v34  ;;  %v928_v41 = vrot.slane %v927_v6, 1  ;;  %v415_v7 = vmul.f32 %v1835_v3, %v119_v27  ;;  %v414_v25 = vmul.f32 %v1835_v3, %v118_v26  ;;  %v416_v47 = vmul.f32 %v1835_v3, %v120_v19 }
  0xf9   :  { %v417_v37 = vmul.f32 %v1835_v3, %v121_v33  ;;  %v418_v53 = vmul.f32 %v1835_v3, %v122_v2  ;;  %v420_v62 = vmul.f32 %v1835_v3, %v124_v52  ;;  %v423_v20 = vmul.f32 %v1835_v3, %v127_v8 }
  0xfa   :  { %851 = vadd.xlane.f32.xlu0 %v850_v18  ;;  %v929_v22 = vadd.f32 %v928_v41, %v927_v6  ;;  %v433_v34 = vsel %vm257_vm0, %v415_v7, 0.0  ;;  %v430_v48 = vsel %vm257_vm0, %v414_v25, 0.0  ;;  %v128_v41 = vld [vmem:[%s2288_s7 + $0x50] sm:$0xff]  ;;  %v1934_v7 = vld [vmem:[%s2285_s3 + $0x8] sm:$0xff] }
  0xfb   :  { %v439_v43 = vsel %vm257_vm0, %v417_v37, 0.0  ;;  %v442_v46 = vsel %vm257_vm0, %v418_v53, 0.0  ;;  %v448_v30 = vsel %vm257_vm0, %v420_v62, 0.0  ;;  %v424_v21 = vmul.f32 %v1835_v3, %v128_v41 }
  0xfc   :  { %343 = vadd.xlane.f32.xlu1 %v342_v35  ;;  %v1848_v23 = vmax.f32 %v929_v22, 0.0  ;;  %v129_v22 = vld [vmem:[%s2288_s7 + $0x58] sm:$0xff]  ;;  %v148_v14 = vmul.f32 %v146_v31, %v1934_v7 }
  0xfe   :  { %340 = vadd.xlane.f32.xlu0 %v339_v45  ;;  %v932_v28 = vmul.f32 %v1848_v23, %v119_v27  ;;  %v931_v40 = vmul.f32 %v1848_v23, %v118_v26  ;;  %v933_v29 = vmul.f32 %v1848_v23, %v120_v19  ;;  %v934_v36 = vmul.f32 %v1848_v23, %v121_v33  ;;  %v130_v26 = vld [vmem:[%s2288_s7 + $0x60] sm:$0xff] }
  0xff   :  { %v436_v45 = vsel %vm257_vm0, %v416_v47, 0.0  ;;  %v939_v51 = vmul.f32 %v1848_v23, %v126_v1  ;;  %v941_v0 = vmul.f32 %v1848_v23, %v128_v41  ;;  %v460_v27 = vsel %vm257_vm0, %v424_v21, 0.0  ;;  %v132_v47 = vld [vmem:[%s2288_s7 + $0x70] sm:$0xff] }
 0x100   :  { %854 = vadd.xlane.f32.xlu1 %v853_v42  ;;  %v950_v18 = vsel %vm257_vm0, %v932_v28, 0.0  ;;  %v947_v32 = vsel %vm257_vm0, %v931_v40, 0.0  ;;  %v953_v35 = vsel %vm257_vm0, %v933_v29, 0.0  ;;  %v956_v13 = vsel %vm257_vm0, %v934_v36, 0.0 }
 0x101   :  { %v935_v42 = vmul.f32 %v1848_v23, %v122_v2  ;;  %v971_v9 = vsel %vm257_vm0, %v939_v51, 0.0  ;;  %v943_v25 = vmul.f32 %v1848_v23, %v130_v26  ;;  %v426_v28 = vmul.f32 %v1835_v3, %v130_v26  ;;  %v133_v2 = vld [vmem:[%s2288_s7 + $0x78] sm:$0xff] }
 0x102   :  { %346 = vadd.xlane.f32.xlu0 %v345_v49  ;;  %v123_v49 = vld [vmem:[%s2288_s7 + $0x28] sm:$0xff]  ;;  %v429_v53 = vmul.f32 %v1835_v3, %v133_v2 }
 0x103   :  { %v959_v44 = vsel %vm257_vm0, %v935_v42, 0.0  ;;  %v936_v58 = vmul.f32 %v1848_v23, %v123_v49  ;;  %v983_v40 = vsel %vm257_vm0, %v943_v25, 0.0  ;;  %v946_v42 = vmul.f32 %v1848_v23, %v133_v2 }
 0x104   :  { %860 = vadd.xlane.f32.xlu1 %v859_v50  ;;  %v419_v50 = vmul.f32 %v1835_v3, %v123_v49 }
 0x105   :  { %v962_v61 = vsel %vm257_vm0, %v936_v58, 0.0  ;;  %v475_v58 = vsel %vm257_vm0, %v429_v53, 0.0 }
 0x106   :  { %857 = vadd.xlane.f32.xlu0 %v856_v24  ;;  %v937_v24 = vmul.f32 %v1848_v23, %v124_v52  ;;  %v445_v55 = vsel %vm257_vm0, %v419_v50, 0.0  ;;  %v1247_v50 = vld [vmem:[%s2283_s2] sm:$0xff] }
 0x108   :  { %349 = vadd.xlane.f32.xlu1 %v348_v59  ;;  %v965_v57 = vsel %vm257_vm0, %v937_v24, 0.0  ;;  %v938_v59 = vmul.f32 %v1848_v23, %v125_v15 }
 0x10a   :  { %863 = vadd.xlane.f32.xlu0 %v862_v60  ;;  %v421_v60 = vmul.f32 %v1835_v3, %v125_v15  ;;  %v968_v56 = vsel %vm257_vm0, %v938_v59, 0.0 }
 0x10c   :  { %355 = vadd.xlane.f32.xlu1 %v354_v38  ;;  %v451_v6 = vsel %vm257_vm0, %v421_v60, 0.0  ;;  %v422_v38 = vmul.f32 %v1835_v3, %v126_v1 }
 0x10e   :  { %352 = vadd.xlane.f32.xlu0 %v351_v11  ;;  %v940_v11 = vmul.f32 %v1848_v23, %v127_v8  ;;  %v454_v12 = vsel %vm257_vm0, %v422_v38, 0.0 }
 0x110   :  { %866 = vadd.xlane.f32.xlu1 %v865_v4  ;;  %v974_v4 = vsel %vm257_vm0, %v940_v11, 0.0 }
 0x112   :  { %358 = vadd.xlane.f32.xlu0 %v357_v54  ;;  %v457_v54 = vsel %vm257_vm0, %v423_v20, 0.0 }
 0x114   :  { %872 = vadd.xlane.f32.xlu1 %v871_v16  ;;  %v977_v16 = vsel %vm257_vm0, %v941_v0, 0.0 }
 0x116   :  { %869 = vadd.xlane.f32.xlu0 %v868_v5  ;;  %v425_v5 = vmul.f32 %v1835_v3, %v129_v22 }
 0x118   :  { %661 = vadd.xlane.f32.xlu1 %v658_v17  ;;  %v942_v17 = vmul.f32 %v1848_v23, %v129_v22 }
 0x11a   :  { %875 = vadd.xlane.f32.xlu0 %v874_v10  ;;  %v980_v10 = vsel %vm257_vm0, %v942_v17, 0.0 }
 0x11c   :  { %434 = vadd.xlane.f32.xlu1 %v433_v34  ;;  %v463_v34 = vsel %vm257_vm0, %v425_v5, 0.0 }
 0x11e   :  { %431 = vadd.xlane.f32.xlu0 %v430_v48  ;;  %v131_v48 = vld [vmem:[%s2288_s7 + $0x68] sm:$0xff] }
 0x11f   :  { %v944_v19 = vmul.f32 %v1848_v23, %v131_v48  ;;  %v427_v29 = vmul.f32 %v1835_v3, %v131_v48 }
 0x120   :  { %951 = vadd.xlane.f32.xlu1 %v950_v18  ;;  %v466_v18 = vsel %vm257_vm0, %v426_v28, 0.0 }
 0x121   :  { %v986_v33 = vsel %vm257_vm0, %v944_v19, 0.0  ;;  %v469_v36 = vsel %vm257_vm0, %v427_v29, 0.0 }
 0x122   :  { %948 = vadd.xlane.f32.xlu0 %v947_v32  ;;  %v155_v32 = vrot.slane %v148_v14, 4 }
 0x124   :  { %954 = vadd.xlane.f32.xlu1 %v953_v35  ;;  %v945_v35 = vmul.f32 %v1848_v23, %v132_v47  ;;  %v156_v37 = vadd.f32 %v155_v32, %v148_v14  ;;  %v657_v23 = vmul.f32 %v1247_v50, %v1831_v39 }
 0x126   :  { %437 = vadd.xlane.f32.xlu0 %v436_v45  ;;  %v428_v45 = vmul.f32 %v1835_v3, %v132_v47  ;;  %v157_v49 = vrot.slane %v156_v37, 2 }
 0x128   :  { %957 = vadd.xlane.f32.xlu1 %v956_v13  ;;  %v989_v13 = vsel %vm257_vm0, %v945_v35, 0.0 }
 0x12a   :  { %440 = vadd.xlane.f32.xlu0 %v439_v43  ;;  %v472_v43 = vsel %vm257_vm0, %v428_v45, 0.0 }
 0x12c   :  { %960 = vadd.xlane.f32.xlu1 %v959_v44  ;;  %v992_v44 = vsel %vm257_vm0, %v946_v42, 0.0 }
 0x12e   :  { %443 = vadd.xlane.f32.xlu0 %v442_v46  ;;  %v158_v46 = vadd.f32 %v157_v49, %v156_v37 }
 0x130   :  { %963 = vadd.xlane.f32.xlu1 %v962_v61  ;;  %v159_v52 = vrot.slane %v158_v46, 1 }
 0x132   :  { %446 = vadd.xlane.f32.xlu0 %v445_v55  ;;  %v1968_v61 = vadd.f32 %v159_v52, %v158_v46 }
 0x134   :  { %966 = vadd.xlane.f32.xlu1 %v965_v57 }
 0x136   :  { %449 = vadd.xlane.f32.xlu0 %v448_v30 }
 0x138   :  { %969 = vadd.xlane.f32.xlu1 %v968_v56 }
 0x13a   :  { %452 = vadd.xlane.f32.xlu0 %v451_v6 }
 0x13c   :  { %972 = vadd.xlane.f32.xlu1 %v971_v9 }
 0x13e   :  { %455 = vadd.xlane.f32.xlu0 %v454_v12 }
 0x140   :  { %975 = vadd.xlane.f32.xlu1 %v974_v4 }
 0x142   :  { %458 = vadd.xlane.f32.xlu0 %v457_v54 }
 0x144   :  { %978 = vadd.xlane.f32.xlu1 %v977_v16 }
 0x146   :  { %461 = vadd.xlane.f32.xlu0 %v460_v27 }
 0x148   :  { %981 = vadd.xlane.f32.xlu1 %v980_v10 }
 0x14a   :  { %464 = vadd.xlane.f32.xlu0 %v463_v34 }
 0x14c   :  { %984 = vadd.xlane.f32.xlu1 %v983_v40 }
 0x14e   :  { %467 = vadd.xlane.f32.xlu0 %v466_v18 }
 0x150   :  { %987 = vadd.xlane.f32.xlu1 %v986_v33 }
 0x152   :  { %470 = vadd.xlane.f32.xlu0 %v469_v36 }
 0x154   :  { %990 = vadd.xlane.f32.xlu1 %v989_v13 }
 0x156   :  { %473 = vadd.xlane.f32.xlu0 %v472_v43 }
 0x158   :  { %993 = vadd.xlane.f32.xlu1 %v992_v44 }
 0x15a   :  { %476 = vadd.xlane.f32.xlu0 %v475_v58 }
 0x15e   :  { %659 = vadd.xlane.f32.xlu0 %v657_v23 }
 0x163   :  { %v317_v3 = vpop.xlane.xlu1 %316  ;;  %v314_v24 = vpop.xlane.xlu0 %313 }
 0x164   :  { %v1971_v55 = vmul.f32 %v317_v3, %v1968_v61  ;;  %v1974_v62 = vmul.f32 %v314_v24, %v1968_v61 }
 0x167   :  { %v326_v15 = vpop.xlane.xlu1 %325  ;;  %v320_v57 = vpop.xlane.xlu0 %319 }
 0x168   :  { %v1977_v59 = vmul.f32 %v326_v15, %v1968_v61  ;;  %v1980_v30 = vmul.f32 %v320_v57, %v1968_v61  ;;  %v478_v40 = vmax.f32 %v314_v24, %v326_v15  ;;  %v499_v29 = vmin.f32 %v314_v24, %v326_v15 }
 0x16b   :  { %v332_v39 = vpop.xlane.xlu1 %331  ;;  %v323_v60 = vpop.xlane.xlu0 %322 }
 0x16c   :  { %v1983_v1 = vmul.f32 %v332_v39, %v1968_v61  ;;  %v1986_v56 = vmul.f32 %v323_v60, %v1968_v61  ;;  %v480_v32 = vmax.f32 %v320_v57, %v332_v39  ;;  %v501_v47 = vmin.f32 %v320_v57, %v332_v39 }
 0x16f   :  { %v329_v51 = vpop.xlane.xlu0 %328 }
 0x170   :  { %v1989_v6 = vmul.f32 %v329_v51, %v1968_v61  ;;  %v479_v19 = vmax.f32 %v317_v3, %v329_v51  ;;  %v500_v18 = vmin.f32 %v317_v3, %v329_v51 }
 0x171   :  { %v1991_v38 = vpop.xlane.xlu1 %830 }
 0x173   :  { %v335_v8 = vpop.xlane.xlu0 %334 }
 0x174   :  { %v1994_v9 = vmul.f32 %v335_v8, %v1968_v61  ;;  %v481_v33 = vmax.f32 %v323_v60, %v335_v8  ;;  %v502_v36 = vmin.f32 %v323_v60, %v335_v8 }
 0x175   :  { %v1996_v11 = vpop.xlane.xlu1 %836 }
 0x177   :  { %v1998_v12 = vpop.xlane.xlu0 %833 }
 0x179   :  { %v2000_v20 = vpop.xlane.xlu1 %842 }
 0x17a   :  { %v995_v45 = vmax.f32 %v1991_v38, %v2000_v20  ;;  %v1016_v23 = vmin.f32 %v1991_v38, %v2000_v20 }
 0x17b   :  { %v2002_v41 = vpop.xlane.xlu0 %839 }
 0x17d   :  { %v2004_v4 = vpop.xlane.xlu1 %848 }
 0x17e   :  { %v997_v52 = vmax.f32 %v1996_v11, %v2004_v4  ;;  %v1018_v8 = vmin.f32 %v1996_v11, %v2004_v4 }
 0x17f   :  { %v2006_v0 = vpop.xlane.xlu0 %845 }
 0x181   :  { %v338_v54 = vpop.xlane.xlu1 %337 }
 0x182   :  { %v2009_v21 = vmul.f32 %v338_v54, %v1968_v61  ;;  %v482_v13 = vmax.f32 %v478_v40, %v338_v54  ;;  %v503_v42 = vmin.f32 %v499_v29, %v338_v54  ;;  %v996_v54 = vmax.f32 %v1998_v12, %v2006_v0 }
 0x183   :  { %v2011_v22 = vpop.xlane.xlu0 %851 }
 0x185   :  { %v344_v16 = vpop.xlane.xlu1 %343 }
 0x186   :  { %v2014_v17 = vmul.f32 %v344_v16, %v1968_v61  ;;  %v484_v43 = vmax.f32 %v480_v32, %v344_v16  ;;  %v505_v53 = vmin.f32 %v501_v47, %v344_v16  ;;  %v1017_v16 = vmin.f32 %v1998_v12, %v2006_v0 }
 0x187   :  { %v341_v27 = vpop.xlane.xlu0 %340  ;;  %v1019_v32 = vmin.f32 %v2002_v41, %v2011_v22 }
 0x188   :  { %v2017_v5 = vmul.f32 %v341_v27, %v1968_v61  ;;  %v483_v37 = vmax.f32 %v479_v19, %v341_v27  ;;  %v504_v2 = vmin.f32 %v500_v18, %v341_v27  ;;  %v998_v27 = vmax.f32 %v2002_v41, %v2011_v22 }
 0x189   :  { %v2019_v31 = vpop.xlane.xlu1 %854 }
 0x18a   :  { %v999_v47 = vmax.f32 %v995_v45, %v2019_v31 }
 0x18b   :  { %v347_v26 = vpop.xlane.xlu0 %346 }
 0x18c   :  { %v2022_v10 = vmul.f32 %v347_v26, %v1968_v61  ;;  %v485_v44 = vmax.f32 %v481_v33, %v347_v26  ;;  %v506_v58 = vmin.f32 %v502_v36, %v347_v26 }
 0x18d   :  { %v2024_v25 = vpop.xlane.xlu1 %860 }
 0x18f   :  { %v2026_v34 = vpop.xlane.xlu0 %857 }
 0x190   :  { %v1000_v33 = vmax.f32 %v996_v54, %v2026_v34  ;;  %v1021_v36 = vmin.f32 %v1017_v16, %v2026_v34 }
 0x191   :  { %v2028_v28 = vpop.xlane.xlu1 %349 }
 0x192   :  { %v486_v3 = vmax.f32 %v482_v13, %v2028_v28  ;;  %v507_v24 = vmin.f32 %v503_v42, %v2028_v28  ;;  %v1001_v13 = vmax.f32 %v997_v52, %v2024_v25 }
 0x193   :  { %v2030_v14 = vpop.xlane.xlu0 %863 }
 0x195   :  { %v2032_v48 = vpop.xlane.xlu1 %355 }
 0x196   :  { %v488_v57 = vmax.f32 %v484_v43, %v2032_v48  ;;  %v509_v39 = vmin.f32 %v505_v53, %v2032_v48  ;;  %v1022_v53 = vmin.f32 %v1018_v8, %v2024_v25 }
 0x197   :  { %v2034_v35 = vpop.xlane.xlu0 %352 }
 0x198   :  { %v487_v46 = vmax.f32 %v483_v37, %v2034_v35  ;;  %v508_v50 = vmin.f32 %v504_v2, %v2034_v35  ;;  %v1020_v2 = vmin.f32 %v1016_v23, %v2019_v31 }
 0x199   :  { %v2038_v49 = vpop.xlane.xlu1 %866 }
 0x19a   :  { %v490_v40 = vmax.f32 %v486_v3, %v487_v46  ;;  %v511_v19 = vmin.f32 %v507_v24, %v508_v50  ;;  %v1023_v50 = vmin.f32 %v1019_v32, %v2030_v14  ;;  %v1003_v3 = vmax.f32 %v999_v47, %v2038_v49 }
 0x19b   :  { %v2048_v15 = vpop.xlane.xlu0 %358  ;;  %v1024_v23 = vmin.f32 %v1020_v2, %v2038_v49 }
 0x19c   :  { %v489_v60 = vmax.f32 %v485_v44, %v2048_v15  ;;  %v510_v51 = vmin.f32 %v506_v58, %v2048_v15  ;;  %v1002_v44 = vmax.f32 %v998_v27, %v2030_v14 }
 0x19d   :  { %v2062_v26 = vpop.xlane.xlu1 %872 }
 0x19e   :  { %v491_v18 = vmax.f32 %v488_v57, %v489_v60  ;;  %v512_v29 = vmin.f32 %v509_v39, %v510_v51  ;;  %v1005_v52 = vmax.f32 %v1001_v13, %v2062_v26  ;;  %v1026_v39 = vmin.f32 %v1022_v53, %v2062_v26 }
 0x19f   :  { %v2069_v37 = vpop.xlane.xlu0 %869 }
 0x1a0   :  { %v492_v42 = vmax.f32 %v490_v40, %v491_v18  ;;  %v513_v43 = vmin.f32 %v511_v19, %v512_v29  ;;  %v1004_v58 = vmax.f32 %v1000_v33, %v2069_v37  ;;  %v1025_v45 = vmin.f32 %v1021_v36, %v2069_v37 }
 0x1a1   :  { %v662_v46 = vpop.xlane.xlu1 %661 }
 0x1a2   :  { %v493_v24 = vrot.slane %v492_v42, 4  ;;  %v514_v57 = vrot.slane %v513_v43, 4  ;;  %v664_v60 = vmax.f32 %v662_v46, 0.0  ;;  %v1007_v40 = vmax.f32 %v1003_v3, %v1004_v58 }
 0x1a3   :  { %v876_v51 = vpop.xlane.xlu0 %875  ;;  %v1028_v19 = vmin.f32 %v1024_v23, %v1025_v45 }
 0x1a4   :  { %v494_v8 = vmax.f32 %v492_v42, %v493_v24  ;;  %v515_v54 = vmin.f32 %v513_v43, %v514_v57  ;;  %v1006_v16 = vmax.f32 %v1002_v44, %v876_v51  ;;  %v1027_v27 = vmin.f32 %v1023_v50, %v876_v51 }
 0x1a5   :  { %v666_v18 = vmul.f32 %v664_v60, %v1934_v7  ;;  %v2083_v29 = vpop.xlane.xlu1 %434 }
 0x1a6   :  { %v495_v32 = vrot.slane %v494_v8, 2  ;;  %v516_v47 = vrot.slane %v515_v54, 2  ;;  %v1008_v33 = vmax.f32 %v1005_v52, %v1006_v16  ;;  %v1029_v36 = vmin.f32 %v1026_v39, %v1027_v27 }
 0x1a7   :  { %v673_v2 = vrot.slane %v666_v18, 4  ;;  %v2085_v13 = vpop.xlane.xlu0 %431 }
 0x1a8   :  { %v496_v53 = vmax.f32 %v494_v8, %v495_v32  ;;  %v517_v46 = vmin.f32 %v515_v54, %v516_v47  ;;  %v1009_v63 = vmax.f32 %v1007_v40, %v1008_v33  ;;  %v1030_v42 = vmin.f32 %v1028_v19, %v1029_v36 }
 0x1a9   :  { %v674_v43 = vadd.f32 %v673_v2, %v666_v18  ;;  %v2087_v44 = vpop.xlane.xlu1 %951  ;;  %v538_v47 = vmul.f32 %v2048_v15, %v1968_v61  ;;  %v2114_v15 = vmul.f32 %v2032_v48, %v1968_v61 }
 0x1aa   :  { %v497_v58 = vrot.slane %v496_v53, 1  ;;  %v518_v45 = vrot.slane %v517_v46, 1  ;;  %v1010_v50 = vrot.slane %v1009_v63, 4  ;;  %v1031_v7 = vrot.slane %v1030_v42, 4 }
 0x1ab   :  { %v675_v3 = vrot.slane %v674_v43, 2  ;;  %v2089_v24 = vpop.xlane.xlu0 %948 }
 0x1ac   :  { %v498_v57 = vmax.f32 %v496_v53, %v497_v58  ;;  %v519_v23 = vmin.f32 %v517_v46, %v518_v45  ;;  %v1011_v52 = vmax.f32 %v1009_v63, %v1010_v50  ;;  %v1032_v39 = vmin.f32 %v1030_v42, %v1031_v7 }
 0x1ad   :  { %v676_v60 = vadd.f32 %v675_v3, %v674_v43  ;;  %v2091_v16 = vpop.xlane.xlu1 %954  ;;  %v2110_v58 = vmul.f32 %v2028_v28, %v1968_v61 }
 0x1ae   :  { %v520_v8 = vmul.f32 %v498_v57, %v1968_v61  ;;  %v521_v54 = vmul.f32 %v519_v23, %v1968_v61  ;;  %v1012_v27 = vrot.slane %v1011_v52, 2  ;;  %v1033_v40 = vrot.slane %v1032_v39, 2 }
 0x1af   :  { %v677_v19 = vrot.slane %v676_v60, 1  ;;  %v2095_v18 = vpop.xlane.xlu0 %437 }
 0x1b0   :  { %v2097_v32 = vmax.f32 %v520_v8, %v521_v54  ;;  %v1013_v33 = vmax.f32 %v1011_v52, %v1012_v27  ;;  %v1034_v63 = vmin.f32 %v1032_v39, %v1033_v40 }
 0x1b1   :  { %v2101_v36 = vadd.f32 %v677_v19, %v676_v60  ;;  %v2103_v2 = vpop.xlane.xlu1 %957 }
 0x1b2   :  { %v554_v53 = vsub.f32 %v538_v47, %v2097_v32  ;;  %v1014_v46 = vrot.slane %v1013_v33, 1  ;;  %v1035_v42 = vrot.slane %v1034_v63, 1  ;;  %v540_v43 = vsub.f32 %v1971_v55, %v2097_v32 }
 0x1b3   :  { %v2117_v45 = vmul.f32 %v876_v51, %v2101_v36  ;;  %v539_v50 = vsub.f32 %v1974_v62, %v2097_v32  ;;  %v2121_v7 = vpop.xlane.xlu0 %440  ;;  %v1041_v55 = vmul.f32 %v1998_v12, %v2101_v36  ;;  %v1040_v48 = vmul.f32 %v1991_v38, %v2101_v36 }
 0x1b4   :  { %v1015_v3 = vmax.f32 %v1013_v33, %v1014_v46  ;;  %v1036_v57 = vmin.f32 %v1034_v63, %v1035_v42  ;;  %v557_v23 = vmul.f32 1.442695, %v540_v43  ;;  %v585_v28 = vmul.f32 1.442695, %v554_v53 }
 0x1b5   :  { %v555_v52 = vmul.f32 1.442695, %v539_v50  ;;  %v541_v51 = vsub.f32 %v1980_v30, %v2097_v32  ;;  %v2129_v39 = vpop.xlane.xlu1 %960  ;;  %v1042_v8 = vmul.f32 %v1996_v11, %v2101_v36  ;;  %v542_v12 = vsub.f32 %v1986_v56, %v2097_v32 }
 0x1b6   :  { %v1037_v62 = vmul.f32 %v1015_v3, %v2101_v36  ;;  %v1038_v60 = vmul.f32 %v1036_v57, %v2101_v36  ;;  %1179 = vpow2.f32 %v557_v23  ;;  %v1043_v38 = vmul.f32 %v2002_v41, %v2101_v36 }
 0x1b7   :  { %v559_v54 = vmul.f32 1.442695, %v541_v51  ;;  %v543_v30 = vsub.f32 %v1977_v59, %v2097_v32  ;;  %v2141_v27 = vpop.xlane.xlu0 %443  ;;  %1181 = vpow2.f32 %v555_v52  ;;  %v561_v19 = vmul.f32 1.442695, %v542_v12 }
 0x1b8   :  { %v2143_v40 = vmax.f32 %v1037_v62, %v1038_v60  ;;  %v1044_v11 = vmul.f32 %v2000_v20, %v2101_v36  ;;  %v1045_v33 = vmul.f32 %v2006_v0, %v2101_v36  ;;  %v544_v41 = vsub.f32 %v1989_v6, %v2097_v32 }
 0x1b9   :  { %1183 = vpow2.f32 %v559_v54  ;;  %v563_v47 = vmul.f32 1.442695, %v543_v30  ;;  %v2147_v56 = vpop.xlane.xlu1 %963  ;;  %v1046_v46 = vmul.f32 %v2004_v4, %v2101_v36  ;;  %v2165_v6 = vmul.f32 %v2034_v35, %v1968_v61 }
 0x1ba   :  { %v1057_v59 = vsub.f32 %v1041_v55, %v2143_v40  ;;  %v1056_v63 = vsub.f32 %v1040_v48, %v2143_v40  ;;  %v1058_v53 = vsub.f32 %v1042_v8, %v2143_v40  ;;  %v1059_v20 = vsub.f32 %v1043_v38, %v2143_v40 }
 0x1bb   :  { %1185 = vpow2.f32 %v561_v19  ;;  %v1060_v42 = vsub.f32 %v1044_v11, %v2143_v40  ;;  %v1061_v43 = vsub.f32 %v1045_v33, %v2143_v40  ;;  %v2161_v0 = vpop.xlane.xlu0 %446  ;;  %v1071_v4 = vsub.f32 %v2117_v45, %v2143_v40 }
 0x1bc   :  { %v1074_v50 = vmul.f32 1.442695, %v1057_v59  ;;  %v1072_v3 = vmul.f32 1.442695, %v1056_v63  ;;  %1187 = vpow2.f32 %v563_v47  ;;  %v1076_v57 = vmul.f32 1.442695, %v1058_v53 }
 0x1bd   :  { %1189 = vpow2.f32 %v585_v28  ;;  %v2169_v23 = vpop.xlane.xlu1 %966  ;;  %v1062_v55 = vsub.f32 %v1046_v46, %v2143_v40  ;;  %v1078_v52 = vmul.f32 1.442695, %v1059_v20  ;;  %v1080_v48 = vmul.f32 1.442695, %v1060_v42 }
 0x1be   :  { %v1082_v51 = vmul.f32 1.442695, %v1061_v43  ;;  %v545_v62 = vsub.f32 %v1983_v1, %v2097_v32  ;;  %1191 = vpow2.f32 %v1074_v50  ;;  %v565_v61 = vmul.f32 1.442695, %v544_v41 }
 0x1bf   :  { %v2174_v35 = vpop.xlane.xlu0 %449  ;;  %v1047_v28 = vmul.f32 %v2011_v22, %v2101_v36  ;;  %v546_v60 = vsub.f32 %v1994_v9, %v2097_v32  ;;  %1193 = vpow2.f32 %v1072_v3  ;;  %v1084_v8 = vmul.f32 1.442695, %v1062_v55 }
 0x1c0   :  { %v1048_v12 = vmul.f32 %v2019_v31, %v2101_v36  ;;  %v547_v54 = vsub.f32 %v2009_v21, %v2097_v32  ;;  %1195 = vpow2.f32 %v1076_v57  ;;  %v567_v1 = vmul.f32 1.442695, %v545_v62 }
 0x1c1   :  { %v2184_v38 = vpop.xlane.xlu1 %969  ;;  %v1063_v30 = vsub.f32 %v1047_v28, %v2143_v40  ;;  %v1049_v22 = vmul.f32 %v2026_v34, %v2101_v36  ;;  %1197 = vpow2.f32 %v1078_v52  ;;  %v569_v19 = vmul.f32 1.442695, %v546_v60 }
 0x1c2   :  { %v1064_v9 = vsub.f32 %v1048_v12, %v2143_v40  ;;  %v548_v11 = vsub.f32 %v2017_v5, %v2097_v32  ;;  %1199 = vpow2.f32 %v1080_v48  ;;  %v571_v21 = vmul.f32 1.442695, %v547_v54 }
 0x1c3   :  { %v2192_v31 = vpop.xlane.xlu0 %452  ;;  %v1065_v47 = vsub.f32 %v1049_v22, %v2143_v40  ;;  %v1050_v33 = vmul.f32 %v2024_v25, %v2101_v36  ;;  %v1180_v41 = vpop.eup %1179  ;;  %1201 = vpow2.f32 %v1082_v51  ;;  %v1086_v59 = vmul.f32 1.442695, %v1063_v30 }
 0x1c4   :  { %v1088_v34 = vmul.f32 1.442695, %v1064_v9  ;;  %v549_v63 = vsub.f32 %v2014_v17, %v2097_v32  ;;  %v1182_v53 = vpop.eup %1181  ;;  %v610_v46 = vmul.f32 %v1180_v41, %v2083_v29  ;;  %1203 = vpow2.f32 %v565_v61 }
 0x1c5   :  { %v2200_v5 = vpop.xlane.xlu1 %972  ;;  %v573_v20 = vmul.f32 1.442695, %v548_v11  ;;  %v1066_v42 = vsub.f32 %v1050_v33, %v2143_v40  ;;  %v587_v50 = vadd.f32 %v1182_v53, %v1180_v41  ;;  %v609_v25 = vmul.f32 %v1182_v53, %v2085_v13 }
 0x1c6   :  { %v1184_v43 = vpop.eup %1183  ;;  %1205 = vpow2.f32 %v1084_v8  ;;  %v1090_v3 = vmul.f32 1.442695, %v1065_v47  ;;  %v575_v17 = vmul.f32 1.442695, %v549_v63  ;;  %v1051_v29 = vmul.f32 %v2030_v14, %v2101_v36 }
 0x1c7   :  { %v611_v57 = vmul.f32 %v1184_v43, %v2095_v18  ;;  %1207 = vpow2.f32 %v567_v1  ;;  %v2205_v55 = vpop.xlane.xlu0 %455  ;;  %v625_v48 = vadd.f32 %v610_v46, %v609_v25  ;;  %v588_v51 = vadd.f32 %v1184_v43, %v587_v50 }
 0x1c8   :  { %v1186_v52 = vpop.eup %1185  ;;  %1209 = vpow2.f32 %v1086_v59  ;;  %v550_v62 = vsub.f32 %v2022_v10, %v2097_v32  ;;  %v1092_v28 = vmul.f32 1.442695, %v1066_v42  ;;  %v1067_v18 = vsub.f32 %v1051_v29, %v2143_v40 }
 0x1c9   :  { %v1188_v61 = vpop.eup %1187  ;;  %1211 = vpow2.f32 %v569_v19  ;;  %v2211_v13 = vpop.xlane.xlu1 %975  ;;  %v1052_v60 = vmul.f32 %v2038_v49, %v2101_v36  ;;  %v626_v14 = vadd.f32 %v625_v48, %v611_v57  ;;  %v589_v12 = vadd.f32 %v1186_v52, %v588_v51 }
 0x1ca   :  { %v2216_v8 = vpop.eup %1189  ;;  %v612_v54 = vmul.f32 %v1186_v52, %v2121_v7  ;;  %1213 = vpow2.f32 %v1088_v34  ;;  %v613_v1 = vmul.f32 %v1188_v61, %v2141_v27  ;;  %v1094_v30 = vmul.f32 1.442695, %v1067_v18 }
 0x1cb   :  { %1215 = vpow2.f32 %v571_v21  ;;  %v2220_v10 = vpop.xlane.xlu0 %458  ;;  %v1068_v22 = vsub.f32 %v1052_v60, %v2143_v40  ;;  %v1192_v19 = vpop.eup %1191  ;;  %v590_v11 = vadd.f32 %v1188_v61, %v589_v12  ;;  %v551_v49 = vsub.f32 %v2110_v58, %v2097_v32 }
 0x1cc   :  { %v627_v9 = vadd.f32 %v626_v14, %v612_v54  ;;  %1217 = vpow2.f32 %v1090_v3  ;;  %v1194_v47 = vpop.eup %1193  ;;  %v1127_v33 = vmul.f32 %v1192_v19, %v2087_v44  ;;  %v577_v27 = vmul.f32 1.442695, %v550_v62 }
 0x1cd   :  { %1219 = vpow2.f32 %v573_v20  ;;  %v2226_v7 = vpop.xlane.xlu1 %978  ;;  %v1053_v21 = vmul.f32 %v2069_v37, %v2101_v36  ;;  %v1196_v41 = vpop.eup %1195  ;;  %v1104_v59 = vadd.f32 %v1194_v47, %v1192_v19  ;;  %v1126_v34 = vmul.f32 %v1194_v47, %v2089_v24 }
 0x1ce   :  { %v628_v63 = vadd.f32 %v627_v9, %v613_v1  ;;  %1221 = vpow2.f32 %v1092_v28  ;;  %v1198_v53 = vpop.eup %1197  ;;  %v1096_v58 = vmul.f32 1.442695, %v1068_v22  ;;  %v579_v42 = vmul.f32 1.442695, %v551_v49 }
 0x1cf   :  { %1223 = vpow2.f32 %v575_v17  ;;  %v2231_v46 = vpop.xlane.xlu0 %461  ;;  %v1069_v44 = vsub.f32 %v1053_v21, %v2143_v40  ;;  %v1200_v20 = vpop.eup %1199  ;;  %v1142_v43 = vadd.f32 %v1127_v33, %v1126_v34  ;;  %v1105_v50 = vadd.f32 %v1196_v41, %v1104_v59 }
 0x1d0   :  { %v1128_v25 = vmul.f32 %v1196_v41, %v2091_v16  ;;  %1225 = vpow2.f32 %v1094_v30  ;;  %v1202_v37 = vpop.eup %1201  ;;  %v2238_v24 = vmul.f32 1.442695, %v1071_v4  ;;  %v1129_v3 = vmul.f32 %v1198_v53, %v2103_v2 }
 0x1d1   :  { %v2241_v57 = vpop.xlane.xlu1 %981  ;;  %1227 = vpow2.f32 %v577_v27  ;;  %v552_v17 = vsub.f32 %v2165_v6, %v2097_v32  ;;  %v1204_v29 = vpop.eup %1203  ;;  %v1106_v48 = vadd.f32 %v1198_v53, %v1105_v50  ;;  %v1130_v16 = vmul.f32 %v1200_v20, %v2129_v39 }
 0x1d2   :  { %v1143_v52 = vadd.f32 %v1142_v43, %v1128_v25  ;;  %v1098_v51 = vmul.f32 1.442695, %v1069_v44  ;;  %v591_v61 = vadd.f32 %v1204_v29, %v590_v11  ;;  %v614_v45 = vmul.f32 %v1204_v29, %v2161_v0 }
 0x1d3   :  { %v1206_v62 = vpop.eup %1205  ;;  %v2247_v4 = vpop.xlane.xlu0 %464  ;;  %1229 = vpow2.f32 %v579_v42  ;;  %v581_v2 = vmul.f32 1.442695, %v552_v17  ;;  %v1107_v60 = vadd.f32 %v1200_v20, %v1106_v48  ;;  %v1131_v14 = vmul.f32 %v1202_v37, %v2147_v56 }
 0x1d4   :  { %v1208_v28 = vpop.eup %1207  ;;  %v1144_v18 = vadd.f32 %v1143_v52, %v1129_v3  ;;  %1231 = vpow2.f32 %v1096_v58  ;;  %v629_v12 = vadd.f32 %v628_v63, %v614_v45  ;;  %v1132_v0 = vmul.f32 %v1206_v62, %v2169_v23 }
 0x1d5   :  { %v1210_v6 = vpop.eup %1209  ;;  %v592_v54 = vadd.f32 %v1208_v28, %v591_v61  ;;  %v615_v39 = vmul.f32 %v1208_v28, %v2174_v35  ;;  %1233 = vpow2.f32 %v581_v2  ;;  %v1108_v22 = vadd.f32 %v1202_v37, %v1107_v60  ;;  %v985_v47 = vpop.xlane.xlu1 %984 }
 0x1d6   :  { %v1212_v1 = vpop.eup %1211  ;;  %v1145_v30 = vadd.f32 %v1144_v18, %v1130_v16  ;;  %v1054_v19 = vmul.f32 %v2062_v26, %v2101_v36  ;;  %v553_v27 = vsub.f32 %v2114_v15, %v2097_v32  ;;  %1235 = vpow2.f32 %v1098_v51 }
 0x1d7   :  { %v1214_v9 = vpop.eup %1213  ;;  %v630_v11 = vadd.f32 %v629_v12, %v615_v39  ;;  %v593_v49 = vadd.f32 %v1212_v1, %v592_v54  ;;  %v616_v56 = vmul.f32 %v1212_v1, %v2192_v31  ;;  %v468_v33 = vpop.xlane.xlu0 %467  ;;  %v1109_v41 = vadd.f32 %v1206_v62, %v1108_v22 }
 0x1d8   :  { %v1216_v35 = vpop.eup %1215  ;;  %v1146_v21 = vadd.f32 %v1145_v30, %v1131_v14  ;;  %v1070_v59 = vsub.f32 %v1054_v19, %v2143_v40  ;;  %v583_v36 = vmul.f32 1.442695, %v553_v27  ;;  %v1133_v42 = vmul.f32 %v1210_v6, %v2184_v38 }
 0x1d9   :  { %v1218_v23 = vpop.eup %1217  ;;  %v631_v34 = vadd.f32 %v630_v11, %v616_v56  ;;  %v594_v63 = vadd.f32 %v1216_v35, %v593_v49  ;;  %v617_v26 = vmul.f32 %v1216_v35, %v2205_v55  ;;  %v1110_v31 = vadd.f32 %v1210_v6, %v1109_v41  ;;  %v988_v38 = vpop.xlane.xlu1 %987 }
 0x1da   :  { %v1220_v53 = vpop.eup %1219  ;;  %v1147_v58 = vadd.f32 %v1146_v21, %v1132_v0  ;;  %v1100_v44 = vmul.f32 1.442695, %v1070_v59  ;;  %1237 = vpow2.f32 %v583_v36  ;;  %v1134_v3 = vmul.f32 %v1214_v9, %v2200_v5 }
 0x1db   :  { %v1222_v20 = vpop.eup %1221  ;;  %v632_v32 = vadd.f32 %v631_v34, %v617_v26  ;;  %v595_v15 = vadd.f32 %v1220_v53, %v594_v63  ;;  %v618_v43 = vmul.f32 %v1220_v53, %v2220_v10  ;;  %v471_v50 = vpop.xlane.xlu0 %470  ;;  %v1111_v37 = vadd.f32 %v1214_v9, %v1110_v31 }
 0x1dc   :  { %v1224_v40 = vpop.eup %1223  ;;  %v1148_v25 = vadd.f32 %v1147_v58, %v1133_v42  ;;  %1239 = vpow2.f32 %v1100_v44  ;;  %v1135_v10 = vmul.f32 %v1218_v23, %v2211_v13  ;;  %v1136_v18 = vmul.f32 %v1222_v20, %v2226_v7 }
 0x1dd   :  { %v1226_v55 = vpop.eup %1225  ;;  %v633_v17 = vadd.f32 %v632_v32, %v618_v43  ;;  %v596_v29 = vadd.f32 %v1224_v40, %v595_v15  ;;  %v619_v52 = vmul.f32 %v1224_v40, %v2231_v46  ;;  %1241 = vpow2.f32 %v2238_v24  ;;  %v991_v0 = vpop.xlane.xlu1 %990 }
 0x1de   :  { %v1228_v48 = vpop.eup %1227  ;;  %v1149_v16 = vadd.f32 %v1148_v25, %v1134_v3  ;;  %v1112_v51 = vadd.f32 %v1218_v23, %v1111_v37  ;;  %v1137_v1 = vmul.f32 %v1226_v55, %v2241_v57 }
 0x1df   :  { %v634_v62 = vadd.f32 %v633_v17, %v619_v52  ;;  %v597_v61 = vadd.f32 %v1228_v48, %v596_v29  ;;  %v620_v45 = vmul.f32 %v1228_v48, %v2247_v4  ;;  %v474_v60 = vpop.xlane.xlu0 %473  ;;  %v2293_v48 = vld [vmem:[#allocation3_spill] sm:$0xff] }
 0x1e0   :  { %v1230_v2 = vpop.eup %1229  ;;  %v1150_v5 = vadd.f32 %v1149_v16, %v1135_v10  ;;  %v1113_v28 = vadd.f32 %v1222_v20, %v1112_v51  ;;  %v149_v16 = vrot.slane %v2293_v48, 4 }
 0x1e1   :  { %v1232_v14 = vpop.eup %1231  ;;  %v635_v46 = vadd.f32 %v634_v62, %v620_v45  ;;  %v598_v6 = vadd.f32 %v1230_v2, %v597_v61  ;;  %v621_v12 = vmul.f32 %v1230_v2, %v468_v33  ;;  %v994_v34 = vpop.xlane.xlu1 %993 }
 0x1e2   :  { %v1234_v54 = vpop.eup %1233  ;;  %v1151_v24 = vadd.f32 %v1150_v5, %v1136_v18  ;;  %v1114_v39 = vadd.f32 %v1226_v55, %v1113_v28  ;;  %v1138_v9 = vmul.f32 %v1232_v14, %v985_v47  ;;  %v150_v28 = vadd.f32 %v149_v16, %v2293_v48 }
 0x1e3   :  { %v636_v13 = vadd.f32 %v635_v46, %v621_v12  ;;  %v599_v30 = vadd.f32 %v1234_v54, %v598_v6  ;;  %v622_v22 = vmul.f32 %v1234_v54, %v471_v50  ;;  %v1236_v11 = vpop.eup %1235  ;;  %v477_v35 = vpop.xlane.xlu0 %476 }
 0x1e4   :  { %v1152_v4 = vadd.f32 %v1151_v24, %v1137_v1  ;;  %v1115_v19 = vadd.f32 %v1232_v14, %v1114_v39  ;;  %v1139_v27 = vmul.f32 %v1236_v11, %v988_v38  ;;  %v624_v57 = vmul.f32 %v2216_v8, %v477_v35 }
 0x1e5   :  { %v637_v49 = vadd.f32 %v636_v13, %v622_v22  ;;  %v151_v46 = vrot.slane %v150_v28, 2 }
 0x1e6   :  { %v1153_v7 = vadd.f32 %v1152_v4, %v1138_v9  ;;  %v1116_v56 = vadd.f32 %v1236_v11, %v1115_v19  ;;  %v649_v19 = vstv %s2289_s8 }
 0x1e7   :  { %v1238_v21 = vpop.eup %1237  ;;  %v660_v58 = vpop.xlane.xlu0 %659  ;;  %v152_v24 = vadd.f32 %v151_v46, %v150_v28 }
 0x1e8   :  { %v1154_v33 = vadd.f32 %v1153_v7, %v1139_v27  ;;  %v600_v59 = vadd.f32 %v1238_v21, %v599_v30  ;;  %v623_v23 = vmul.f32 %v1238_v21, %v474_v60  ;;  %v663_v50 = vmax.f32 %v660_v58, 0.0 }
 0x1e9   :  { %v1240_v41 = vpop.eup %1239  ;;  %v153_v30 = vrot.slane %v152_v24, 1 }
 0x1ea   :  { %v1117_v63 = vadd.f32 %v1240_v41, %v1116_v56  ;;  %v1140_v26 = vmul.f32 %v1240_v41, %v991_v0  ;;  %v1242_v36 = vpop.eup %1241  ;;  %v601_v53 = vadd.f32 %v2216_v8, %v600_v59  ;;  %v638_v47 = vadd.f32 %v637_v49, %v623_v23  ;;  %v1248_v8 = vld [vmem:[%s2285_s3] sm:$0xff] }
 0x1eb   :  { %v1141_v44 = vmul.f32 %v1242_v36, %v994_v34  ;;  %v665_v29 = vmul.f32 %v1248_v8, %v663_v50  ;;  %v154_v56 = vadd.f32 %v153_v30, %v152_v24 }
 0x1ec   :  { %v1118_v31 = vadd.f32 %v1242_v36, %v1117_v63  ;;  %v1155_v42 = vadd.f32 %v1154_v33, %v1140_v26  ;;  %v602_v20 = vrot.slane %v601_v53, 4  ;;  %v639_v32 = vadd.f32 %v638_v47, %v624_v57 }
 0x1ed   :  { %v667_v45 = vrot.slane %v665_v29, 4 }
 0x1ee   :  { %v1119_v15 = vrot.slane %v1118_v31, 4  ;;  %v1156_v43 = vadd.f32 %v1155_v42, %v1141_v44  ;;  %v603_v40 = vadd.f32 %v602_v20, %v601_v53  ;;  %v640_v3 = vrot.slane %v639_v32, 4 }
 0x1ef   :  { %v668_v14 = vadd.f32 %v667_v45, %v665_v29 }
 0x1f0   :  { %v1120_v25 = vadd.f32 %v1119_v15, %v1118_v31  ;;  %v604_v37 = vrot.slane %v603_v40, 2  ;;  %v1157_v17 = vrot.slane %v1156_v43, 4  ;;  %v641_v10 = vadd.f32 %v640_v3, %v639_v32 }
 0x1f1   :  { %v669_v54 = vrot.slane %v668_v14, 2 }
 0x1f2   :  { %v1121_v55 = vrot.slane %v1120_v25, 2  ;;  %v605_v52 = vadd.f32 %v604_v37, %v603_v40  ;;  %v1158_v61 = vadd.f32 %v1157_v17, %v1156_v43  ;;  %v642_v18 = vrot.slane %v641_v10, 2 }
 0x1f3   :  { %v670_v13 = vadd.f32 %v669_v54, %v668_v14 }
 0x1f4   :  { %v1122_v38 = vadd.f32 %v1121_v55, %v1120_v25  ;;  %v606_v51 = vrot.slane %v605_v52, 1  ;;  %v1159_v60 = vrot.slane %v1158_v61, 2  ;;  %v643_v6 = vadd.f32 %v642_v18, %v641_v10 }
 0x1f5   :  { %v671_v9 = vrot.slane %v670_v13, 1 }
 0x1f6   :  { %v1123_v62 = vrot.slane %v1122_v38, 1  ;;  %v607_v2 = vadd.f32 %v606_v51, %v605_v52  ;;  %v1160_v12 = vadd.f32 %v1159_v60, %v1158_v61  ;;  %v644_v39 = vrot.slane %v643_v6, 1 }
 0x1f7   :  { %v672_v21 = vadd.f32 %v671_v9, %v670_v13 }
 0x1f8   :  { %v1124_v5 = vadd.f32 %v1123_v62, %v1122_v38  ;;  %1243 = vrcp.f32 %v607_v2  ;;  %v1161_v1 = vrot.slane %v1160_v12, 1  ;;  %v645_v22 = vadd.f32 %v644_v39, %v643_v6 }
 0x1fa   :  { %1245 = vrcp.f32 %v1124_v5  ;;  %v1162_v4 = vadd.f32 %v1161_v1, %v1160_v12 }
 0x205   :  { %v1244_v0 = vpop.eup %1243 }
 0x206   :  { %v648_v49 = vmul.f32 %v1244_v0, %v645_v22 }
 0x207   :  { %v1246_v11 = vpop.eup %1245 }
 0x208   :  { %v1165_v7 = vmul.f32 %v1246_v11, %v1162_v4  ;;  %v650_v27 = vmul.f32 %v649_v19, %v648_v49 }
 0x20a   :  { %v1166_v35 = vmul.f32 %v1165_v7, %v649_v19  ;;  %v651_v33 = vadd.f32 %v650_v27, %v154_v56 }
 0x20c   :  { %v1167_v41 = vadd.f32 %v1166_v35, %v672_v21  ;;  %v652_v59 = vadd.f32 1.0, %v651_v33 }
 0x20e   :  { %v1168_v23 = vadd.f32 1.0, %v1167_v41 }
 0x210   :  { %v1170_v34 = vsel %vm1169_vm1, %v652_v59, %v1168_v23 }
 0x211   :  { %1171 = vst [vmem:[%s2290_s9] sm:$0x3] %v1170_v34 }

</bundles_post_ra>
